<compile_context>
chip_gen: v7x
topology: tpu7x:2x2x1
jax: 0.10.0
libtpu: 0.0.40
codegen_flags: <defaults>
</compile_context>

<pallas_src>
import math
import functools

import jax
import jax.numpy as jnp
from jax import lax
from jax.experimental import pallas as pl
from jax.experimental.pallas import tpu as pltpu

_VMEM_LIMIT = 48 * 1024 * 1024   # safe on v5e/v6e (128 MiB) and v7x (64 MiB)


# ----------------------------------------------------------------------------
# Fused tap-conv kernel
#   out[b, l, :] = relu( sum_taps x_norm[b, l+shift, cin_slice] @ W[slice] + b )
#   optional prologue: x_norm = x*scale + shift   (folded BN of previous layer)
#   optional epilogue: per-batch per-channel (sum, sumsq) of the (post-ReLU)
#   output for the next layer's BN.
# ----------------------------------------------------------------------------

def _tap_conv_kernel(*refs, n_inputs, taps, pad, lout, cout_total,
                     has_norm, relu, want_stats):
    idx = 0
    x_refs = refs[idx:idx + n_inputs]; idx += n_inputs
    w_ref = refs[idx]; idx += 1
    b_ref = refs[idx]; idx += 1
    if has_norm:
        scale_ref = refs[idx]; shift_ref = refs[idx + 1]; idx += 2
    o_ref = refs[idx]; idx += 1
    s_ref = refs[idx] if want_stats else None

    # Load (+ normalize input 0) and zero-pad `pad` rows on both ends.
    xs = []
    for i, xr in enumerate(x_refs):
        x = xr[0]                                          # (L, Cin_i)
        if i == 0 and has_norm:
            xf = x.astype(jnp.float32) * scale_ref[0] + shift_ref[0]
            x = xf.astype(jnp.bfloat16)
        else:
            x = x.astype(jnp.bfloat16)
        if pad:
            z = jnp.zeros((pad, x.shape[1]), jnp.bfloat16)
            x = jnp.concatenate([z, x, z], axis=0)
        xs.append(x)

    acc = jnp.zeros((lout, cout_total), jnp.float32)
    for (shift, co0, con, parts) in taps:
        start = pad + shift                                # static, >= 0
        partial = None
        for (inp, ci0, cil, wrow) in parts:
            xsl = xs[inp][start:start + lout, ci0:ci0 + cil]
            wsl = w_ref[wrow:wrow + cil, co0:co0 + con]
            p = jnp.dot(xsl, wsl, preferred_element_type=jnp.float32)
            partial = p if partial is None else partial + p
        if co0 == 0 and con == cout_total:
            acc = acc + partial
        else:                                              # place into a cout slice
            pieces = []
            if co0 > 0:
                pieces.append(jnp.zeros((lout, co0), jnp.float32))
            pieces.append(partial)
            rem = cout_total - co0 - con
            if rem > 0:
                pieces.append(jnp.zeros((lout, rem), jnp.float32))
            acc = acc + (pieces[0] if len(pieces) == 1
                         else jnp.concatenate(pieces, axis=1))

    acc = acc + b_ref[0]                                   # (1, N) broadcast
    if relu:
        acc = jnp.maximum(acc, 0.0)
    o_ref[0] = acc.astype(o_ref.dtype)
    if want_stats:
        ssum = jnp.sum(acc, axis=0, keepdims=True)
        ssq = jnp.sum(acc * acc, axis=0, keepdims=True)
        s_ref[0] = jnp.concatenate([ssum, ssq], axis=0)    # (2, N)


def tap_conv(inputs, w, b, taps, *, pad, scale=None, shift=None,
             relu=False, want_stats=False, out_dtype=jnp.bfloat16):
    """inputs: list of (B, L, Cin_i); w: packed (rows, cout_total); b: (cout_total,).
    taps: static tuple of (row_shift, cout_start, cout_len, parts) with
    parts = ((input_idx, cin_start, cin_len, weight_row_start), ...)."""
    B, L, _ = inputs[0].shape
    cout_total = w.shape[1]
    has_norm = scale is not None
    n_inputs = len(inputs)

    in_specs, args = [], []
    for xi in inputs:
        in_specs.append(pl.BlockSpec((1, L, xi.shape[-1]), lambda bb: (bb, 0, 0)))
        args.append(xi)
    in_specs.append(pl.BlockSpec(w.shape, lambda bb: (0, 0)))
    args.append(w)
    in_specs.append(pl.BlockSpec((1, 1, cout_total), lambda bb: (0, 0, 0)))
    args.append(b.astype(jnp.float32).reshape(1, 1, cout_total))
    if has_norm:
        cin0 = inputs[0].shape[-1]
        in_specs.append(pl.BlockSpec((1, 1, cin0), lambda bb: (0, 0, 0)))
        args.append(scale.astype(jnp.float32).reshape(1, 1, cin0))
        in_specs.append(pl.BlockSpec((1, 1, cin0), lambda bb: (bb, 0, 0)))
        args.append(shift.astype(jnp.float32).reshape(B, 1, cin0))

    main_shape = jax.ShapeDtypeStruct((B, L, cout_total), out_dtype)
    main_spec = pl.BlockSpec((1, L, cout_total), lambda bb: (bb, 0, 0))
    if want_stats:
        out_shape = (main_shape,
                     jax.ShapeDtypeStruct((B, 2, cout_total), jnp.float32))
        out_specs = (main_spec,
                     pl.BlockSpec((1, 2, cout_total), lambda bb: (bb, 0, 0)))
    else:
        out_shape, out_specs = main_shape, main_spec

    kern = functools.partial(
        _tap_conv_kernel, n_inputs=n_inputs, taps=taps, pad=pad, lout=L,
        cout_total=cout_total, has_norm=has_norm, relu=relu,
        want_stats=want_stats)

    return pl.pallas_call(
        kern,
        grid=(B,),
        in_specs=in_specs,
        out_specs=out_specs,
        out_shape=out_shape,
        compiler_params=pltpu.CompilerParams(
            dimension_semantics=("parallel",),
            vmem_limit_bytes=_VMEM_LIMIT),
    )(*args)


# ----------------------------------------------------------------------------
# Static tap descriptions
# ----------------------------------------------------------------------------

def _dense_taps(cin, cout):
    # plain matmul / K=1 conv
    return ((0, 0, cout, ((0, 0, cin, 0),)),)


def _conv3_taps(cins, cout):
    # K=3 stride=1 pad=1 conv over (possibly several concatenated) inputs.
    ctot = sum(cins)
    taps = []
    for k in range(3):
        parts, off = [], 0
        for i, ci in enumerate(cins):
            parts.append((i, 0, ci, k * ctot + off))
            off += ci
        taps.append((k - 1, 0, cout, tuple(parts)))
    return tuple(taps)


def _down4_taps(cin, cout):
    # Conv1d(K=4, stride=2, pad=1) on the even/odd phase reshape (.., L/2, 2*cin):
    #   out[m] = xo[m-1]@w0 + xe[m]@w1 + xo[m]@w2 + xe[m+1]@w3
    # weight packed as rows [w0; w1; w2; w3]  -> (4*cin, cout), no zero blocks.
    return ((-1, 0, cout, ((0, cin, cin, 0),)),
            (0, 0, cout, ((0, 0, 2 * cin, cin),)),
            (1, 0, cout, ((0, 0, cin, 3 * cin),)))


def _up4_taps(cin, cout):
    # ConvTranspose1d(K=4, stride=2, pad=1), true polyphase:
    #   ye[m] = x[m-1]@w3 + x[m]@w1 ;  yo[m] = x[m]@w2 + x[m+1]@w0
    # output has 2*cout lanes [ye|yo]; weight packed (3*cin, 2*cout) with the
    # edge taps occupying only their cout half (zeros never reach the MXU).
    return ((-1, 0, cout, ((0, 0, cin, 0),)),
            (0, 0, 2 * cout, ((0, 0, cin, cin),)),
            (1, cout, cout, ((0, 0, cin, 2 * cin),)))


# ----------------------------------------------------------------------------
# TSDUNet forward
# ----------------------------------------------------------------------------

def make_pos_table(n_dim, n_step):
    position = jnp.arange(n_step, dtype=jnp.float32)
    div_term = jnp.exp(jnp.arange(0, n_dim, 2, dtype=jnp.float32)
                       * (-math.log(10000.0) / n_dim))
    args = div_term[:, None] * position[None, :]
    tab = jnp.zeros((n_step, n_dim), jnp.float32)
    tab = tab.at[:, 0::2].set(jnp.sin(args).T)
    tab = tab.at[:, 1::2].set(jnp.cos(args).T)
    return tab


def init_params(key, in_dim, n_dim, n_layer):
    keys = iter(jax.random.split(key, 1024))

    def w(shape, fan_in):
        # matmul-ready layouts, stored bf16 (MXU input dtype).
        # (PyTorch Conv1d weight (Cout,Cin,K) maps to rows [k*Cin+cin] here.)
        return (jax.random.normal(next(keys), shape, jnp.float32)
                / math.sqrt(fan_in)).astype(jnp.bfloat16)

    def bvec(n):
        return jax.random.normal(next(keys), (n,), jnp.float32) * 0.01

    pos_ws, pos_bs = [], []

    def block_params(cin_conv, cout, block_type):
        pos_ws.append(w((n_dim, cout), n_dim))
        pos_bs.append(bvec(cout))
        p = dict(
            wa=w((3 * cin_conv, cout), 3 * cin_conv), ba=bvec(cout),
            wb=w((3 * cout, cout), 3 * cout), bb=bvec(cout),
            gamma0=jnp.ones((cout,), jnp.float32), beta0=jnp.zeros((cout,), jnp.float32),
            gamma1=jnp.ones((cout,), jnp.float32), beta1=jnp.zeros((cout,), jnp.float32),
        )
        w4 = w((4, cout, cout), 4 * cout)          # (K, Cin, Cout)
        bt = bvec(cout)
        if block_type == 'down':
            p['wt'] = w4.reshape(4 * cout, cout)   # rows [w0; w1; w2; w3]
            p['bt'] = bt
        else:
            z = jnp.zeros((cout, cout), w4.dtype)
            top = jnp.concatenate([w4[3], z], axis=1)            # [w3 | 0]
            mid = jnp.concatenate([w4[1], w4[2]], axis=1)        # [w1 | w2]
            bot = jnp.concatenate([z, w4[0]], axis=1)            # [0  | w0]
            p['wt'] = jnp.concatenate([top, mid, bot], axis=0)   # (3c, 2c)
            p['bt'] = jnp.concatenate([bt, bt], axis=0)
        return p

    params = {
        'lin_w': w((n_dim, n_dim), n_dim), 'lin_b': bvec(n_dim),
        'conv00_w': w((3 * in_dim, n_dim), 3 * in_dim), 'conv00_b': bvec(n_dim),
        'down': [], 'up': [],
    }
    cin = n_dim
    for _ in range(n_layer):
        cout = cin * 2
        params['down'].append(block_params(cin, cout, 'down'))
        cin = cout
    for _ in range(n_layer):
        cout = cin // 2
        params['up'].append(block_params(2 * cin, cout, 'up'))   # channel concat
        cin = cout
    params['conv01_w'] = w((cin, in_dim), cin)
    params['conv01_b'] = bvec(in_dim)
    # batched per-block positional MLPs, built ONCE at init
    params['pos_w_all'] = jnp.concatenate(pos_ws, axis=1)
    params['pos_b_all'] = jnp.concatenate(pos_bs, axis=0)
    return params


def _bn_affine(stats, gamma, beta, count, eps=1e-5):
    """Turn (B, 2, C) sum/sumsq partials into the BN affine (scale, shift)."""
    tot = jnp.sum(stats, axis=0)                       # (2, C) f32, tiny
    mean = tot[0] / count
    var = jnp.maximum(tot[1] / count - mean * mean, 0.0)   # biased (train mode)
    inv = lax.rsqrt(var + eps)
    scale = gamma * inv
    shift = beta - mean * scale
    return scale, shift


def block_forward(h_inputs, te_blk, blk, block_type):
    B, L, _ = h_inputs[0].shape
    cout = blk['ba'].shape[0]
    cins = [h.shape[-1] for h in h_inputs]

    # conv_00 -> ReLU  (+ BN0 stats in the epilogue)
    h1, s1 = tap_conv(h_inputs, blk['wa'], blk['ba'], _conv3_taps(cins, cout),
                      pad=1, relu=True, want_stats=True)
    scale0, shift0 = _bn_affine(s1, blk['gamma0'], blk['beta0'], B * L)
    shift0b = shift0[None, :] + te_blk                 # fold the te broadcast add

    # BN0+te applied in the prologue, conv_01 -> ReLU (+ BN1 stats)
    h2, s2 = tap_conv([h1], blk['wb'], blk['bb'], _conv3_taps([cout], cout),
                      pad=1, scale=scale0, shift=shift0b, relu=True,
                      want_stats=True)
    scale1, shift1 = _bn_affine(s2, blk['gamma1'], blk['beta1'], B * L)
    shift1b = jnp.broadcast_to(shift1[None, :], (B, cout))

    # BN1 applied in the prologue of transform_00
    if block_type == 'down':
        h2p = h2.reshape(B, L // 2, 2 * cout)          # contiguous phase reshape
        scale_t = jnp.concatenate([scale1, scale1], axis=0)
        shift_t = jnp.concatenate([shift1b, shift1b], axis=1)
        return tap_conv([h2p], blk['wt'], blk['bt'], _down4_taps(cout, cout),
                        pad=1, scale=scale_t, shift=shift_t)       # (B, L/2, c)
    out2 = tap_conv([h2], blk['wt'], blk['bt'], _up4_taps(cout, cout),
                    pad=1, scale=scale1, shift=shift1b)            # (B, L, 2c)
    return out2.reshape(B, 2 * L, cout)                # interleave phases


def tsd_unet_forward(x_ncl, t, params, pos_table):
    B = x_ncl.shape[0]
    in_dim = x_ncl.shape[1]
    n_dim = params['lin_b'].shape[0]

    x = jnp.transpose(x_ncl, (0, 2, 1)).astype(jnp.bfloat16)     # NCL -> NLC

    # positional embedding: table lookup -> Linear -> ReLU (one tiny matmul)
    pe = pos_table[t].astype(jnp.float32)                        # (B, n_dim)
    te_base = tap_conv([pe[None]], params['lin_w'], params['lin_b'],
                       _dense_taps(n_dim, n_dim), pad=0, relu=True,
                       out_dtype=jnp.float32)[0]
    # all per-block pos-MLPs in one matmul
    n_all = params['pos_b_all'].shape[0]
    te_all = tap_conv([te_base[None]], params['pos_w_all'], params['pos_b_all'],
                      _dense_taps(n_dim, n_all), pad=0, relu=True,
                      out_dtype=jnp.float32)[0]                  # (B, sum cout)

    blocks = params['down'] + params['up']
    te_slices, off = [], 0
    for blk in blocks:
        c = blk['ba'].shape[0]
        te_slices.append(te_all[:, off:off + c])
        off += c

    # stem conv
    h = tap_conv([x], params['conv00_w'], params['conv00_b'],
                 _conv3_taps([in_dim], n_dim), pad=1)

    residuals, idx = [], 0
    for blk in params['down']:
        h = block_forward([h], te_slices[idx], blk, 'down'); idx += 1
        residuals.append(h)
    for blk in params['up']:
        r = residuals.pop()
        # skip concat fused: h and r are two inputs of the conv kernel
        h = block_forward([h, r], te_slices[idx], blk, 'up'); idx += 1

    out = tap_conv([h], params['conv01_w'], params['conv01_b'],
                   _dense_taps(h.shape[-1], in_dim), pad=0,
                   out_dtype=jnp.float32)
    return jnp.transpose(out, (0, 2, 1))                          # back to NCL


if __name__ == "__main__":
    in_dim, n_dim, n_layer, n_step = 4, 16, 2, 40
    B, L = 2, 16                                  # L divisible by 2**n_layer

    key = jax.random.PRNGKey(0)
    kx, kt, kp = jax.random.split(key, 3)
    x = jax.random.normal(kx, (B, in_dim, L), jnp.float32)
    t = jax.random.randint(kt, (B,), 0, n_step)

    params = init_params(kp, in_dim, n_dim, n_layer)
    pos_table = make_pos_table(n_dim, n_step)

    fwd = jax.jit(functools.partial(tsd_unet_forward, pos_table=pos_table))
    out = fwd(x, t, params)
    jax.block_until_ready(out)
    assert out.shape == (B, in_dim, L) and out.dtype == jnp.float32
    print("KERNEL_OK")
</pallas_src>

<mosaic_0001>
module attributes {stable_mosaic.version = 11 : i64} {
  func.func @_tap_conv_kernel(%arg0: i32, %arg1: memref<1x2x16xf32, #tpu.memory_space<vmem>>, %arg2: memref<16x16xbf16, #tpu.memory_space<vmem>>, %arg3: memref<1x1x16xf32, #tpu.memory_space<vmem>>, %arg4: memref<1x2x16xf32, #tpu.memory_space<vmem>>) attributes {dimension_semantics = [#tpu.dimension_semantics<parallel>], iteration_bounds = array<i64: 1>, scalar_prefetch = 0 : i64, scratch_operands = 0 : i64, tpu.core_type = #tpu.core_type<tc>, window_params = [{transform_indices = @transform_0, window_bounds = array<i64: 1, 2, 16>}, {pipeline_mode = #tpu.pipeline_mode<synchronous>, transform_indices = @transform_1, window_bounds = array<i64: 16, 16>}, {pipeline_mode = #tpu.pipeline_mode<synchronous>, transform_indices = @transform_2, window_bounds = array<i64: 1, 1, 16>}, {transform_indices = @transform_3, window_bounds = array<i64: 1, 2, 16>}]} {
    %c0 = arith.constant 0 : index
    %c0_0 = arith.constant 0 : index
    %c0_1 = arith.constant 0 : index
    %0 = vector.load %arg1[%c0, %c0_0, %c0_1] : memref<1x2x16xf32, #tpu.memory_space<vmem>>, vector<1x2x16xf32>
    %1 = vector.shape_cast %0 : vector<1x2x16xf32> to vector<2x16xf32>
    %2 = arith.truncf %1 : vector<2x16xf32> to vector<2x16xbf16>
    %cst = arith.constant 0.000000e+00 : f32
    %3 = vector.broadcast %cst : f32 to vector<2x16xf32>
    %c0_2 = arith.constant 0 : index
    %c0_3 = arith.constant 0 : index
    %4 = vector.load %arg2[%c0_2, %c0_3] : memref<16x16xbf16, #tpu.memory_space<vmem>>, vector<16x16xbf16>
    %cst_4 = arith.constant dense<0.000000e+00> : vector<2x16xf32>
    %5 = tpu.matmul %2, %4, %cst_4 {dimension_numbers = #tpu.dot_dimension_numbers<[1], [0], [0], [1], [0, 0, 1, 1], [], []>} : vector<2x16xbf16>, vector<16x16xbf16>, vector<2x16xf32> -> vector<2x16xf32>
    %6 = arith.addf %3, %5 : vector<2x16xf32>
    %c0_5 = arith.constant 0 : index
    %c0_6 = arith.constant 0 : index
    %c0_7 = arith.constant 0 : index
    %7 = vector.load %arg3[%c0_5, %c0_6, %c0_7] : memref<1x1x16xf32, #tpu.memory_space<vmem>>, vector<1x1x16xf32>
    %8 = vector.shape_cast %7 : vector<1x1x16xf32> to vector<1x16xf32>
    %9 = vector.broadcast %8 : vector<1x16xf32> to vector<2x16xf32>
    %10 = arith.addf %6, %9 : vector<2x16xf32>
    %cst_8 = arith.constant 0.000000e+00 : f32
    %11 = vector.broadcast %cst_8 : f32 to vector<2x16xf32>
    %12 = arith.maximumf %10, %11 : vector<2x16xf32>
    %c0_9 = arith.constant 0 : index
    %c0_10 = arith.constant 0 : index
    %c0_11 = arith.constant 0 : index
    %13 = vector.load %arg4[%c0_9, %c0_10, %c0_11] : memref<1x2x16xf32, #tpu.memory_space<vmem>>, vector<1x2x16xf32>
    %14 = vector.shape_cast %13 : vector<1x2x16xf32> to vector<2x16xf32>
    %15 = vector.shape_cast %12 : vector<2x16xf32> to vector<1x2x16xf32>
    tpu.vector_store %arg4[%c0_9, %c0_10, %c0_11], %15 {strides = array<i32>} : memref<1x2x16xf32, #tpu.memory_space<vmem>>, vector<1x2x16xf32>,
    return
  }
  func.func @transform_0(%arg0: i32) -> (i32, i32, i32) {
    %c0_i32 = arith.constant 0 : i32
    %c0_i32_0 = arith.constant 0 : i32
    %c0_i32_1 = arith.constant 0 : i32
    return %arg0, %c0_i32, %c0_i32_0 : i32, i32, i32
  }
  func.func @transform_1(%arg0: i32) -> (i32, i32) {
    %c0_i32 = arith.constant 0 : i32
    %c0_i32_0 = arith.constant 0 : i32
    %c0_i32_1 = arith.constant 0 : i32
    return %c0_i32, %c0_i32_0 : i32, i32
  }
  func.func @transform_2(%arg0: i32) -> (i32, i32, i32) {
    %c0_i32 = arith.constant 0 : i32
    %c0_i32_0 = arith.constant 0 : i32
    %c0_i32_1 = arith.constant 0 : i32
    %c0_i32_2 = arith.constant 0 : i32
    return %c0_i32, %c0_i32_0, %c0_i32_1 : i32, i32, i32
  }
  func.func @transform_3(%arg0: i32) -> (i32, i32, i32) {
    %c0_i32 = arith.constant 0 : i32
    %c0_i32_0 = arith.constant 0 : i32
    %c0_i32_1 = arith.constant 0 : i32
    return %arg0, %c0_i32, %c0_i32_0 : i32, i32, i32
  }
}

module attributes {stable_mosaic.version = 11 : i64} {
  func.func @_tap_conv_kernel(%arg0: i32, %arg1: memref<1x2x16xf32, #tpu.memory_space<vmem>>, %arg2: memref<16x144xbf16, #tpu.memory_space<vmem>>, %arg3: memref<1x1x144xf32, #tpu.memory_space<vmem>>, %arg4: memref<1x2x144xf32, #tpu.memory_space<vmem>>) attributes {dimension_semantics = [#tpu.dimension_semantics<parallel>], iteration_bounds = array<i64: 1>, scalar_prefetch = 0 : i64, scratch_operands = 0 : i64, tpu.core_type = #tpu.core_type<tc>, window_params = [{transform_indices = @transform_0, window_bounds = array<i64: 1, 2, 16>}, {pipeline_mode = #tpu.pipeline_mode<synchronous>, transform_indices = @transform_1, window_bounds = array<i64: 16, 144>}, {pipeline_mode = #tpu.pipeline_mode<synchronous>, transform_indices = @transform_2, window_bounds = array<i64: 1, 1, 144>}, {transform_indices = @transform_3, window_bounds = array<i64: 1, 2, 144>}]} {
    %c0 = arith.constant 0 : index
    %c0_0 = arith.constant 0 : index
    %c0_1 = arith.constant 0 : index
    %0 = vector.load %arg1[%c0, %c0_0, %c0_1] : memref<1x2x16xf32, #tpu.memory_space<vmem>>, vector<1x2x16xf32>
    %1 = vector.shape_cast %0 : vector<1x2x16xf32> to vector<2x16xf32>
    %2 = arith.truncf %1 : vector<2x16xf32> to vector<2x16xbf16>
    %cst = arith.constant 0.000000e+00 : f32
    %3 = vector.broadcast %cst : f32 to vector<2x144xf32>
    %c0_2 = arith.constant 0 : index
    %c0_3 = arith.constant 0 : index
    %4 = vector.load %arg2[%c0_2, %c0_3] : memref<16x144xbf16, #tpu.memory_space<vmem>>, vector<16x144xbf16>
    %cst_4 = arith.constant dense<0.000000e+00> : vector<2x144xf32>
    %5 = tpu.matmul %2, %4, %cst_4 {dimension_numbers = #tpu.dot_dimension_numbers<[1], [0], [0], [1], [0, 0, 1, 1], [], []>} : vector<2x16xbf16>, vector<16x144xbf16>, vector<2x144xf32> -> vector<2x144xf32>
    %6 = arith.addf %3, %5 : vector<2x144xf32>
    %c0_5 = arith.constant 0 : index
    %c0_6 = arith.constant 0 : index
    %c0_7 = arith.constant 0 : index
    %7 = vector.load %arg3[%c0_5, %c0_6, %c0_7] : memref<1x1x144xf32, #tpu.memory_space<vmem>>, vector<1x1x144xf32>
    %8 = vector.shape_cast %7 : vector<1x1x144xf32> to vector<1x144xf32>
    %9 = vector.broadcast %8 : vector<1x144xf32> to vector<2x144xf32>
    %10 = arith.addf %6, %9 : vector<2x144xf32>
    %cst_8 = arith.constant 0.000000e+00 : f32
    %11 = vector.broadcast %cst_8 : f32 to vector<2x144xf32>
    %12 = arith.maximumf %10, %11 : vector<2x144xf32>
    %c0_9 = arith.constant 0 : index
    %c0_10 = arith.constant 0 : index
    %c0_11 = arith.constant 0 : index
    %13 = vector.load %arg4[%c0_9, %c0_10, %c0_11] : memref<1x2x144xf32, #tpu.memory_space<vmem>>, vector<1x2x144xf32>
    %14 = vector.shape_cast %13 : vector<1x2x144xf32> to vector<2x144xf32>
    %15 = vector.shape_cast %12 : vector<2x144xf32> to vector<1x2x144xf32>
    tpu.vector_store %arg4[%c0_9, %c0_10, %c0_11], %15 {strides = array<i32>} : memref<1x2x144xf32, #tpu.memory_space<vmem>>, vector<1x2x144xf32>,
    return
  }
  func.func @transform_0(%arg0: i32) -> (i32, i32, i32) {
    %c0_i32 = arith.constant 0 : i32
    %c0_i32_0 = arith.constant 0 : i32
    %c0_i32_1 = arith.constant 0 : i32
    return %arg0, %c0_i32, %c0_i32_0 : i32, i32, i32
  }
  func.func @transform_1(%arg0: i32) -> (i32, i32) {
    %c0_i32 = arith.constant 0 : i32
    %c0_i32_0 = arith.constant 0 : i32
    %c0_i32_1 = arith.constant 0 : i32
    return %c0_i32, %c0_i32_0 : i32, i32
  }
  func.func @transform_2(%arg0: i32) -> (i32, i32, i32) {
    %c0_i32 = arith.constant 0 : i32
    %c0_i32_0 = arith.constant 0 : i32
    %c0_i32_1 = arith.constant 0 : i32
    %c0_i32_2 = arith.constant 0 : i32
    return %c0_i32, %c0_i32_0, %c0_i32_1 : i32, i32, i32
  }
  func.func @transform_3(%arg0: i32) -> (i32, i32, i32) {
    %c0_i32 = arith.constant 0 : i32
    %c0_i32_0 = arith.constant 0 : i32
    %c0_i32_1 = arith.constant 0 : i32
    return %arg0, %c0_i32, %c0_i32_0 : i32, i32, i32
  }
}

module attributes {stable_mosaic.version = 11 : i64} {
  func.func @_tap_conv_kernel(%arg0: i32, %arg1: memref<1x16x4xbf16, #tpu.memory_space<vmem>>, %arg2: memref<12x16xbf16, #tpu.memory_space<vmem>>, %arg3: memref<1x1x16xf32, #tpu.memory_space<vmem>>, %arg4: memref<1x16x16xbf16, #tpu.memory_space<vmem>>) attributes {dimension_semantics = [#tpu.dimension_semantics<parallel>], iteration_bounds = array<i64: 2>, scalar_prefetch = 0 : i64, scratch_operands = 0 : i64, tpu.core_type = #tpu.core_type<tc>, window_params = [{transform_indices = @transform_0, window_bounds = array<i64: 1, 16, 4>}, {pipeline_mode = #tpu.pipeline_mode<synchronous>, transform_indices = @transform_1, window_bounds = array<i64: 12, 16>}, {pipeline_mode = #tpu.pipeline_mode<synchronous>, transform_indices = @transform_2, window_bounds = array<i64: 1, 1, 16>}, {transform_indices = @transform_3, window_bounds = array<i64: 1, 16, 16>}]} {
    %c0 = arith.constant 0 : index
    %c0_0 = arith.constant 0 : index
    %c0_1 = arith.constant 0 : index
    %0 = vector.load %arg1[%c0, %c0_0, %c0_1] : memref<1x16x4xbf16, #tpu.memory_space<vmem>>, vector<1x16x4xbf16>
    %1 = vector.shape_cast %0 : vector<1x16x4xbf16> to vector<16x4xbf16>
    %cst = arith.constant 0.000000e+00 : bf16
    %2 = vector.broadcast %cst : bf16 to vector<1x4xbf16>
    %3 = tpu.concatenate %2, %1, %2 in 0 : vector<1x4xbf16>, vector<16x4xbf16>, vector<1x4xbf16> -> vector<18x4xbf16>
    %cst_2 = arith.constant 0.000000e+00 : f32
    %4 = vector.broadcast %cst_2 : f32 to vector<16x16xf32>
    %5 = vector.extract_strided_slice %3 {offsets = [0, 0], sizes = [16, 4], strides = [1, 1]} : vector<18x4xbf16> to vector<16x4xbf16>
    %c0_3 = arith.constant 0 : index
    %c0_4 = arith.constant 0 : index
    %6 = vector.load %arg2[%c0_3, %c0_4] : memref<12x16xbf16, #tpu.memory_space<vmem>>, vector<4x16xbf16>
    %cst_5 = arith.constant dense<0.000000e+00> : vector<16x16xf32>
    %7 = tpu.matmul %5, %6, %cst_5 {dimension_numbers = #tpu.dot_dimension_numbers<[1], [0], [0], [1], [0, 0, 1, 1], [], []>} : vector<16x4xbf16>, vector<4x16xbf16>, vector<16x16xf32> -> vector<16x16xf32>
    %8 = arith.addf %4, %7 : vector<16x16xf32>
    %9 = vector.extract_strided_slice %3 {offsets = [1, 0], sizes = [16, 4], strides = [1, 1]} : vector<18x4xbf16> to vector<16x4xbf16>
    %c4 = arith.constant 4 : index
    %c0_6 = arith.constant 0 : index
    %10 = vector.load %arg2[%c4, %c0_6] : memref<12x16xbf16, #tpu.memory_space<vmem>>, vector<4x16xbf16>
    %cst_7 = arith.constant dense<0.000000e+00> : vector<16x16xf32>
    %11 = tpu.matmul %9, %10, %cst_7 {dimension_numbers = #tpu.dot_dimension_numbers<[1], [0], [0], [1], [0, 0, 1, 1], [], []>} : vector<16x4xbf16>, vector<4x16xbf16>, vector<16x16xf32> -> vector<16x16xf32>
    %12 = arith.addf %8, %11 : vector<16x16xf32>
    %13 = vector.extract_strided_slice %3 {offsets = [2, 0], sizes = [16, 4], strides = [1, 1]} : vector<18x4xbf16> to vector<16x4xbf16>
    %c8 = arith.constant 8 : index
    %c0_8 = arith.constant 0 : index
    %14 = vector.load %arg2[%c8, %c0_8] : memref<12x16xbf16, #tpu.memory_space<vmem>>, vector<4x16xbf16>
    %cst_9 = arith.constant dense<0.000000e+00> : vector<16x16xf32>
    %15 = tpu.matmul %13, %14, %cst_9 {dimension_numbers = #tpu.dot_dimension_numbers<[1], [0], [0], [1], [0, 0, 1, 1], [], []>} : vector<16x4xbf16>, vector<4x16xbf16>, vector<16x16xf32> -> vector<16x16xf32>
    %16 = arith.addf %12, %15 : vector<16x16xf32>
    %c0_10 = arith.constant 0 : index
    %c0_11 = arith.constant 0 : index
    %c0_12 = arith.constant 0 : index
    %17 = vector.load %arg3[%c0_10, %c0_11, %c0_12] : memref<1x1x16xf32, #tpu.memory_space<vmem>>, vector<1x1x16xf32>
    %18 = vector.shape_cast %17 : vector<1x1x16xf32> to vector<1x16xf32>
    %19 = vector.broadcast %18 : vector<1x16xf32> to vector<16x16xf32>
    %20 = arith.addf %16, %19 : vector<16x16xf32>
    %21 = arith.truncf %20 : vector<16x16xf32> to vector<16x16xbf16>
    %c0_13 = arith.constant 0 : index
    %c0_14 = arith.constant 0 : index
    %c0_15 = arith.constant 0 : index
    %22 = vector.load %arg4[%c0_13, %c0_14, %c0_15] : memref<1x16x16xbf16, #tpu.memory_space<vmem>>, vector<1x16x16xbf16>
    %23 = vector.shape_cast %22 : vector<1x16x16xbf16> to vector<16x16xbf16>
    %24 = vector.shape_cast %21 : vector<16x16xbf16> to vector<1x16x16xbf16>
    tpu.vector_store %arg4[%c0_13, %c0_14, %c0_15], %24 {strides = array<i32>} : memref<1x16x16xbf16, #tpu.memory_space<vmem>>, vector<1x16x16xbf16>,
    return
  }
  func.func @transform_0(%arg0: i32) -> (i32, i32, i32) {
    %c0_i32 = arith.constant 0 : i32
    %c0_i32_0 = arith.constant 0 : i32
    %c0_i32_1 = arith.constant 0 : i32
    return %arg0, %c0_i32, %c0_i32_0 : i32, i32, i32
  }
  func.func @transform_1(%arg0: i32) -> (i32, i32) {
    %c0_i32 = arith.constant 0 : i32
    %c0_i32_0 = arith.constant 0 : i32
    %c0_i32_1 = arith.constant 0 : i32
    return %c0_i32, %c0_i32_0 : i32, i32
  }
  func.func @transform_2(%arg0: i32) -> (i32, i32, i32) {
    %c0_i32 = arith.constant 0 : i32
    %c0_i32_0 = arith.constant 0 : i32
    %c0_i32_1 = arith.constant 0 : i32
    %c0_i32_2 = arith.constant 0 : i32
    return %c0_i32, %c0_i32_0, %c0_i32_1 : i32, i32, i32
  }
  func.func @transform_3(%arg0: i32) -> (i32, i32, i32) {
    %c0_i32 = arith.constant 0 : i32
    %c0_i32_0 = arith.constant 0 : i32
    %c0_i32_1 = arith.constant 0 : i32
    return %arg0, %c0_i32, %c0_i32_0 : i32, i32, i32
  }
}

module attributes {stable_mosaic.version = 11 : i64} {
  func.func @_tap_conv_kernel(%arg0: i32, %arg1: memref<1x16x16xbf16, #tpu.memory_space<vmem>>, %arg2: memref<48x32xbf16, #tpu.memory_space<vmem>>, %arg3: memref<1x1x32xf32, #tpu.memory_space<vmem>>, %arg4: memref<1x16x32xbf16, #tpu.memory_space<vmem>>, %arg5: memref<1x2x32xf32, #tpu.memory_space<vmem>>) attributes {dimension_semantics = [#tpu.dimension_semantics<parallel>], iteration_bounds = array<i64: 2>, scalar_prefetch = 0 : i64, scratch_operands = 0 : i64, tpu.core_type = #tpu.core_type<tc>, window_params = [{transform_indices = @transform_0, window_bounds = array<i64: 1, 16, 16>}, {pipeline_mode = #tpu.pipeline_mode<synchronous>, transform_indices = @transform_1, window_bounds = array<i64: 48, 32>}, {pipeline_mode = #tpu.pipeline_mode<synchronous>, transform_indices = @transform_2, window_bounds = array<i64: 1, 1, 32>}, {transform_indices = @transform_3, window_bounds = array<i64: 1, 16, 32>}, {transform_indices = @transform_4, window_bounds = array<i64: 1, 2, 32>}]} {
    %c0 = arith.constant 0 : index
    %c0_0 = arith.constant 0 : index
    %c0_1 = arith.constant 0 : index
    %0 = vector.load %arg1[%c0, %c0_0, %c0_1] : memref<1x16x16xbf16, #tpu.memory_space<vmem>>, vector<1x16x16xbf16>
    %1 = vector.shape_cast %0 : vector<1x16x16xbf16> to vector<16x16xbf16>
    %cst = arith.constant 0.000000e+00 : bf16
    %2 = vector.broadcast %cst : bf16 to vector<1x16xbf16>
    %3 = tpu.concatenate %2, %1, %2 in 0 : vector<1x16xbf16>, vector<16x16xbf16>, vector<1x16xbf16> -> vector<18x16xbf16>
    %cst_2 = arith.constant 0.000000e+00 : f32
    %4 = vector.broadcast %cst_2 : f32 to vector<16x32xf32>
    %5 = vector.extract_strided_slice %3 {offsets = [0, 0], sizes = [16, 16], strides = [1, 1]} : vector<18x16xbf16> to vector<16x16xbf16>
    %c0_3 = arith.constant 0 : index
    %c0_4 = arith.constant 0 : index
    %6 = vector.load %arg2[%c0_3, %c0_4] : memref<48x32xbf16, #tpu.memory_space<vmem>>, vector<16x32xbf16>
    %cst_5 = arith.constant dense<0.000000e+00> : vector<16x32xf32>
    %7 = tpu.matmul %5, %6, %cst_5 {dimension_numbers = #tpu.dot_dimension_numbers<[1], [0], [0], [1], [0, 0, 1, 1], [], []>} : vector<16x16xbf16>, vector<16x32xbf16>, vector<16x32xf32> -> vector<16x32xf32>
    %8 = arith.addf %4, %7 : vector<16x32xf32>
    %9 = vector.extract_strided_slice %3 {offsets = [1, 0], sizes = [16, 16], strides = [1, 1]} : vector<18x16xbf16> to vector<16x16xbf16>
    %c16 = arith.constant 16 : index
    %c0_6 = arith.constant 0 : index
    %10 = vector.load %arg2[%c16, %c0_6] : memref<48x32xbf16, #tpu.memory_space<vmem>>, vector<16x32xbf16>
    %cst_7 = arith.constant dense<0.000000e+00> : vector<16x32xf32>
    %11 = tpu.matmul %9, %10, %cst_7 {dimension_numbers = #tpu.dot_dimension_numbers<[1], [0], [0], [1], [0, 0, 1, 1], [], []>} : vector<16x16xbf16>, vector<16x32xbf16>, vector<16x32xf32> -> vector<16x32xf32>
    %12 = arith.addf %8, %11 : vector<16x32xf32>
    %13 = vector.extract_strided_slice %3 {offsets = [2, 0], sizes = [16, 16], strides = [1, 1]} : vector<18x16xbf16> to vector<16x16xbf16>
    %c32 = arith.constant 32 : index
    %c0_8 = arith.constant 0 : index
    %14 = vector.load %arg2[%c32, %c0_8] : memref<48x32xbf16, #tpu.memory_space<vmem>>, vector<16x32xbf16>
    %cst_9 = arith.constant dense<0.000000e+00> : vector<16x32xf32>
    %15 = tpu.matmul %13, %14, %cst_9 {dimension_numbers = #tpu.dot_dimension_numbers<[1], [0], [0], [1], [0, 0, 1, 1], [], []>} : vector<16x16xbf16>, vector<16x32xbf16>, vector<16x32xf32> -> vector<16x32xf32>
    %16 = arith.addf %12, %15 : vector<16x32xf32>
    %c0_10 = arith.constant 0 : index
    %c0_11 = arith.constant 0 : index
    %c0_12 = arith.constant 0 : index
    %17 = vector.load %arg3[%c0_10, %c0_11, %c0_12] : memref<1x1x32xf32, #tpu.memory_space<vmem>>, vector<1x1x32xf32>
    %18 = vector.shape_cast %17 : vector<1x1x32xf32> to vector<1x32xf32>
    %19 = vector.broadcast %18 : vector<1x32xf32> to vector<16x32xf32>
    %20 = arith.addf %16, %19 : vector<16x32xf32>
    %cst_13 = arith.constant 0.000000e+00 : f32
    %21 = vector.broadcast %cst_13 : f32 to vector<16x32xf32>
    %22 = arith.maximumf %20, %21 : vector<16x32xf32>
    %23 = arith.truncf %22 : vector<16x32xf32> to vector<16x32xbf16>
    %c0_14 = arith.constant 0 : index
    %c0_15 = arith.constant 0 : index
    %c0_16 = arith.constant 0 : index
    %24 = vector.load %arg4[%c0_14, %c0_15, %c0_16] : memref<1x16x32xbf16, #tpu.memory_space<vmem>>, vector<1x16x32xbf16>
    %25 = vector.shape_cast %24 : vector<1x16x32xbf16> to vector<16x32xbf16>
    %26 = vector.shape_cast %23 : vector<16x32xbf16> to vector<1x16x32xbf16>
    tpu.vector_store %arg4[%c0_14, %c0_15, %c0_16], %26 {strides = array<i32>} : memref<1x16x32xbf16, #tpu.memory_space<vmem>>, vector<1x16x32xbf16>,
    %cst_17 = arith.constant dense<0.000000e+00> : vector<32xf32>
    %27 = vector.multi_reduction <add>, %22, %cst_17 [0] : vector<16x32xf32> to vector<32xf32>
    %28 = vector.shape_cast %27 : vector<32xf32> to vector<1x32xf32>
    %29 = arith.mulf %22, %22 : vector<16x32xf32>
    %cst_18 = arith.constant dense<0.000000e+00> : vector<32xf32>
    %30 = vector.multi_reduction <add>, %29, %cst_18 [0] : vector<16x32xf32> to vector<32xf32>
    %31 = vector.shape_cast %30 : vector<32xf32> to vector<1x32xf32>
    %32 = tpu.concatenate %28, %31 in 0 : vector<1x32xf32>, vector<1x32xf32> -> vector<2x32xf32>
    %c0_19 = arith.constant 0 : index
    %c0_20 = arith.constant 0 : index
    %c0_21 = arith.constant 0 : index
    %33 = vector.load %arg5[%c0_19, %c0_20, %c0_21] : memref<1x2x32xf32, #tpu.memory_space<vmem>>, vector<1x2x32xf32>
    %34 = vector.shape_cast %33 : vector<1x2x32xf32> to vector<2x32xf32>
    %35 = vector.shape_cast %32 : vector<2x32xf32> to vector<1x2x32xf32>
    tpu.vector_store %arg5[%c0_19, %c0_20, %c0_21], %35 {strides = array<i32>} : memref<1x2x32xf32, #tpu.memory_space<vmem>>, vector<1x2x32xf32>,
    return
  }
  func.func @transform_0(%arg0: i32) -> (i32, i32, i32) {
    %c0_i32 = arith.constant 0 : i32
    %c0_i32_0 = arith.constant 0 : i32
    %c0_i32_1 = arith.constant 0 : i32
    return %arg0, %c0_i32, %c0_i32_0 : i32, i32, i32
  }
  func.func @transform_1(%arg0: i32) -> (i32, i32) {
    %c0_i32 = arith.constant 0 : i32
    %c0_i32_0 = arith.constant 0 : i32
    %c0_i32_1 = arith.constant 0 : i32
    return %c0_i32, %c0_i32_0 : i32, i32
  }
  func.func @transform_2(%arg0: i32) -> (i32, i32, i32) {
    %c0_i32 = arith.constant 0 : i32
    %c0_i32_0 = arith.constant 0 : i32
    %c0_i32_1 = arith.constant 0 : i32
    %c0_i32_2 = arith.constant 0 : i32
    return %c0_i32, %c0_i32_0, %c0_i32_1 : i32, i32, i32
  }
  func.func @transform_3(%arg0: i32) -> (i32, i32, i32) {
    %c0_i32 = arith.constant 0 : i32
    %c0_i32_0 = arith.constant 0 : i32
    %c0_i32_1 = arith.constant 0 : i32
    return %arg0, %c0_i32, %c0_i32_0 : i32, i32, i32
  }
  func.func @transform_4(%arg0: i32) -> (i32, i32, i32) {
    %c0_i32 = arith.constant 0 : i32
    %c0_i32_0 = arith.constant 0 : i32
    %c0_i32_1 = arith.constant 0 : i32
    return %arg0, %c0_i32, %c0_i32_0 : i32, i32, i32
  }
}

module attributes {stable_mosaic.version = 11 : i64} {
  func.func @_tap_conv_kernel(%arg0: i32, %arg1: memref<1x16x32xbf16, #tpu.memory_space<vmem>>, %arg2: memref<96x32xbf16, #tpu.memory_space<vmem>>, %arg3: memref<1x1x32xf32, #tpu.memory_space<vmem>>, %arg4: memref<1x1x32xf32, #tpu.memory_space<vmem>>, %arg5: memref<1x1x32xf32, #tpu.memory_space<vmem>>, %arg6: memref<1x16x32xbf16, #tpu.memory_space<vmem>>, %arg7: memref<1x2x32xf32, #tpu.memory_space<vmem>>) attributes {dimension_semantics = [#tpu.dimension_semantics<parallel>], iteration_bounds = array<i64: 2>, scalar_prefetch = 0 : i64, scratch_operands = 0 : i64, tpu.core_type = #tpu.core_type<tc>, window_params = [{transform_indices = @transform_0, window_bounds = array<i64: 1, 16, 32>}, {pipeline_mode = #tpu.pipeline_mode<synchronous>, transform_indices = @transform_1, window_bounds = array<i64: 96, 32>}, {pipeline_mode = #tpu.pipeline_mode<synchronous>, transform_indices = @transform_2, window_bounds = array<i64: 1, 1, 32>}, {pipeline_mode = #tpu.pipeline_mode<synchronous>, transform_indices = @transform_3, window_bounds = array<i64: 1, 1, 32>}, {transform_indices = @transform_4, window_bounds = array<i64: 1, 1, 32>}, {transform_indices = @transform_5, window_bounds = array<i64: 1, 16, 32>}, {transform_indices = @transform_6, window_bounds = array<i64: 1, 2, 32>}]} {
    %c0 = arith.constant 0 : index
    %c0_0 = arith.constant 0 : index
    %c0_1 = arith.constant 0 : index
    %0 = vector.load %arg1[%c0, %c0_0, %c0_1] : memref<1x16x32xbf16, #tpu.memory_space<vmem>>, vector<1x16x32xbf16>
    %1 = vector.shape_cast %0 : vector<1x16x32xbf16> to vector<16x32xbf16>
    %2 = arith.extf %1 : vector<16x32xbf16> to vector<16x32xf32>
    %c0_2 = arith.constant 0 : index
    %c0_3 = arith.constant 0 : index
    %c0_4 = arith.constant 0 : index
    %3 = vector.load %arg4[%c0_2, %c0_3, %c0_4] : memref<1x1x32xf32, #tpu.memory_space<vmem>>, vector<1x1x32xf32>
    %4 = vector.shape_cast %3 : vector<1x1x32xf32> to vector<1x32xf32>
    %5 = vector.broadcast %4 : vector<1x32xf32> to vector<16x32xf32>
    %6 = arith.mulf %2, %5 : vector<16x32xf32>
    %c0_5 = arith.constant 0 : index
    %c0_6 = arith.constant 0 : index
    %c0_7 = arith.constant 0 : index
    %7 = vector.load %arg5[%c0_5, %c0_6, %c0_7] : memref<1x1x32xf32, #tpu.memory_space<vmem>>, vector<1x1x32xf32>
    %8 = vector.shape_cast %7 : vector<1x1x32xf32> to vector<1x32xf32>
    %9 = vector.broadcast %8 : vector<1x32xf32> to vector<16x32xf32>
    %10 = arith.addf %6, %9 : vector<16x32xf32>
    %11 = arith.truncf %10 : vector<16x32xf32> to vector<16x32xbf16>
    %cst = arith.constant 0.000000e+00 : bf16
    %12 = vector.broadcast %cst : bf16 to vector<1x32xbf16>
    %13 = tpu.concatenate %12, %11, %12 in 0 : vector<1x32xbf16>, vector<16x32xbf16>, vector<1x32xbf16> -> vector<18x32xbf16>
    %cst_8 = arith.constant 0.000000e+00 : f32
    %14 = vector.broadcast %cst_8 : f32 to vector<16x32xf32>
    %15 = vector.extract_strided_slice %13 {offsets = [0, 0], sizes = [16, 32], strides = [1, 1]} : vector<18x32xbf16> to vector<16x32xbf16>
    %c0_9 = arith.constant 0 : index
    %c0_10 = arith.constant 0 : index
    %16 = vector.load %arg2[%c0_9, %c0_10] : memref<96x32xbf16, #tpu.memory_space<vmem>>, vector<32x32xbf16>
    %cst_11 = arith.constant dense<0.000000e+00> : vector<16x32xf32>
    %17 = tpu.matmul %15, %16, %cst_11 {dimension_numbers = #tpu.dot_dimension_numbers<[1], [0], [0], [1], [0, 0, 1, 1], [], []>} : vector<16x32xbf16>, vector<32x32xbf16>, vector<16x32xf32> -> vector<16x32xf32>
    %18 = arith.addf %14, %17 : vector<16x32xf32>
    %19 = vector.extract_strided_slice %13 {offsets = [1, 0], sizes = [16, 32], strides = [1, 1]} : vector<18x32xbf16> to vector<16x32xbf16>
    %c32 = arith.constant 32 : index
    %c0_12 = arith.constant 0 : index
    %20 = vector.load %arg2[%c32, %c0_12] : memref<96x32xbf16, #tpu.memory_space<vmem>>, vector<32x32xbf16>
    %cst_13 = arith.constant dense<0.000000e+00> : vector<16x32xf32>
    %21 = tpu.matmul %19, %20, %cst_13 {dimension_numbers = #tpu.dot_dimension_numbers<[1], [0], [0], [1], [0, 0, 1, 1], [], []>} : vector<16x32xbf16>, vector<32x32xbf16>, vector<16x32xf32> -> vector<16x32xf32>
    %22 = arith.addf %18, %21 : vector<16x32xf32>
    %23 = vector.extract_strided_slice %13 {offsets = [2, 0], sizes = [16, 32], strides = [1, 1]} : vector<18x32xbf16> to vector<16x32xbf16>
    %c64 = arith.constant 64 : index
    %c0_14 = arith.constant 0 : index
    %24 = vector.load %arg2[%c64, %c0_14] : memref<96x32xbf16, #tpu.memory_space<vmem>>, vector<32x32xbf16>
    %cst_15 = arith.constant dense<0.000000e+00> : vector<16x32xf32>
    %25 = tpu.matmul %23, %24, %cst_15 {dimension_numbers = #tpu.dot_dimension_numbers<[1], [0], [0], [1], [0, 0, 1, 1], [], []>} : vector<16x32xbf16>, vector<32x32xbf16>, vector<16x32xf32> -> vector<16x32xf32>
    %26 = arith.addf %22, %25 : vector<16x32xf32>
    %c0_16 = arith.constant 0 : index
    %c0_17 = arith.constant 0 : index
    %c0_18 = arith.constant 0 : index
    %27 = vector.load %arg3[%c0_16, %c0_17, %c0_18] : memref<1x1x32xf32, #tpu.memory_space<vmem>>, vector<1x1x32xf32>
    %28 = vector.shape_cast %27 : vector<1x1x32xf32> to vector<1x32xf32>
    %29 = vector.broadcast %28 : vector<1x32xf32> to vector<16x32xf32>
    %30 = arith.addf %26, %29 : vector<16x32xf32>
    %cst_19 = arith.constant 0.000000e+00 : f32
    %31 = vector.broadcast %cst_19 : f32 to vector<16x32xf32>
    %32 = arith.maximumf %30, %31 : vector<16x32xf32>
    %33 = arith.truncf %32 : vector<16x32xf32> to vector<16x32xbf16>
    %c0_20 = arith.constant 0 : index
    %c0_21 = arith.constant 0 : index
    %c0_22 = arith.constant 0 : index
    %34 = vector.load %arg6[%c0_20, %c0_21, %c0_22] : memref<1x16x32xbf16, #tpu.memory_space<vmem>>, vector<1x16x32xbf16>
    %35 = vector.shape_cast %34 : vector<1x16x32xbf16> to vector<16x32xbf16>
    %36 = vector.shape_cast %33 : vector<16x32xbf16> to vector<1x16x32xbf16>
    tpu.vector_store %arg6[%c0_20, %c0_21, %c0_22], %36 {strides = array<i32>} : memref<1x16x32xbf16, #tpu.memory_space<vmem>>, vector<1x16x32xbf16>,
    %cst_23 = arith.constant dense<0.000000e+00> : vector<32xf32>
    %37 = vector.multi_reduction <add>, %32, %cst_23 [0] : vector<16x32xf32> to vector<32xf32>
    %38 = vector.shape_cast %37 : vector<32xf32> to vector<1x32xf32>
    %39 = arith.mulf %32, %32 : vector<16x32xf32>
    %cst_24 = arith.constant dense<0.000000e+00> : vector<32xf32>
    %40 = vector.multi_reduction <add>, %39, %cst_24 [0] : vector<16x32xf32> to vector<32xf32>
    %41 = vector.shape_cast %40 : vector<32xf32> to vector<1x32xf32>
    %42 = tpu.concatenate %38, %41 in 0 : vector<1x32xf32>, vector<1x32xf32> -> vector<2x32xf32>
    %c0_25 = arith.constant 0 : index
    %c0_26 = arith.constant 0 : index
    %c0_27 = arith.constant 0 : index
    %43 = vector.load %arg7[%c0_25, %c0_26, %c0_27] : memref<1x2x32xf32, #tpu.memory_space<vmem>>, vector<1x2x32xf32>
    %44 = vector.shape_cast %43 : vector<1x2x32xf32> to vector<2x32xf32>
    %45 = vector.shape_cast %42 : vector<2x32xf32> to vector<1x2x32xf32>
    tpu.vector_store %arg7[%c0_25, %c0_26, %c0_27], %45 {strides = array<i32>} : memref<1x2x32xf32, #tpu.memory_space<vmem>>, vector<1x2x32xf32>,
    return
  }
  func.func @transform_0(%arg0: i32) -> (i32, i32, i32) {
    %c0_i32 = arith.constant 0 : i32
    %c0_i32_0 = arith.constant 0 : i32
    %c0_i32_1 = arith.constant 0 : i32
    return %arg0, %c0_i32, %c0_i32_0 : i32, i32, i32
  }
  func.func @transform_1(%arg0: i32) -> (i32, i32) {
    %c0_i32 = arith.constant 0 : i32
    %c0_i32_0 = arith.constant 0 : i32
    %c0_i32_1 = arith.constant 0 : i32
    return %c0_i32, %c0_i32_0 : i32, i32
  }
  func.func @transform_2(%arg0: i32) -> (i32, i32, i32) {
    %c0_i32 = arith.constant 0 : i32
    %c0_i32_0 = arith.constant 0 : i32
    %c0_i32_1 = arith.constant 0 : i32
    %c0_i32_2 = arith.constant 0 : i32
    return %c0_i32, %c0_i32_0, %c0_i32_1 : i32, i32, i32
  }
  func.func @transform_3(%arg0: i32) -> (i32, i32, i32) {
    %c0_i32 = arith.constant 0 : i32
    %c0_i32_0 = arith.constant 0 : i32
    %c0_i32_1 = arith.constant 0 : i32
    %c0_i32_2 = arith.constant 0 : i32
    return %c0_i32, %c0_i32_0, %c0_i32_1 : i32, i32, i32
  }
  func.func @transform_4(%arg0: i32) -> (i32, i32, i32) {
    %c0_i32 = arith.constant 0 : i32
    %c0_i32_0 = arith.constant 0 : i32
    %c0_i32_1 = arith.constant 0 : i32
    return %arg0, %c0_i32, %c0_i32_0 : i32, i32, i32
  }
  func.func @transform_5(%arg0: i32) -> (i32, i32, i32) {
    %c0_i32 = arith.constant 0 : i32
    %c0_i32_0 = arith.constant 0 : i32
    %c0_i32_1 = arith.constant 0 : i32
    return %arg0, %c0_i32, %c0_i32_0 : i32, i32, i32
  }
  func.func @transform_6(%arg0: i32) -> (i32, i32, i32) {
    %c0_i32 = arith.constant 0 : i32
    %c0_i32_0 = arith.constant 0 : i32
    %c0_i32_1 = arith.constant 0 : i32
    return %arg0, %c0_i32, %c0_i32_0 : i32, i32, i32
  }
}

module attributes {stable_mosaic.version = 11 : i64} {
  func.func @_tap_conv_kernel(%arg0: i32, %arg1: memref<1x8x32xbf16, #tpu.memory_space<vmem>>, %arg2: memref<96x64xbf16, #tpu.memory_space<vmem>>, %arg3: memref<1x1x64xf32, #tpu.memory_space<vmem>>, %arg4: memref<1x8x64xbf16, #tpu.memory_space<vmem>>, %arg5: memref<1x2x64xf32, #tpu.memory_space<vmem>>) attributes {dimension_semantics = [#tpu.dimension_semantics<parallel>], iteration_bounds = array<i64: 2>, scalar_prefetch = 0 : i64, scratch_operands = 0 : i64, tpu.core_type = #tpu.core_type<tc>, window_params = [{transform_indices = @transform_0, window_bounds = array<i64: 1, 8, 32>}, {pipeline_mode = #tpu.pipeline_mode<synchronous>, transform_indices = @transform_1, window_bounds = array<i64: 96, 64>}, {pipeline_mode = #tpu.pipeline_mode<synchronous>, transform_indices = @transform_2, window_bounds = array<i64: 1, 1, 64>}, {transform_indices = @transform_3, window_bounds = array<i64: 1, 8, 64>}, {transform_indices = @transform_4, window_bounds = array<i64: 1, 2, 64>}]} {
    %c0 = arith.constant 0 : index
    %c0_0 = arith.constant 0 : index
    %c0_1 = arith.constant 0 : index
    %0 = vector.load %arg1[%c0, %c0_0, %c0_1] : memref<1x8x32xbf16, #tpu.memory_space<vmem>>, vector<1x8x32xbf16>
    %1 = vector.shape_cast %0 : vector<1x8x32xbf16> to vector<8x32xbf16>
    %cst = arith.constant 0.000000e+00 : bf16
    %2 = vector.broadcast %cst : bf16 to vector<1x32xbf16>
    %3 = tpu.concatenate %2, %1, %2 in 0 : vector<1x32xbf16>, vector<8x32xbf16>, vector<1x32xbf16> -> vector<10x32xbf16>
    %cst_2 = arith.constant 0.000000e+00 : f32
    %4 = vector.broadcast %cst_2 : f32 to vector<8x64xf32>
    %5 = vector.extract_strided_slice %3 {offsets = [0, 0], sizes = [8, 32], strides = [1, 1]} : vector<10x32xbf16> to vector<8x32xbf16>
    %c0_3 = arith.constant 0 : index
    %c0_4 = arith.constant 0 : index
    %6 = vector.load %arg2[%c0_3, %c0_4] : memref<96x64xbf16, #tpu.memory_space<vmem>>, vector<32x64xbf16>
    %cst_5 = arith.constant dense<0.000000e+00> : vector<8x64xf32>
    %7 = tpu.matmul %5, %6, %cst_5 {dimension_numbers = #tpu.dot_dimension_numbers<[1], [0], [0], [1], [0, 0, 1, 1], [], []>} : vector<8x32xbf16>, vector<32x64xbf16>, vector<8x64xf32> -> vector<8x64xf32>
    %8 = arith.addf %4, %7 : vector<8x64xf32>
    %9 = vector.extract_strided_slice %3 {offsets = [1, 0], sizes = [8, 32], strides = [1, 1]} : vector<10x32xbf16> to vector<8x32xbf16>
    %c32 = arith.constant 32 : index
    %c0_6 = arith.constant 0 : index
    %10 = vector.load %arg2[%c32, %c0_6] : memref<96x64xbf16, #tpu.memory_space<vmem>>, vector<32x64xbf16>
    %cst_7 = arith.constant dense<0.000000e+00> : vector<8x64xf32>
    %11 = tpu.matmul %9, %10, %cst_7 {dimension_numbers = #tpu.dot_dimension_numbers<[1], [0], [0], [1], [0, 0, 1, 1], [], []>} : vector<8x32xbf16>, vector<32x64xbf16>, vector<8x64xf32> -> vector<8x64xf32>
    %12 = arith.addf %8, %11 : vector<8x64xf32>
    %13 = vector.extract_strided_slice %3 {offsets = [2, 0], sizes = [8, 32], strides = [1, 1]} : vector<10x32xbf16> to vector<8x32xbf16>
    %c64 = arith.constant 64 : index
    %c0_8 = arith.constant 0 : index
    %14 = vector.load %arg2[%c64, %c0_8] : memref<96x64xbf16, #tpu.memory_space<vmem>>, vector<32x64xbf16>
    %cst_9 = arith.constant dense<0.000000e+00> : vector<8x64xf32>
    %15 = tpu.matmul %13, %14, %cst_9 {dimension_numbers = #tpu.dot_dimension_numbers<[1], [0], [0], [1], [0, 0, 1, 1], [], []>} : vector<8x32xbf16>, vector<32x64xbf16>, vector<8x64xf32> -> vector<8x64xf32>
    %16 = arith.addf %12, %15 : vector<8x64xf32>
    %c0_10 = arith.constant 0 : index
    %c0_11 = arith.constant 0 : index
    %c0_12 = arith.constant 0 : index
    %17 = vector.load %arg3[%c0_10, %c0_11, %c0_12] : memref<1x1x64xf32, #tpu.memory_space<vmem>>, vector<1x1x64xf32>
    %18 = vector.shape_cast %17 : vector<1x1x64xf32> to vector<1x64xf32>
    %19 = vector.broadcast %18 : vector<1x64xf32> to vector<8x64xf32>
    %20 = arith.addf %16, %19 : vector<8x64xf32>
    %cst_13 = arith.constant 0.000000e+00 : f32
    %21 = vector.broadcast %cst_13 : f32 to vector<8x64xf32>
    %22 = arith.maximumf %20, %21 : vector<8x64xf32>
    %23 = arith.truncf %22 : vector<8x64xf32> to vector<8x64xbf16>
    %c0_14 = arith.constant 0 : index
    %c0_15 = arith.constant 0 : index
    %c0_16 = arith.constant 0 : index
    %24 = vector.load %arg4[%c0_14, %c0_15, %c0_16] : memref<1x8x64xbf16, #tpu.memory_space<vmem>>, vector<1x8x64xbf16>
    %25 = vector.shape_cast %24 : vector<1x8x64xbf16> to vector<8x64xbf16>
    %26 = vector.shape_cast %23 : vector<8x64xbf16> to vector<1x8x64xbf16>
    tpu.vector_store %arg4[%c0_14, %c0_15, %c0_16], %26 {strides = array<i32>} : memref<1x8x64xbf16, #tpu.memory_space<vmem>>, vector<1x8x64xbf16>,
    %cst_17 = arith.constant dense<0.000000e+00> : vector<64xf32>
    %27 = vector.multi_reduction <add>, %22, %cst_17 [0] : vector<8x64xf32> to vector<64xf32>
    %28 = vector.shape_cast %27 : vector<64xf32> to vector<1x64xf32>
    %29 = arith.mulf %22, %22 : vector<8x64xf32>
    %cst_18 = arith.constant dense<0.000000e+00> : vector<64xf32>
    %30 = vector.multi_reduction <add>, %29, %cst_18 [0] : vector<8x64xf32> to vector<64xf32>
    %31 = vector.shape_cast %30 : vector<64xf32> to vector<1x64xf32>
    %32 = tpu.concatenate %28, %31 in 0 : vector<1x64xf32>, vector<1x64xf32> -> vector<2x64xf32>
    %c0_19 = arith.constant 0 : index
    %c0_20 = arith.constant 0 : index
    %c0_21 = arith.constant 0 : index
    %33 = vector.load %arg5[%c0_19, %c0_20, %c0_21] : memref<1x2x64xf32, #tpu.memory_space<vmem>>, vector<1x2x64xf32>
    %34 = vector.shape_cast %33 : vector<1x2x64xf32> to vector<2x64xf32>
    %35 = vector.shape_cast %32 : vector<2x64xf32> to vector<1x2x64xf32>
    tpu.vector_store %arg5[%c0_19, %c0_20, %c0_21], %35 {strides = array<i32>} : memref<1x2x64xf32, #tpu.memory_space<vmem>>, vector<1x2x64xf32>,
    return
  }
  func.func @transform_0(%arg0: i32) -> (i32, i32, i32) {
    %c0_i32 = arith.constant 0 : i32
    %c0_i32_0 = arith.constant 0 : i32
    %c0_i32_1 = arith.constant 0 : i32
    return %arg0, %c0_i32, %c0_i32_0 : i32, i32, i32
  }
  func.func @transform_1(%arg0: i32) -> (i32, i32) {
    %c0_i32 = arith.constant 0 : i32
    %c0_i32_0 = arith.constant 0 : i32
    %c0_i32_1 = arith.constant 0 : i32
    return %c0_i32, %c0_i32_0 : i32, i32
  }
  func.func @transform_2(%arg0: i32) -> (i32, i32, i32) {
    %c0_i32 = arith.constant 0 : i32
    %c0_i32_0 = arith.constant 0 : i32
    %c0_i32_1 = arith.constant 0 : i32
    %c0_i32_2 = arith.constant 0 : i32
    return %c0_i32, %c0_i32_0, %c0_i32_1 : i32, i32, i32
  }
  func.func @transform_3(%arg0: i32) -> (i32, i32, i32) {
    %c0_i32 = arith.constant 0 : i32
    %c0_i32_0 = arith.constant 0 : i32
    %c0_i32_1 = arith.constant 0 : i32
    return %arg0, %c0_i32, %c0_i32_0 : i32, i32, i32
  }
  func.func @transform_4(%arg0: i32) -> (i32, i32, i32) {
    %c0_i32 = arith.constant 0 : i32
    %c0_i32_0 = arith.constant 0 : i32
    %c0_i32_1 = arith.constant 0 : i32
    return %arg0, %c0_i32, %c0_i32_0 : i32, i32, i32
  }
}

module attributes {stable_mosaic.version = 11 : i64} {
  func.func @_tap_conv_kernel(%arg0: i32, %arg1: memref<1x8x64xbf16, #tpu.memory_space<vmem>>, %arg2: memref<128x32xbf16, #tpu.memory_space<vmem>>, %arg3: memref<1x1x32xf32, #tpu.memory_space<vmem>>, %arg4: memref<1x1x64xf32, #tpu.memory_space<vmem>>, %arg5: memref<1x1x64xf32, #tpu.memory_space<vmem>>, %arg6: memref<1x8x32xbf16, #tpu.memory_space<vmem>>) attributes {dimension_semantics = [#tpu.dimension_semantics<parallel>], iteration_bounds = array<i64: 2>, scalar_prefetch = 0 : i64, scratch_operands = 0 : i64, tpu.core_type = #tpu.core_type<tc>, window_params = [{transform_indices = @transform_0, window_bounds = array<i64: 1, 8, 64>}, {pipeline_mode = #tpu.pipeline_mode<synchronous>, transform_indices = @transform_1, window_bounds = array<i64: 128, 32>}, {pipeline_mode = #tpu.pipeline_mode<synchronous>, transform_indices = @transform_2, window_bounds = array<i64: 1, 1, 32>}, {pipeline_mode = #tpu.pipeline_mode<synchronous>, transform_indices = @transform_3, window_bounds = array<i64: 1, 1, 64>}, {transform_indices = @transform_4, window_bounds = array<i64: 1, 1, 64>}, {transform_indices = @transform_5, window_bounds = array<i64: 1, 8, 32>}]} {
    %c0 = arith.constant 0 : index
    %c0_0 = arith.constant 0 : index
    %c0_1 = arith.constant 0 : index
    %0 = vector.load %arg1[%c0, %c0_0, %c0_1] : memref<1x8x64xbf16, #tpu.memory_space<vmem>>, vector<1x8x64xbf16>
    %1 = vector.shape_cast %0 : vector<1x8x64xbf16> to vector<8x64xbf16>
    %2 = arith.extf %1 : vector<8x64xbf16> to vector<8x64xf32>
    %c0_2 = arith.constant 0 : index
    %c0_3 = arith.constant 0 : index
    %c0_4 = arith.constant 0 : index
    %3 = vector.load %arg4[%c0_2, %c0_3, %c0_4] : memref<1x1x64xf32, #tpu.memory_space<vmem>>, vector<1x1x64xf32>
    %4 = vector.shape_cast %3 : vector<1x1x64xf32> to vector<1x64xf32>
    %5 = vector.broadcast %4 : vector<1x64xf32> to vector<8x64xf32>
    %6 = arith.mulf %2, %5 : vector<8x64xf32>
    %c0_5 = arith.constant 0 : index
    %c0_6 = arith.constant 0 : index
    %c0_7 = arith.constant 0 : index
    %7 = vector.load %arg5[%c0_5, %c0_6, %c0_7] : memref<1x1x64xf32, #tpu.memory_space<vmem>>, vector<1x1x64xf32>
    %8 = vector.shape_cast %7 : vector<1x1x64xf32> to vector<1x64xf32>
    %9 = vector.broadcast %8 : vector<1x64xf32> to vector<8x64xf32>
    %10 = arith.addf %6, %9 : vector<8x64xf32>
    %11 = arith.truncf %10 : vector<8x64xf32> to vector<8x64xbf16>
    %cst = arith.constant 0.000000e+00 : bf16
    %12 = vector.broadcast %cst : bf16 to vector<1x64xbf16>
    %13 = tpu.concatenate %12, %11, %12 in 0 : vector<1x64xbf16>, vector<8x64xbf16>, vector<1x64xbf16> -> vector<10x64xbf16>
    %cst_8 = arith.constant 0.000000e+00 : f32
    %14 = vector.broadcast %cst_8 : f32 to vector<8x32xf32>
    %15 = vector.extract_strided_slice %13 {offsets = [0, 32], sizes = [8, 32], strides = [1, 1]} : vector<10x64xbf16> to vector<8x32xbf16>
    %c0_9 = arith.constant 0 : index
    %c0_10 = arith.constant 0 : index
    %16 = vector.load %arg2[%c0_9, %c0_10] : memref<128x32xbf16, #tpu.memory_space<vmem>>, vector<32x32xbf16>
    %cst_11 = arith.constant dense<0.000000e+00> : vector<8x32xf32>
    %17 = tpu.matmul %15, %16, %cst_11 {dimension_numbers = #tpu.dot_dimension_numbers<[1], [0], [0], [1], [0, 0, 1, 1], [], []>} : vector<8x32xbf16>, vector<32x32xbf16>, vector<8x32xf32> -> vector<8x32xf32>
    %18 = arith.addf %14, %17 : vector<8x32xf32>
    %19 = vector.extract_strided_slice %13 {offsets = [1, 0], sizes = [8, 64], strides = [1, 1]} : vector<10x64xbf16> to vector<8x64xbf16>
    %c32 = arith.constant 32 : index
    %c0_12 = arith.constant 0 : index
    %20 = vector.load %arg2[%c32, %c0_12] : memref<128x32xbf16, #tpu.memory_space<vmem>>, vector<64x32xbf16>
    %cst_13 = arith.constant dense<0.000000e+00> : vector<8x32xf32>
    %21 = tpu.matmul %19, %20, %cst_13 {dimension_numbers = #tpu.dot_dimension_numbers<[1], [0], [0], [1], [0, 0, 1, 1], [], []>} : vector<8x64xbf16>, vector<64x32xbf16>, vector<8x32xf32> -> vector<8x32xf32>
    %22 = arith.addf %18, %21 : vector<8x32xf32>
    %23 = vector.extract_strided_slice %13 {offsets = [2, 0], sizes = [8, 32], strides = [1, 1]} : vector<10x64xbf16> to vector<8x32xbf16>
    %c96 = arith.constant 96 : index
    %c0_14 = arith.constant 0 : index
    %24 = vector.load %arg2[%c96, %c0_14] : memref<128x32xbf16, #tpu.memory_space<vmem>>, vector<32x32xbf16>
    %cst_15 = arith.constant dense<0.000000e+00> : vector<8x32xf32>
    %25 = tpu.matmul %23, %24, %cst_15 {dimension_numbers = #tpu.dot_dimension_numbers<[1], [0], [0], [1], [0, 0, 1, 1], [], []>} : vector<8x32xbf16>, vector<32x32xbf16>, vector<8x32xf32> -> vector<8x32xf32>
    %26 = arith.addf %22, %25 : vector<8x32xf32>
    %c0_16 = arith.constant 0 : index
    %c0_17 = arith.constant 0 : index
    %c0_18 = arith.constant 0 : index
    %27 = vector.load %arg3[%c0_16, %c0_17, %c0_18] : memref<1x1x32xf32, #tpu.memory_space<vmem>>, vector<1x1x32xf32>
    %28 = vector.shape_cast %27 : vector<1x1x32xf32> to vector<1x32xf32>
    %29 = vector.broadcast %28 : vector<1x32xf32> to vector<8x32xf32>
    %30 = arith.addf %26, %29 : vector<8x32xf32>
    %31 = arith.truncf %30 : vector<8x32xf32> to vector<8x32xbf16>
    %c0_19 = arith.constant 0 : index
    %c0_20 = arith.constant 0 : index
    %c0_21 = arith.constant 0 : index
    %32 = vector.load %arg6[%c0_19, %c0_20, %c0_21] : memref<1x8x32xbf16, #tpu.memory_space<vmem>>, vector<1x8x32xbf16>
    %33 = vector.shape_cast %32 : vector<1x8x32xbf16> to vector<8x32xbf16>
    %34 = vector.shape_cast %31 : vector<8x32xbf16> to vector<1x8x32xbf16>
    tpu.vector_store %arg6[%c0_19, %c0_20, %c0_21], %34 {strides = array<i32>} : memref<1x8x32xbf16, #tpu.memory_space<vmem>>, vector<1x8x32xbf16>,
    return
  }
  func.func @transform_0(%arg0: i32) -> (i32, i32, i32) {
    %c0_i32 = arith.constant 0 : i32
    %c0_i32_0 = arith.constant 0 : i32
    %c0_i32_1 = arith.constant 0 : i32
    return %arg0, %c0_i32, %c0_i32_0 : i32, i32, i32
  }
  func.func @transform_1(%arg0: i32) -> (i32, i32) {
    %c0_i32 = arith.constant 0 : i32
    %c0_i32_0 = arith.constant 0 : i32
    %c0_i32_1 = arith.constant 0 : i32
    return %c0_i32, %c0_i32_0 : i32, i32
  }
  func.func @transform_2(%arg0: i32) -> (i32, i32, i32) {
    %c0_i32 = arith.constant 0 : i32
    %c0_i32_0 = arith.constant 0 : i32
    %c0_i32_1 = arith.constant 0 : i32
    %c0_i32_2 = arith.constant 0 : i32
    return %c0_i32, %c0_i32_0, %c0_i32_1 : i32, i32, i32
  }
  func.func @transform_3(%arg0: i32) -> (i32, i32, i32) {
    %c0_i32 = arith.constant 0 : i32
    %c0_i32_0 = arith.constant 0 : i32
    %c0_i32_1 = arith.constant 0 : i32
    %c0_i32_2 = arith.constant 0 : i32
    return %c0_i32, %c0_i32_0, %c0_i32_1 : i32, i32, i32
  }
  func.func @transform_4(%arg0: i32) -> (i32, i32, i32) {
    %c0_i32 = arith.constant 0 : i32
    %c0_i32_0 = arith.constant 0 : i32
    %c0_i32_1 = arith.constant 0 : i32
    return %arg0, %c0_i32, %c0_i32_0 : i32, i32, i32
  }
  func.func @transform_5(%arg0: i32) -> (i32, i32, i32) {
    %c0_i32 = arith.constant 0 : i32
    %c0_i32_0 = arith.constant 0 : i32
    %c0_i32_1 = arith.constant 0 : i32
    return %arg0, %c0_i32, %c0_i32_0 : i32, i32, i32
  }
}

module attributes {stable_mosaic.version = 11 : i64} {
  func.func @_tap_conv_kernel(%arg0: i32, %arg1: memref<1x8x64xbf16, #tpu.memory_space<vmem>>, %arg2: memref<192x64xbf16, #tpu.memory_space<vmem>>, %arg3: memref<1x1x64xf32, #tpu.memory_space<vmem>>, %arg4: memref<1x1x64xf32, #tpu.memory_space<vmem>>, %arg5: memref<1x1x64xf32, #tpu.memory_space<vmem>>, %arg6: memref<1x8x64xbf16, #tpu.memory_space<vmem>>, %arg7: memref<1x2x64xf32, #tpu.memory_space<vmem>>) attributes {dimension_semantics = [#tpu.dimension_semantics<parallel>], iteration_bounds = array<i64: 2>, scalar_prefetch = 0 : i64, scratch_operands = 0 : i64, tpu.core_type = #tpu.core_type<tc>, window_params = [{transform_indices = @transform_0, window_bounds = array<i64: 1, 8, 64>}, {pipeline_mode = #tpu.pipeline_mode<synchronous>, transform_indices = @transform_1, window_bounds = array<i64: 192, 64>}, {pipeline_mode = #tpu.pipeline_mode<synchronous>, transform_indices = @transform_2, window_bounds = array<i64: 1, 1, 64>}, {pipeline_mode = #tpu.pipeline_mode<synchronous>, transform_indices = @transform_3, window_bounds = array<i64: 1, 1, 64>}, {transform_indices = @transform_4, window_bounds = array<i64: 1, 1, 64>}, {transform_indices = @transform_5, window_bounds = array<i64: 1, 8, 64>}, {transform_indices = @transform_6, window_bounds = array<i64: 1, 2, 64>}]} {
    %c0 = arith.constant 0 : index
    %c0_0 = arith.constant 0 : index
    %c0_1 = arith.constant 0 : index
    %0 = vector.load %arg1[%c0, %c0_0, %c0_1] : memref<1x8x64xbf16, #tpu.memory_space<vmem>>, vector<1x8x64xbf16>
    %1 = vector.shape_cast %0 : vector<1x8x64xbf16> to vector<8x64xbf16>
    %2 = arith.extf %1 : vector<8x64xbf16> to vector<8x64xf32>
    %c0_2 = arith.constant 0 : index
    %c0_3 = arith.constant 0 : index
    %c0_4 = arith.constant 0 : index
    %3 = vector.load %arg4[%c0_2, %c0_3, %c0_4] : memref<1x1x64xf32, #tpu.memory_space<vmem>>, vector<1x1x64xf32>
    %4 = vector.shape_cast %3 : vector<1x1x64xf32> to vector<1x64xf32>
    %5 = vector.broadcast %4 : vector<1x64xf32> to vector<8x64xf32>
    %6 = arith.mulf %2, %5 : vector<8x64xf32>
    %c0_5 = arith.constant 0 : index
    %c0_6 = arith.constant 0 : index
    %c0_7 = arith.constant 0 : index
    %7 = vector.load %arg5[%c0_5, %c0_6, %c0_7] : memref<1x1x64xf32, #tpu.memory_space<vmem>>, vector<1x1x64xf32>
    %8 = vector.shape_cast %7 : vector<1x1x64xf32> to vector<1x64xf32>
    %9 = vector.broadcast %8 : vector<1x64xf32> to vector<8x64xf32>
    %10 = arith.addf %6, %9 : vector<8x64xf32>
    %11 = arith.truncf %10 : vector<8x64xf32> to vector<8x64xbf16>
    %cst = arith.constant 0.000000e+00 : bf16
    %12 = vector.broadcast %cst : bf16 to vector<1x64xbf16>
    %13 = tpu.concatenate %12, %11, %12 in 0 : vector<1x64xbf16>, vector<8x64xbf16>, vector<1x64xbf16> -> vector<10x64xbf16>
    %cst_8 = arith.constant 0.000000e+00 : f32
    %14 = vector.broadcast %cst_8 : f32 to vector<8x64xf32>
    %15 = vector.extract_strided_slice %13 {offsets = [0, 0], sizes = [8, 64], strides = [1, 1]} : vector<10x64xbf16> to vector<8x64xbf16>
    %c0_9 = arith.constant 0 : index
    %c0_10 = arith.constant 0 : index
    %16 = vector.load %arg2[%c0_9, %c0_10] : memref<192x64xbf16, #tpu.memory_space<vmem>>, vector<64x64xbf16>
    %cst_11 = arith.constant dense<0.000000e+00> : vector<8x64xf32>
    %17 = tpu.matmul %15, %16, %cst_11 {dimension_numbers = #tpu.dot_dimension_numbers<[1], [0], [0], [1], [0, 0, 1, 1], [], []>} : vector<8x64xbf16>, vector<64x64xbf16>, vector<8x64xf32> -> vector<8x64xf32>
    %18 = arith.addf %14, %17 : vector<8x64xf32>
    %19 = vector.extract_strided_slice %13 {offsets = [1, 0], sizes = [8, 64], strides = [1, 1]} : vector<10x64xbf16> to vector<8x64xbf16>
    %c64 = arith.constant 64 : index
    %c0_12 = arith.constant 0 : index
    %20 = vector.load %arg2[%c64, %c0_12] : memref<192x64xbf16, #tpu.memory_space<vmem>>, vector<64x64xbf16>
    %cst_13 = arith.constant dense<0.000000e+00> : vector<8x64xf32>
    %21 = tpu.matmul %19, %20, %cst_13 {dimension_numbers = #tpu.dot_dimension_numbers<[1], [0], [0], [1], [0, 0, 1, 1], [], []>} : vector<8x64xbf16>, vector<64x64xbf16>, vector<8x64xf32> -> vector<8x64xf32>
    %22 = arith.addf %18, %21 : vector<8x64xf32>
    %23 = vector.extract_strided_slice %13 {offsets = [2, 0], sizes = [8, 64], strides = [1, 1]} : vector<10x64xbf16> to vector<8x64xbf16>
    %c128 = arith.constant 128 : index
    %c0_14 = arith.constant 0 : index
    %24 = vector.load %arg2[%c128, %c0_14] : memref<192x64xbf16, #tpu.memory_space<vmem>>, vector<64x64xbf16>
    %cst_15 = arith.constant dense<0.000000e+00> : vector<8x64xf32>
    %25 = tpu.matmul %23, %24, %cst_15 {dimension_numbers = #tpu.dot_dimension_numbers<[1], [0], [0], [1], [0, 0, 1, 1], [], []>} : vector<8x64xbf16>, vector<64x64xbf16>, vector<8x64xf32> -> vector<8x64xf32>
    %26 = arith.addf %22, %25 : vector<8x64xf32>
    %c0_16 = arith.constant 0 : index
    %c0_17 = arith.constant 0 : index
    %c0_18 = arith.constant 0 : index
    %27 = vector.load %arg3[%c0_16, %c0_17, %c0_18] : memref<1x1x64xf32, #tpu.memory_space<vmem>>, vector<1x1x64xf32>
    %28 = vector.shape_cast %27 : vector<1x1x64xf32> to vector<1x64xf32>
    %29 = vector.broadcast %28 : vector<1x64xf32> to vector<8x64xf32>
    %30 = arith.addf %26, %29 : vector<8x64xf32>
    %cst_19 = arith.constant 0.000000e+00 : f32
    %31 = vector.broadcast %cst_19 : f32 to vector<8x64xf32>
    %32 = arith.maximumf %30, %31 : vector<8x64xf32>
    %33 = arith.truncf %32 : vector<8x64xf32> to vector<8x64xbf16>
    %c0_20 = arith.constant 0 : index
    %c0_21 = arith.constant 0 : index
    %c0_22 = arith.constant 0 : index
    %34 = vector.load %arg6[%c0_20, %c0_21, %c0_22] : memref<1x8x64xbf16, #tpu.memory_space<vmem>>, vector<1x8x64xbf16>
    %35 = vector.shape_cast %34 : vector<1x8x64xbf16> to vector<8x64xbf16>
    %36 = vector.shape_cast %33 : vector<8x64xbf16> to vector<1x8x64xbf16>
    tpu.vector_store %arg6[%c0_20, %c0_21, %c0_22], %36 {strides = array<i32>} : memref<1x8x64xbf16, #tpu.memory_space<vmem>>, vector<1x8x64xbf16>,
    %cst_23 = arith.constant dense<0.000000e+00> : vector<64xf32>
    %37 = vector.multi_reduction <add>, %32, %cst_23 [0] : vector<8x64xf32> to vector<64xf32>
    %38 = vector.shape_cast %37 : vector<64xf32> to vector<1x64xf32>
    %39 = arith.mulf %32, %32 : vector<8x64xf32>
    %cst_24 = arith.constant dense<0.000000e+00> : vector<64xf32>
    %40 = vector.multi_reduction <add>, %39, %cst_24 [0] : vector<8x64xf32> to vector<64xf32>
    %41 = vector.shape_cast %40 : vector<64xf32> to vector<1x64xf32>
    %42 = tpu.concatenate %38, %41 in 0 : vector<1x64xf32>, vector<1x64xf32> -> vector<2x64xf32>
    %c0_25 = arith.constant 0 : index
    %c0_26 = arith.constant 0 : index
    %c0_27 = arith.constant 0 : index
    %43 = vector.load %arg7[%c0_25, %c0_26, %c0_27] : memref<1x2x64xf32, #tpu.memory_space<vmem>>, vector<1x2x64xf32>
    %44 = vector.shape_cast %43 : vector<1x2x64xf32> to vector<2x64xf32>
    %45 = vector.shape_cast %42 : vector<2x64xf32> to vector<1x2x64xf32>
    tpu.vector_store %arg7[%c0_25, %c0_26, %c0_27], %45 {strides = array<i32>} : memref<1x2x64xf32, #tpu.memory_space<vmem>>, vector<1x2x64xf32>,
    return
  }
  func.func @transform_0(%arg0: i32) -> (i32, i32, i32) {
    %c0_i32 = arith.constant 0 : i32
    %c0_i32_0 = arith.constant 0 : i32
    %c0_i32_1 = arith.constant 0 : i32
    return %arg0, %c0_i32, %c0_i32_0 : i32, i32, i32
  }
  func.func @transform_1(%arg0: i32) -> (i32, i32) {
    %c0_i32 = arith.constant 0 : i32
    %c0_i32_0 = arith.constant 0 : i32
    %c0_i32_1 = arith.constant 0 : i32
    return %c0_i32, %c0_i32_0 : i32, i32
  }
  func.func @transform_2(%arg0: i32) -> (i32, i32, i32) {
    %c0_i32 = arith.constant 0 : i32
    %c0_i32_0 = arith.constant 0 : i32
    %c0_i32_1 = arith.constant 0 : i32
    %c0_i32_2 = arith.constant 0 : i32
    return %c0_i32, %c0_i32_0, %c0_i32_1 : i32, i32, i32
  }
  func.func @transform_3(%arg0: i32) -> (i32, i32, i32) {
    %c0_i32 = arith.constant 0 : i32
    %c0_i32_0 = arith.constant 0 : i32
    %c0_i32_1 = arith.constant 0 : i32
    %c0_i32_2 = arith.constant 0 : i32
    return %c0_i32, %c0_i32_0, %c0_i32_1 : i32, i32, i32
  }
  func.func @transform_4(%arg0: i32) -> (i32, i32, i32) {
    %c0_i32 = arith.constant 0 : i32
    %c0_i32_0 = arith.constant 0 : i32
    %c0_i32_1 = arith.constant 0 : i32
    return %arg0, %c0_i32, %c0_i32_0 : i32, i32, i32
  }
  func.func @transform_5(%arg0: i32) -> (i32, i32, i32) {
    %c0_i32 = arith.constant 0 : i32
    %c0_i32_0 = arith.constant 0 : i32
    %c0_i32_1 = arith.constant 0 : i32
    return %arg0, %c0_i32, %c0_i32_0 : i32, i32, i32
  }
  func.func @transform_6(%arg0: i32) -> (i32, i32, i32) {
    %c0_i32 = arith.constant 0 : i32
    %c0_i32_0 = arith.constant 0 : i32
    %c0_i32_1 = arith.constant 0 : i32
    return %arg0, %c0_i32, %c0_i32_0 : i32, i32, i32
  }
}

module attributes {stable_mosaic.version = 11 : i64} {
  func.func @_tap_conv_kernel(%arg0: i32, %arg1: memref<1x4x128xbf16, #tpu.memory_space<vmem>>, %arg2: memref<256x64xbf16, #tpu.memory_space<vmem>>, %arg3: memref<1x1x64xf32, #tpu.memory_space<vmem>>, %arg4: memref<1x1x128xf32, #tpu.memory_space<vmem>>, %arg5: memref<1x1x128xf32, #tpu.memory_space<vmem>>, %arg6: memref<1x4x64xbf16, #tpu.memory_space<vmem>>) attributes {dimension_semantics = [#tpu.dimension_semantics<parallel>], iteration_bounds = array<i64: 2>, scalar_prefetch = 0 : i64, scratch_operands = 0 : i64, tpu.core_type = #tpu.core_type<tc>, window_params = [{transform_indices = @transform_0, window_bounds = array<i64: 1, 4, 128>}, {pipeline_mode = #tpu.pipeline_mode<synchronous>, transform_indices = @transform_1, window_bounds = array<i64: 256, 64>}, {pipeline_mode = #tpu.pipeline_mode<synchronous>, transform_indices = @transform_2, window_bounds = array<i64: 1, 1, 64>}, {pipeline_mode = #tpu.pipeline_mode<synchronous>, transform_indices = @transform_3, window_bounds = array<i64: 1, 1, 128>}, {transform_indices = @transform_4, window_bounds = array<i64: 1, 1, 128>}, {transform_indices = @transform_5, window_bounds = array<i64: 1, 4, 64>}]} {
    %c0 = arith.constant 0 : index
    %c0_0 = arith.constant 0 : index
    %c0_1 = arith.constant 0 : index
    %0 = vector.load %arg1[%c0, %c0_0, %c0_1] : memref<1x4x128xbf16, #tpu.memory_space<vmem>>, vector<1x4x128xbf16>
    %1 = vector.shape_cast %0 : vector<1x4x128xbf16> to vector<4x128xbf16>
    %2 = arith.extf %1 : vector<4x128xbf16> to vector<4x128xf32>
    %c0_2 = arith.constant 0 : index
    %c0_3 = arith.constant 0 : index
    %c0_4 = arith.constant 0 : index
    %3 = vector.load %arg4[%c0_2, %c0_3, %c0_4] : memref<1x1x128xf32, #tpu.memory_space<vmem>>, vector<1x1x128xf32>
    %4 = vector.shape_cast %3 : vector<1x1x128xf32> to vector<1x128xf32>
    %5 = vector.broadcast %4 : vector<1x128xf32> to vector<4x128xf32>
    %6 = arith.mulf %2, %5 : vector<4x128xf32>
    %c0_5 = arith.constant 0 : index
    %c0_6 = arith.constant 0 : index
    %c0_7 = arith.constant 0 : index
    %7 = vector.load %arg5[%c0_5, %c0_6, %c0_7] : memref<1x1x128xf32, #tpu.memory_space<vmem>>, vector<1x1x128xf32>
    %8 = vector.shape_cast %7 : vector<1x1x128xf32> to vector<1x128xf32>
    %9 = vector.broadcast %8 : vector<1x128xf32> to vector<4x128xf32>
    %10 = arith.addf %6, %9 : vector<4x128xf32>
    %11 = arith.truncf %10 : vector<4x128xf32> to vector<4x128xbf16>
    %cst = arith.constant 0.000000e+00 : bf16
    %12 = vector.broadcast %cst : bf16 to vector<1x128xbf16>
    %13 = tpu.concatenate %12, %11, %12 in 0 : vector<1x128xbf16>, vector<4x128xbf16>, vector<1x128xbf16> -> vector<6x128xbf16>
    %cst_8 = arith.constant 0.000000e+00 : f32
    %14 = vector.broadcast %cst_8 : f32 to vector<4x64xf32>
    %15 = vector.extract_strided_slice %13 {offsets = [0, 64], sizes = [4, 64], strides = [1, 1]} : vector<6x128xbf16> to vector<4x64xbf16>
    %c0_9 = arith.constant 0 : index
    %c0_10 = arith.constant 0 : index
    %16 = vector.load %arg2[%c0_9, %c0_10] : memref<256x64xbf16, #tpu.memory_space<vmem>>, vector<64x64xbf16>
    %cst_11 = arith.constant dense<0.000000e+00> : vector<4x64xf32>
    %17 = tpu.matmul %15, %16, %cst_11 {dimension_numbers = #tpu.dot_dimension_numbers<[1], [0], [0], [1], [0, 0, 1, 1], [], []>} : vector<4x64xbf16>, vector<64x64xbf16>, vector<4x64xf32> -> vector<4x64xf32>
    %18 = arith.addf %14, %17 : vector<4x64xf32>
    %19 = vector.extract_strided_slice %13 {offsets = [1, 0], sizes = [4, 128], strides = [1, 1]} : vector<6x128xbf16> to vector<4x128xbf16>
    %c64 = arith.constant 64 : index
    %c0_12 = arith.constant 0 : index
    %20 = vector.load %arg2[%c64, %c0_12] : memref<256x64xbf16, #tpu.memory_space<vmem>>, vector<128x64xbf16>
    %cst_13 = arith.constant dense<0.000000e+00> : vector<4x64xf32>
    %21 = tpu.matmul %19, %20, %cst_13 {dimension_numbers = #tpu.dot_dimension_numbers<[1], [0], [0], [1], [0, 0, 1, 1], [], []>} : vector<4x128xbf16>, vector<128x64xbf16>, vector<4x64xf32> -> vector<4x64xf32>
    %22 = arith.addf %18, %21 : vector<4x64xf32>
    %23 = vector.extract_strided_slice %13 {offsets = [2, 0], sizes = [4, 64], strides = [1, 1]} : vector<6x128xbf16> to vector<4x64xbf16>
    %c192 = arith.constant 192 : index
    %c0_14 = arith.constant 0 : index
    %24 = vector.load %arg2[%c192, %c0_14] : memref<256x64xbf16, #tpu.memory_space<vmem>>, vector<64x64xbf16>
    %cst_15 = arith.constant dense<0.000000e+00> : vector<4x64xf32>
    %25 = tpu.matmul %23, %24, %cst_15 {dimension_numbers = #tpu.dot_dimension_numbers<[1], [0], [0], [1], [0, 0, 1, 1], [], []>} : vector<4x64xbf16>, vector<64x64xbf16>, vector<4x64xf32> -> vector<4x64xf32>
    %26 = arith.addf %22, %25 : vector<4x64xf32>
    %c0_16 = arith.constant 0 : index
    %c0_17 = arith.constant 0 : index
    %c0_18 = arith.constant 0 : index
    %27 = vector.load %arg3[%c0_16, %c0_17, %c0_18] : memref<1x1x64xf32, #tpu.memory_space<vmem>>, vector<1x1x64xf32>
    %28 = vector.shape_cast %27 : vector<1x1x64xf32> to vector<1x64xf32>
    %29 = vector.broadcast %28 : vector<1x64xf32> to vector<4x64xf32>
    %30 = arith.addf %26, %29 : vector<4x64xf32>
    %31 = arith.truncf %30 : vector<4x64xf32> to vector<4x64xbf16>
    %c0_19 = arith.constant 0 : index
    %c0_20 = arith.constant 0 : index
    %c0_21 = arith.constant 0 : index
    %32 = vector.load %arg6[%c0_19, %c0_20, %c0_21] : memref<1x4x64xbf16, #tpu.memory_space<vmem>>, vector<1x4x64xbf16>
    %33 = vector.shape_cast %32 : vector<1x4x64xbf16> to vector<4x64xbf16>
    %34 = vector.shape_cast %31 : vector<4x64xbf16> to vector<1x4x64xbf16>
    tpu.vector_store %arg6[%c0_19, %c0_20, %c0_21], %34 {strides = array<i32>} : memref<1x4x64xbf16, #tpu.memory_space<vmem>>, vector<1x4x64xbf16>,
    return
  }
  func.func @transform_0(%arg0: i32) -> (i32, i32, i32) {
    %c0_i32 = arith.constant 0 : i32
    %c0_i32_0 = arith.constant 0 : i32
    %c0_i32_1 = arith.constant 0 : i32
    return %arg0, %c0_i32, %c0_i32_0 : i32, i32, i32
  }
  func.func @transform_1(%arg0: i32) -> (i32, i32) {
    %c0_i32 = arith.constant 0 : i32
    %c0_i32_0 = arith.constant 0 : i32
    %c0_i32_1 = arith.constant 0 : i32
    return %c0_i32, %c0_i32_0 : i32, i32
  }
  func.func @transform_2(%arg0: i32) -> (i32, i32, i32) {
    %c0_i32 = arith.constant 0 : i32
    %c0_i32_0 = arith.constant 0 : i32
    %c0_i32_1 = arith.constant 0 : i32
    %c0_i32_2 = arith.constant 0 : i32
    return %c0_i32, %c0_i32_0, %c0_i32_1 : i32, i32, i32
  }
  func.func @transform_3(%arg0: i32) -> (i32, i32, i32) {
    %c0_i32 = arith.constant 0 : i32
    %c0_i32_0 = arith.constant 0 : i32
    %c0_i32_1 = arith.constant 0 : i32
    %c0_i32_2 = arith.constant 0 : i32
    return %c0_i32, %c0_i32_0, %c0_i32_1 : i32, i32, i32
  }
  func.func @transform_4(%arg0: i32) -> (i32, i32, i32) {
    %c0_i32 = arith.constant 0 : i32
    %c0_i32_0 = arith.constant 0 : i32
    %c0_i32_1 = arith.constant 0 : i32
    return %arg0, %c0_i32, %c0_i32_0 : i32, i32, i32
  }
  func.func @transform_5(%arg0: i32) -> (i32, i32, i32) {
    %c0_i32 = arith.constant 0 : i32
    %c0_i32_0 = arith.constant 0 : i32
    %c0_i32_1 = arith.constant 0 : i32
    return %arg0, %c0_i32, %c0_i32_0 : i32, i32, i32
  }
}

module attributes {stable_mosaic.version = 11 : i64} {
  func.func @_tap_conv_kernel(%arg0: i32, %arg1: memref<1x4x64xbf16, #tpu.memory_space<vmem>>, %arg2: memref<1x4x64xbf16, #tpu.memory_space<vmem>>, %arg3: memref<384x32xbf16, #tpu.memory_space<vmem>>, %arg4: memref<1x1x32xf32, #tpu.memory_space<vmem>>, %arg5: memref<1x4x32xbf16, #tpu.memory_space<vmem>>, %arg6: memref<1x2x32xf32, #tpu.memory_space<vmem>>) attributes {dimension_semantics = [#tpu.dimension_semantics<parallel>], iteration_bounds = array<i64: 2>, scalar_prefetch = 0 : i64, scratch_operands = 0 : i64, tpu.core_type = #tpu.core_type<tc>, window_params = [{transform_indices = @transform_0, window_bounds = array<i64: 1, 4, 64>}, {transform_indices = @transform_1, window_bounds = array<i64: 1, 4, 64>}, {pipeline_mode = #tpu.pipeline_mode<synchronous>, transform_indices = @transform_2, window_bounds = array<i64: 384, 32>}, {pipeline_mode = #tpu.pipeline_mode<synchronous>, transform_indices = @transform_3, window_bounds = array<i64: 1, 1, 32>}, {transform_indices = @transform_4, window_bounds = array<i64: 1, 4, 32>}, {transform_indices = @transform_5, window_bounds = array<i64: 1, 2, 32>}]} {
    %c0 = arith.constant 0 : index
    %c0_0 = arith.constant 0 : index
    %c0_1 = arith.constant 0 : index
    %0 = vector.load %arg1[%c0, %c0_0, %c0_1] : memref<1x4x64xbf16, #tpu.memory_space<vmem>>, vector<1x4x64xbf16>
    %1 = vector.shape_cast %0 : vector<1x4x64xbf16> to vector<4x64xbf16>
    %cst = arith.constant 0.000000e+00 : bf16
    %2 = vector.broadcast %cst : bf16 to vector<1x64xbf16>
    %3 = tpu.concatenate %2, %1, %2 in 0 : vector<1x64xbf16>, vector<4x64xbf16>, vector<1x64xbf16> -> vector<6x64xbf16>
    %c0_2 = arith.constant 0 : index
    %c0_3 = arith.constant 0 : index
    %c0_4 = arith.constant 0 : index
    %4 = vector.load %arg2[%c0_2, %c0_3, %c0_4] : memref<1x4x64xbf16, #tpu.memory_space<vmem>>, vector<1x4x64xbf16>
    %5 = vector.shape_cast %4 : vector<1x4x64xbf16> to vector<4x64xbf16>
    %cst_5 = arith.constant 0.000000e+00 : bf16
    %6 = vector.broadcast %cst_5 : bf16 to vector<1x64xbf16>
    %7 = tpu.concatenate %6, %5, %6 in 0 : vector<1x64xbf16>, vector<4x64xbf16>, vector<1x64xbf16> -> vector<6x64xbf16>
    %cst_6 = arith.constant 0.000000e+00 : f32
    %8 = vector.broadcast %cst_6 : f32 to vector<4x32xf32>
    %9 = vector.extract_strided_slice %3 {offsets = [0, 0], sizes = [4, 64], strides = [1, 1]} : vector<6x64xbf16> to vector<4x64xbf16>
    %c0_7 = arith.constant 0 : index
    %c0_8 = arith.constant 0 : index
    %10 = vector.load %arg3[%c0_7, %c0_8] : memref<384x32xbf16, #tpu.memory_space<vmem>>, vector<64x32xbf16>
    %cst_9 = arith.constant dense<0.000000e+00> : vector<4x32xf32>
    %11 = tpu.matmul %9, %10, %cst_9 {dimension_numbers = #tpu.dot_dimension_numbers<[1], [0], [0], [1], [0, 0, 1, 1], [], []>} : vector<4x64xbf16>, vector<64x32xbf16>, vector<4x32xf32> -> vector<4x32xf32>
    %12 = vector.extract_strided_slice %7 {offsets = [0, 0], sizes = [4, 64], strides = [1, 1]} : vector<6x64xbf16> to vector<4x64xbf16>
    %c64 = arith.constant 64 : index
    %c0_10 = arith.constant 0 : index
    %13 = vector.load %arg3[%c64, %c0_10] : memref<384x32xbf16, #tpu.memory_space<vmem>>, vector<64x32xbf16>
    %cst_11 = arith.constant dense<0.000000e+00> : vector<4x32xf32>
    %14 = tpu.matmul %12, %13, %cst_11 {dimension_numbers = #tpu.dot_dimension_numbers<[1], [0], [0], [1], [0, 0, 1, 1], [], []>} : vector<4x64xbf16>, vector<64x32xbf16>, vector<4x32xf32> -> vector<4x32xf32>
    %15 = arith.addf %11, %14 : vector<4x32xf32>
    %16 = arith.addf %8, %15 : vector<4x32xf32>
    %17 = vector.extract_strided_slice %3 {offsets = [1, 0], sizes = [4, 64], strides = [1, 1]} : vector<6x64xbf16> to vector<4x64xbf16>
    %c128 = arith.constant 128 : index
    %c0_12 = arith.constant 0 : index
    %18 = vector.load %arg3[%c128, %c0_12] : memref<384x32xbf16, #tpu.memory_space<vmem>>, vector<64x32xbf16>
    %cst_13 = arith.constant dense<0.000000e+00> : vector<4x32xf32>
    %19 = tpu.matmul %17, %18, %cst_13 {dimension_numbers = #tpu.dot_dimension_numbers<[1], [0], [0], [1], [0, 0, 1, 1], [], []>} : vector<4x64xbf16>, vector<64x32xbf16>, vector<4x32xf32> -> vector<4x32xf32>
    %20 = vector.extract_strided_slice %7 {offsets = [1, 0], sizes = [4, 64], strides = [1, 1]} : vector<6x64xbf16> to vector<4x64xbf16>
    %c192 = arith.constant 192 : index
    %c0_14 = arith.constant 0 : index
    %21 = vector.load %arg3[%c192, %c0_14] : memref<384x32xbf16, #tpu.memory_space<vmem>>, vector<64x32xbf16>
    %cst_15 = arith.constant dense<0.000000e+00> : vector<4x32xf32>
    %22 = tpu.matmul %20, %21, %cst_15 {dimension_numbers = #tpu.dot_dimension_numbers<[1], [0], [0], [1], [0, 0, 1, 1], [], []>} : vector<4x64xbf16>, vector<64x32xbf16>, vector<4x32xf32> -> vector<4x32xf32>
    %23 = arith.addf %19, %22 : vector<4x32xf32>
    %24 = arith.addf %16, %23 : vector<4x32xf32>
    %25 = vector.extract_strided_slice %3 {offsets = [2, 0], sizes = [4, 64], strides = [1, 1]} : vector<6x64xbf16> to vector<4x64xbf16>
    %c256 = arith.constant 256 : index
    %c0_16 = arith.constant 0 : index
    %26 = vector.load %arg3[%c256, %c0_16] : memref<384x32xbf16, #tpu.memory_space<vmem>>, vector<64x32xbf16>
    %cst_17 = arith.constant dense<0.000000e+00> : vector<4x32xf32>
    %27 = tpu.matmul %25, %26, %cst_17 {dimension_numbers = #tpu.dot_dimension_numbers<[1], [0], [0], [1], [0, 0, 1, 1], [], []>} : vector<4x64xbf16>, vector<64x32xbf16>, vector<4x32xf32> -> vector<4x32xf32>
    %28 = vector.extract_strided_slice %7 {offsets = [2, 0], sizes = [4, 64], strides = [1, 1]} : vector<6x64xbf16> to vector<4x64xbf16>
    %c320 = arith.constant 320 : index
    %c0_18 = arith.constant 0 : index
    %29 = vector.load %arg3[%c320, %c0_18] : memref<384x32xbf16, #tpu.memory_space<vmem>>, vector<64x32xbf16>
    %cst_19 = arith.constant dense<0.000000e+00> : vector<4x32xf32>
    %30 = tpu.matmul %28, %29, %cst_19 {dimension_numbers = #tpu.dot_dimension_numbers<[1], [0], [0], [1], [0, 0, 1, 1], [], []>} : vector<4x64xbf16>, vector<64x32xbf16>, vector<4x32xf32> -> vector<4x32xf32>
    %31 = arith.addf %27, %30 : vector<4x32xf32>
    %32 = arith.addf %24, %31 : vector<4x32xf32>
    %c0_20 = arith.constant 0 : index
    %c0_21 = arith.constant 0 : index
    %c0_22 = arith.constant 0 : index
    %33 = vector.load %arg4[%c0_20, %c0_21, %c0_22] : memref<1x1x32xf32, #tpu.memory_space<vmem>>, vector<1x1x32xf32>
    %34 = vector.shape_cast %33 : vector<1x1x32xf32> to vector<1x32xf32>
    %35 = vector.broadcast %34 : vector<1x32xf32> to vector<4x32xf32>
    %36 = arith.addf %32, %35 : vector<4x32xf32>
    %cst_23 = arith.constant 0.000000e+00 : f32
    %37 = vector.broadcast %cst_23 : f32 to vector<4x32xf32>
    %38 = arith.maximumf %36, %37 : vector<4x32xf32>
    %39 = arith.truncf %38 : vector<4x32xf32> to vector<4x32xbf16>
    %c0_24 = arith.constant 0 : index
    %c0_25 = arith.constant 0 : index
    %c0_26 = arith.constant 0 : index
    %40 = vector.load %arg5[%c0_24, %c0_25, %c0_26] : memref<1x4x32xbf16, #tpu.memory_space<vmem>>, vector<1x4x32xbf16>
    %41 = vector.shape_cast %40 : vector<1x4x32xbf16> to vector<4x32xbf16>
    %42 = vector.shape_cast %39 : vector<4x32xbf16> to vector<1x4x32xbf16>
    tpu.vector_store %arg5[%c0_24, %c0_25, %c0_26], %42 {strides = array<i32>} : memref<1x4x32xbf16, #tpu.memory_space<vmem>>, vector<1x4x32xbf16>,
    %cst_27 = arith.constant dense<0.000000e+00> : vector<32xf32>
    %43 = vector.multi_reduction <add>, %38, %cst_27 [0] : vector<4x32xf32> to vector<32xf32>
    %44 = vector.shape_cast %43 : vector<32xf32> to vector<1x32xf32>
    %45 = arith.mulf %38, %38 : vector<4x32xf32>
    %cst_28 = arith.constant dense<0.000000e+00> : vector<32xf32>
    %46 = vector.multi_reduction <add>, %45, %cst_28 [0] : vector<4x32xf32> to vector<32xf32>
    %47 = vector.shape_cast %46 : vector<32xf32> to vector<1x32xf32>
    %48 = tpu.concatenate %44, %47 in 0 : vector<1x32xf32>, vector<1x32xf32> -> vector<2x32xf32>
    %c0_29 = arith.constant 0 : index
    %c0_30 = arith.constant 0 : index
    %c0_31 = arith.constant 0 : index
    %49 = vector.load %arg6[%c0_29, %c0_30, %c0_31] : memref<1x2x32xf32, #tpu.memory_space<vmem>>, vector<1x2x32xf32>
    %50 = vector.shape_cast %49 : vector<1x2x32xf32> to vector<2x32xf32>
    %51 = vector.shape_cast %48 : vector<2x32xf32> to vector<1x2x32xf32>
    tpu.vector_store %arg6[%c0_29, %c0_30, %c0_31], %51 {strides = array<i32>} : memref<1x2x32xf32, #tpu.memory_space<vmem>>, vector<1x2x32xf32>,
    return
  }
  func.func @transform_0(%arg0: i32) -> (i32, i32, i32) {
    %c0_i32 = arith.constant 0 : i32
    %c0_i32_0 = arith.constant 0 : i32
    %c0_i32_1 = arith.constant 0 : i32
    return %arg0, %c0_i32, %c0_i32_0 : i32, i32, i32
  }
  func.func @transform_1(%arg0: i32) -> (i32, i32, i32) {
    %c0_i32 = arith.constant 0 : i32
    %c0_i32_0 = arith.constant 0 : i32
    %c0_i32_1 = arith.constant 0 : i32
    return %arg0, %c0_i32, %c0_i32_0 : i32, i32, i32
  }
  func.func @transform_2(%arg0: i32) -> (i32, i32) {
    %c0_i32 = arith.constant 0 : i32
    %c0_i32_0 = arith.constant 0 : i32
    %c0_i32_1 = arith.constant 0 : i32
    return %c0_i32, %c0_i32_0 : i32, i32
  }
  func.func @transform_3(%arg0: i32) -> (i32, i32, i32) {
    %c0_i32 = arith.constant 0 : i32
    %c0_i32_0 = arith.constant 0 : i32
    %c0_i32_1 = arith.constant 0 : i32
    %c0_i32_2 = arith.constant 0 : i32
    return %c0_i32, %c0_i32_0, %c0_i32_1 : i32, i32, i32
  }
  func.func @transform_4(%arg0: i32) -> (i32, i32, i32) {
    %c0_i32 = arith.constant 0 : i32
    %c0_i32_0 = arith.constant 0 : i32
    %c0_i32_1 = arith.constant 0 : i32
    return %arg0, %c0_i32, %c0_i32_0 : i32, i32, i32
  }
  func.func @transform_5(%arg0: i32) -> (i32, i32, i32) {
    %c0_i32 = arith.constant 0 : i32
    %c0_i32_0 = arith.constant 0 : i32
    %c0_i32_1 = arith.constant 0 : i32
    return %arg0, %c0_i32, %c0_i32_0 : i32, i32, i32
  }
}

module attributes {stable_mosaic.version = 11 : i64} {
  func.func @_tap_conv_kernel(%arg0: i32, %arg1: memref<1x4x32xbf16, #tpu.memory_space<vmem>>, %arg2: memref<96x32xbf16, #tpu.memory_space<vmem>>, %arg3: memref<1x1x32xf32, #tpu.memory_space<vmem>>, %arg4: memref<1x1x32xf32, #tpu.memory_space<vmem>>, %arg5: memref<1x1x32xf32, #tpu.memory_space<vmem>>, %arg6: memref<1x4x32xbf16, #tpu.memory_space<vmem>>, %arg7: memref<1x2x32xf32, #tpu.memory_space<vmem>>) attributes {dimension_semantics = [#tpu.dimension_semantics<parallel>], iteration_bounds = array<i64: 2>, scalar_prefetch = 0 : i64, scratch_operands = 0 : i64, tpu.core_type = #tpu.core_type<tc>, window_params = [{transform_indices = @transform_0, window_bounds = array<i64: 1, 4, 32>}, {pipeline_mode = #tpu.pipeline_mode<synchronous>, transform_indices = @transform_1, window_bounds = array<i64: 96, 32>}, {pipeline_mode = #tpu.pipeline_mode<synchronous>, transform_indices = @transform_2, window_bounds = array<i64: 1, 1, 32>}, {pipeline_mode = #tpu.pipeline_mode<synchronous>, transform_indices = @transform_3, window_bounds = array<i64: 1, 1, 32>}, {transform_indices = @transform_4, window_bounds = array<i64: 1, 1, 32>}, {transform_indices = @transform_5, window_bounds = array<i64: 1, 4, 32>}, {transform_indices = @transform_6, window_bounds = array<i64: 1, 2, 32>}]} {
    %c0 = arith.constant 0 : index
    %c0_0 = arith.constant 0 : index
    %c0_1 = arith.constant 0 : index
    %0 = vector.load %arg1[%c0, %c0_0, %c0_1] : memref<1x4x32xbf16, #tpu.memory_space<vmem>>, vector<1x4x32xbf16>
    %1 = vector.shape_cast %0 : vector<1x4x32xbf16> to vector<4x32xbf16>
    %2 = arith.extf %1 : vector<4x32xbf16> to vector<4x32xf32>
    %c0_2 = arith.constant 0 : index
    %c0_3 = arith.constant 0 : index
    %c0_4 = arith.constant 0 : index
    %3 = vector.load %arg4[%c0_2, %c0_3, %c0_4] : memref<1x1x32xf32, #tpu.memory_space<vmem>>, vector<1x1x32xf32>
    %4 = vector.shape_cast %3 : vector<1x1x32xf32> to vector<1x32xf32>
    %5 = vector.broadcast %4 : vector<1x32xf32> to vector<4x32xf32>
    %6 = arith.mulf %2, %5 : vector<4x32xf32>
    %c0_5 = arith.constant 0 : index
    %c0_6 = arith.constant 0 : index
    %c0_7 = arith.constant 0 : index
    %7 = vector.load %arg5[%c0_5, %c0_6, %c0_7] : memref<1x1x32xf32, #tpu.memory_space<vmem>>, vector<1x1x32xf32>
    %8 = vector.shape_cast %7 : vector<1x1x32xf32> to vector<1x32xf32>
    %9 = vector.broadcast %8 : vector<1x32xf32> to vector<4x32xf32>
    %10 = arith.addf %6, %9 : vector<4x32xf32>
    %11 = arith.truncf %10 : vector<4x32xf32> to vector<4x32xbf16>
    %cst = arith.constant 0.000000e+00 : bf16
    %12 = vector.broadcast %cst : bf16 to vector<1x32xbf16>
    %13 = tpu.concatenate %12, %11, %12 in 0 : vector<1x32xbf16>, vector<4x32xbf16>, vector<1x32xbf16> -> vector<6x32xbf16>
    %cst_8 = arith.constant 0.000000e+00 : f32
    %14 = vector.broadcast %cst_8 : f32 to vector<4x32xf32>
    %15 = vector.extract_strided_slice %13 {offsets = [0, 0], sizes = [4, 32], strides = [1, 1]} : vector<6x32xbf16> to vector<4x32xbf16>
    %c0_9 = arith.constant 0 : index
    %c0_10 = arith.constant 0 : index
    %16 = vector.load %arg2[%c0_9, %c0_10] : memref<96x32xbf16, #tpu.memory_space<vmem>>, vector<32x32xbf16>
    %cst_11 = arith.constant dense<0.000000e+00> : vector<4x32xf32>
    %17 = tpu.matmul %15, %16, %cst_11 {dimension_numbers = #tpu.dot_dimension_numbers<[1], [0], [0], [1], [0, 0, 1, 1], [], []>} : vector<4x32xbf16>, vector<32x32xbf16>, vector<4x32xf32> -> vector<4x32xf32>
    %18 = arith.addf %14, %17 : vector<4x32xf32>
    %19 = vector.extract_strided_slice %13 {offsets = [1, 0], sizes = [4, 32], strides = [1, 1]} : vector<6x32xbf16> to vector<4x32xbf16>
    %c32 = arith.constant 32 : index
    %c0_12 = arith.constant 0 : index
    %20 = vector.load %arg2[%c32, %c0_12] : memref<96x32xbf16, #tpu.memory_space<vmem>>, vector<32x32xbf16>
    %cst_13 = arith.constant dense<0.000000e+00> : vector<4x32xf32>
    %21 = tpu.matmul %19, %20, %cst_13 {dimension_numbers = #tpu.dot_dimension_numbers<[1], [0], [0], [1], [0, 0, 1, 1], [], []>} : vector<4x32xbf16>, vector<32x32xbf16>, vector<4x32xf32> -> vector<4x32xf32>
    %22 = arith.addf %18, %21 : vector<4x32xf32>
    %23 = vector.extract_strided_slice %13 {offsets = [2, 0], sizes = [4, 32], strides = [1, 1]} : vector<6x32xbf16> to vector<4x32xbf16>
    %c64 = arith.constant 64 : index
    %c0_14 = arith.constant 0 : index
    %24 = vector.load %arg2[%c64, %c0_14] : memref<96x32xbf16, #tpu.memory_space<vmem>>, vector<32x32xbf16>
    %cst_15 = arith.constant dense<0.000000e+00> : vector<4x32xf32>
    %25 = tpu.matmul %23, %24, %cst_15 {dimension_numbers = #tpu.dot_dimension_numbers<[1], [0], [0], [1], [0, 0, 1, 1], [], []>} : vector<4x32xbf16>, vector<32x32xbf16>, vector<4x32xf32> -> vector<4x32xf32>
    %26 = arith.addf %22, %25 : vector<4x32xf32>
    %c0_16 = arith.constant 0 : index
    %c0_17 = arith.constant 0 : index
    %c0_18 = arith.constant 0 : index
    %27 = vector.load %arg3[%c0_16, %c0_17, %c0_18] : memref<1x1x32xf32, #tpu.memory_space<vmem>>, vector<1x1x32xf32>
    %28 = vector.shape_cast %27 : vector<1x1x32xf32> to vector<1x32xf32>
    %29 = vector.broadcast %28 : vector<1x32xf32> to vector<4x32xf32>
    %30 = arith.addf %26, %29 : vector<4x32xf32>
    %cst_19 = arith.constant 0.000000e+00 : f32
    %31 = vector.broadcast %cst_19 : f32 to vector<4x32xf32>
    %32 = arith.maximumf %30, %31 : vector<4x32xf32>
    %33 = arith.truncf %32 : vector<4x32xf32> to vector<4x32xbf16>
    %c0_20 = arith.constant 0 : index
    %c0_21 = arith.constant 0 : index
    %c0_22 = arith.constant 0 : index
    %34 = vector.load %arg6[%c0_20, %c0_21, %c0_22] : memref<1x4x32xbf16, #tpu.memory_space<vmem>>, vector<1x4x32xbf16>
    %35 = vector.shape_cast %34 : vector<1x4x32xbf16> to vector<4x32xbf16>
    %36 = vector.shape_cast %33 : vector<4x32xbf16> to vector<1x4x32xbf16>
    tpu.vector_store %arg6[%c0_20, %c0_21, %c0_22], %36 {strides = array<i32>} : memref<1x4x32xbf16, #tpu.memory_space<vmem>>, vector<1x4x32xbf16>,
    %cst_23 = arith.constant dense<0.000000e+00> : vector<32xf32>
    %37 = vector.multi_reduction <add>, %32, %cst_23 [0] : vector<4x32xf32> to vector<32xf32>
    %38 = vector.shape_cast %37 : vector<32xf32> to vector<1x32xf32>
    %39 = arith.mulf %32, %32 : vector<4x32xf32>
    %cst_24 = arith.constant dense<0.000000e+00> : vector<32xf32>
    %40 = vector.multi_reduction <add>, %39, %cst_24 [0] : vector<4x32xf32> to vector<32xf32>
    %41 = vector.shape_cast %40 : vector<32xf32> to vector<1x32xf32>
    %42 = tpu.concatenate %38, %41 in 0 : vector<1x32xf32>, vector<1x32xf32> -> vector<2x32xf32>
    %c0_25 = arith.constant 0 : index
    %c0_26 = arith.constant 0 : index
    %c0_27 = arith.constant 0 : index
    %43 = vector.load %arg7[%c0_25, %c0_26, %c0_27] : memref<1x2x32xf32, #tpu.memory_space<vmem>>, vector<1x2x32xf32>
    %44 = vector.shape_cast %43 : vector<1x2x32xf32> to vector<2x32xf32>
    %45 = vector.shape_cast %42 : vector<2x32xf32> to vector<1x2x32xf32>
    tpu.vector_store %arg7[%c0_25, %c0_26, %c0_27], %45 {strides = array<i32>} : memref<1x2x32xf32, #tpu.memory_space<vmem>>, vector<1x2x32xf32>,
    return
  }
  func.func @transform_0(%arg0: i32) -> (i32, i32, i32) {
    %c0_i32 = arith.constant 0 : i32
    %c0_i32_0 = arith.constant 0 : i32
    %c0_i32_1 = arith.constant 0 : i32
    return %arg0, %c0_i32, %c0_i32_0 : i32, i32, i32
  }
  func.func @transform_1(%arg0: i32) -> (i32, i32) {
    %c0_i32 = arith.constant 0 : i32
    %c0_i32_0 = arith.constant 0 : i32
    %c0_i32_1 = arith.constant 0 : i32
    return %c0_i32, %c0_i32_0 : i32, i32
  }
  func.func @transform_2(%arg0: i32) -> (i32, i32, i32) {
    %c0_i32 = arith.constant 0 : i32
    %c0_i32_0 = arith.constant 0 : i32
    %c0_i32_1 = arith.constant 0 : i32
    %c0_i32_2 = arith.constant 0 : i32
    return %c0_i32, %c0_i32_0, %c0_i32_1 : i32, i32, i32
  }
  func.func @transform_3(%arg0: i32) -> (i32, i32, i32) {
    %c0_i32 = arith.constant 0 : i32
    %c0_i32_0 = arith.constant 0 : i32
    %c0_i32_1 = arith.constant 0 : i32
    %c0_i32_2 = arith.constant 0 : i32
    return %c0_i32, %c0_i32_0, %c0_i32_1 : i32, i32, i32
  }
  func.func @transform_4(%arg0: i32) -> (i32, i32, i32) {
    %c0_i32 = arith.constant 0 : i32
    %c0_i32_0 = arith.constant 0 : i32
    %c0_i32_1 = arith.constant 0 : i32
    return %arg0, %c0_i32, %c0_i32_0 : i32, i32, i32
  }
  func.func @transform_5(%arg0: i32) -> (i32, i32, i32) {
    %c0_i32 = arith.constant 0 : i32
    %c0_i32_0 = arith.constant 0 : i32
    %c0_i32_1 = arith.constant 0 : i32
    return %arg0, %c0_i32, %c0_i32_0 : i32, i32, i32
  }
  func.func @transform_6(%arg0: i32) -> (i32, i32, i32) {
    %c0_i32 = arith.constant 0 : i32
    %c0_i32_0 = arith.constant 0 : i32
    %c0_i32_1 = arith.constant 0 : i32
    return %arg0, %c0_i32, %c0_i32_0 : i32, i32, i32
  }
}

module attributes {stable_mosaic.version = 11 : i64} {
  func.func @_tap_conv_kernel(%arg0: i32, %arg1: memref<1x4x32xbf16, #tpu.memory_space<vmem>>, %arg2: memref<96x64xbf16, #tpu.memory_space<vmem>>, %arg3: memref<1x1x64xf32, #tpu.memory_space<vmem>>, %arg4: memref<1x1x32xf32, #tpu.memory_space<vmem>>, %arg5: memref<1x1x32xf32, #tpu.memory_space<vmem>>, %arg6: memref<1x4x64xbf16, #tpu.memory_space<vmem>>) attributes {dimension_semantics = [#tpu.dimension_semantics<parallel>], iteration_bounds = array<i64: 2>, scalar_prefetch = 0 : i64, scratch_operands = 0 : i64, tpu.core_type = #tpu.core_type<tc>, window_params = [{transform_indices = @transform_0, window_bounds = array<i64: 1, 4, 32>}, {pipeline_mode = #tpu.pipeline_mode<synchronous>, transform_indices = @transform_1, window_bounds = array<i64: 96, 64>}, {pipeline_mode = #tpu.pipeline_mode<synchronous>, transform_indices = @transform_2, window_bounds = array<i64: 1, 1, 64>}, {pipeline_mode = #tpu.pipeline_mode<synchronous>, transform_indices = @transform_3, window_bounds = array<i64: 1, 1, 32>}, {transform_indices = @transform_4, window_bounds = array<i64: 1, 1, 32>}, {transform_indices = @transform_5, window_bounds = array<i64: 1, 4, 64>}]} {
    %c0 = arith.constant 0 : index
    %c0_0 = arith.constant 0 : index
    %c0_1 = arith.constant 0 : index
    %0 = vector.load %arg1[%c0, %c0_0, %c0_1] : memref<1x4x32xbf16, #tpu.memory_space<vmem>>, vector<1x4x32xbf16>
    %1 = vector.shape_cast %0 : vector<1x4x32xbf16> to vector<4x32xbf16>
    %2 = arith.extf %1 : vector<4x32xbf16> to vector<4x32xf32>
    %c0_2 = arith.constant 0 : index
    %c0_3 = arith.constant 0 : index
    %c0_4 = arith.constant 0 : index
    %3 = vector.load %arg4[%c0_2, %c0_3, %c0_4] : memref<1x1x32xf32, #tpu.memory_space<vmem>>, vector<1x1x32xf32>
    %4 = vector.shape_cast %3 : vector<1x1x32xf32> to vector<1x32xf32>
    %5 = vector.broadcast %4 : vector<1x32xf32> to vector<4x32xf32>
    %6 = arith.mulf %2, %5 : vector<4x32xf32>
    %c0_5 = arith.constant 0 : index
    %c0_6 = arith.constant 0 : index
    %c0_7 = arith.constant 0 : index
    %7 = vector.load %arg5[%c0_5, %c0_6, %c0_7] : memref<1x1x32xf32, #tpu.memory_space<vmem>>, vector<1x1x32xf32>
    %8 = vector.shape_cast %7 : vector<1x1x32xf32> to vector<1x32xf32>
    %9 = vector.broadcast %8 : vector<1x32xf32> to vector<4x32xf32>
    %10 = arith.addf %6, %9 : vector<4x32xf32>
    %11 = arith.truncf %10 : vector<4x32xf32> to vector<4x32xbf16>
    %cst = arith.constant 0.000000e+00 : bf16
    %12 = vector.broadcast %cst : bf16 to vector<1x32xbf16>
    %13 = tpu.concatenate %12, %11, %12 in 0 : vector<1x32xbf16>, vector<4x32xbf16>, vector<1x32xbf16> -> vector<6x32xbf16>
    %cst_8 = arith.constant 0.000000e+00 : f32
    %14 = vector.broadcast %cst_8 : f32 to vector<4x64xf32>
    %15 = vector.extract_strided_slice %13 {offsets = [0, 0], sizes = [4, 32], strides = [1, 1]} : vector<6x32xbf16> to vector<4x32xbf16>
    %c0_9 = arith.constant 0 : index
    %c0_10 = arith.constant 0 : index
    %16 = vector.load %arg2[%c0_9, %c0_10] : memref<96x64xbf16, #tpu.memory_space<vmem>>, vector<32x32xbf16>
    %cst_11 = arith.constant dense<0.000000e+00> : vector<4x32xf32>
    %17 = tpu.matmul %15, %16, %cst_11 {dimension_numbers = #tpu.dot_dimension_numbers<[1], [0], [0], [1], [0, 0, 1, 1], [], []>} : vector<4x32xbf16>, vector<32x32xbf16>, vector<4x32xf32> -> vector<4x32xf32>
    %cst_12 = arith.constant 0.000000e+00 : f32
    %18 = vector.broadcast %cst_12 : f32 to vector<4x32xf32>
    %19 = tpu.concatenate %17, %18 in 1 : vector<4x32xf32>, vector<4x32xf32> -> vector<4x64xf32>
    %20 = arith.addf %14, %19 : vector<4x64xf32>
    %21 = vector.extract_strided_slice %13 {offsets = [1, 0], sizes = [4, 32], strides = [1, 1]} : vector<6x32xbf16> to vector<4x32xbf16>
    %c32 = arith.constant 32 : index
    %c0_13 = arith.constant 0 : index
    %22 = vector.load %arg2[%c32, %c0_13] : memref<96x64xbf16, #tpu.memory_space<vmem>>, vector<32x64xbf16>
    %cst_14 = arith.constant dense<0.000000e+00> : vector<4x64xf32>
    %23 = tpu.matmul %21, %22, %cst_14 {dimension_numbers = #tpu.dot_dimension_numbers<[1], [0], [0], [1], [0, 0, 1, 1], [], []>} : vector<4x32xbf16>, vector<32x64xbf16>, vector<4x64xf32> -> vector<4x64xf32>
    %24 = arith.addf %20, %23 : vector<4x64xf32>
    %25 = vector.extract_strided_slice %13 {offsets = [2, 0], sizes = [4, 32], strides = [1, 1]} : vector<6x32xbf16> to vector<4x32xbf16>
    %c64 = arith.constant 64 : index
    %c32_15 = arith.constant 32 : index
    %26 = vector.load %arg2[%c64, %c32_15] : memref<96x64xbf16, #tpu.memory_space<vmem>>, vector<32x32xbf16>
    %cst_16 = arith.constant dense<0.000000e+00> : vector<4x32xf32>
    %27 = tpu.matmul %25, %26, %cst_16 {dimension_numbers = #tpu.dot_dimension_numbers<[1], [0], [0], [1], [0, 0, 1, 1], [], []>} : vector<4x32xbf16>, vector<32x32xbf16>, vector<4x32xf32> -> vector<4x32xf32>
    %cst_17 = arith.constant 0.000000e+00 : f32
    %28 = vector.broadcast %cst_17 : f32 to vector<4x32xf32>
    %29 = tpu.concatenate %28, %27 in 1 : vector<4x32xf32>, vector<4x32xf32> -> vector<4x64xf32>
    %30 = arith.addf %24, %29 : vector<4x64xf32>
    %c0_18 = arith.constant 0 : index
    %c0_19 = arith.constant 0 : index
    %c0_20 = arith.constant 0 : index
    %31 = vector.load %arg3[%c0_18, %c0_19, %c0_20] : memref<1x1x64xf32, #tpu.memory_space<vmem>>, vector<1x1x64xf32>
    %32 = vector.shape_cast %31 : vector<1x1x64xf32> to vector<1x64xf32>
    %33 = vector.broadcast %32 : vector<1x64xf32> to vector<4x64xf32>
    %34 = arith.addf %30, %33 : vector<4x64xf32>
    %35 = arith.truncf %34 : vector<4x64xf32> to vector<4x64xbf16>
    %c0_21 = arith.constant 0 : index
    %c0_22 = arith.constant 0 : index
    %c0_23 = arith.constant 0 : index
    %36 = vector.load %arg6[%c0_21, %c0_22, %c0_23] : memref<1x4x64xbf16, #tpu.memory_space<vmem>>, vector<1x4x64xbf16>
    %37 = vector.shape_cast %36 : vector<1x4x64xbf16> to vector<4x64xbf16>
    %38 = vector.shape_cast %35 : vector<4x64xbf16> to vector<1x4x64xbf16>
    tpu.vector_store %arg6[%c0_21, %c0_22, %c0_23], %38 {strides = array<i32>} : memref<1x4x64xbf16, #tpu.memory_space<vmem>>, vector<1x4x64xbf16>,
    return
  }
  func.func @transform_0(%arg0: i32) -> (i32, i32, i32) {
    %c0_i32 = arith.constant 0 : i32
    %c0_i32_0 = arith.constant 0 : i32
    %c0_i32_1 = arith.constant 0 : i32
    return %arg0, %c0_i32, %c0_i32_0 : i32, i32, i32
  }
  func.func @transform_1(%arg0: i32) -> (i32, i32) {
    %c0_i32 = arith.constant 0 : i32
    %c0_i32_0 = arith.constant 0 : i32
    %c0_i32_1 = arith.constant 0 : i32
    return %c0_i32, %c0_i32_0 : i32, i32
  }
  func.func @transform_2(%arg0: i32) -> (i32, i32, i32) {
    %c0_i32 = arith.constant 0 : i32
    %c0_i32_0 = arith.constant 0 : i32
    %c0_i32_1 = arith.constant 0 : i32
    %c0_i32_2 = arith.constant 0 : i32
    return %c0_i32, %c0_i32_0, %c0_i32_1 : i32, i32, i32
  }
  func.func @transform_3(%arg0: i32) -> (i32, i32, i32) {
    %c0_i32 = arith.constant 0 : i32
    %c0_i32_0 = arith.constant 0 : i32
    %c0_i32_1 = arith.constant 0 : i32
    %c0_i32_2 = arith.constant 0 : i32
    return %c0_i32, %c0_i32_0, %c0_i32_1 : i32, i32, i32
  }
  func.func @transform_4(%arg0: i32) -> (i32, i32, i32) {
    %c0_i32 = arith.constant 0 : i32
    %c0_i32_0 = arith.constant 0 : i32
    %c0_i32_1 = arith.constant 0 : i32
    return %arg0, %c0_i32, %c0_i32_0 : i32, i32, i32
  }
  func.func @transform_5(%arg0: i32) -> (i32, i32, i32) {
    %c0_i32 = arith.constant 0 : i32
    %c0_i32_0 = arith.constant 0 : i32
    %c0_i32_1 = arith.constant 0 : i32
    return %arg0, %c0_i32, %c0_i32_0 : i32, i32, i32
  }
}

module attributes {stable_mosaic.version = 11 : i64} {
  func.func @_tap_conv_kernel(%arg0: i32, %arg1: memref<1x8x32xbf16, #tpu.memory_space<vmem>>, %arg2: memref<1x8x32xbf16, #tpu.memory_space<vmem>>, %arg3: memref<192x16xbf16, #tpu.memory_space<vmem>>, %arg4: memref<1x1x16xf32, #tpu.memory_space<vmem>>, %arg5: memref<1x8x16xbf16, #tpu.memory_space<vmem>>, %arg6: memref<1x2x16xf32, #tpu.memory_space<vmem>>) attributes {dimension_semantics = [#tpu.dimension_semantics<parallel>], iteration_bounds = array<i64: 2>, scalar_prefetch = 0 : i64, scratch_operands = 0 : i64, tpu.core_type = #tpu.core_type<tc>, window_params = [{transform_indices = @transform_0, window_bounds = array<i64: 1, 8, 32>}, {transform_indices = @transform_1, window_bounds = array<i64: 1, 8, 32>}, {pipeline_mode = #tpu.pipeline_mode<synchronous>, transform_indices = @transform_2, window_bounds = array<i64: 192, 16>}, {pipeline_mode = #tpu.pipeline_mode<synchronous>, transform_indices = @transform_3, window_bounds = array<i64: 1, 1, 16>}, {transform_indices = @transform_4, window_bounds = array<i64: 1, 8, 16>}, {transform_indices = @transform_5, window_bounds = array<i64: 1, 2, 16>}]} {
    %c0 = arith.constant 0 : index
    %c0_0 = arith.constant 0 : index
    %c0_1 = arith.constant 0 : index
    %0 = vector.load %arg1[%c0, %c0_0, %c0_1] : memref<1x8x32xbf16, #tpu.memory_space<vmem>>, vector<1x8x32xbf16>
    %1 = vector.shape_cast %0 : vector<1x8x32xbf16> to vector<8x32xbf16>
    %cst = arith.constant 0.000000e+00 : bf16
    %2 = vector.broadcast %cst : bf16 to vector<1x32xbf16>
    %3 = tpu.concatenate %2, %1, %2 in 0 : vector<1x32xbf16>, vector<8x32xbf16>, vector<1x32xbf16> -> vector<10x32xbf16>
    %c0_2 = arith.constant 0 : index
    %c0_3 = arith.constant 0 : index
    %c0_4 = arith.constant 0 : index
    %4 = vector.load %arg2[%c0_2, %c0_3, %c0_4] : memref<1x8x32xbf16, #tpu.memory_space<vmem>>, vector<1x8x32xbf16>
    %5 = vector.shape_cast %4 : vector<1x8x32xbf16> to vector<8x32xbf16>
    %cst_5 = arith.constant 0.000000e+00 : bf16
    %6 = vector.broadcast %cst_5 : bf16 to vector<1x32xbf16>
    %7 = tpu.concatenate %6, %5, %6 in 0 : vector<1x32xbf16>, vector<8x32xbf16>, vector<1x32xbf16> -> vector<10x32xbf16>
    %cst_6 = arith.constant 0.000000e+00 : f32
    %8 = vector.broadcast %cst_6 : f32 to vector<8x16xf32>
    %9 = vector.extract_strided_slice %3 {offsets = [0, 0], sizes = [8, 32], strides = [1, 1]} : vector<10x32xbf16> to vector<8x32xbf16>
    %c0_7 = arith.constant 0 : index
    %c0_8 = arith.constant 0 : index
    %10 = vector.load %arg3[%c0_7, %c0_8] : memref<192x16xbf16, #tpu.memory_space<vmem>>, vector<32x16xbf16>
    %cst_9 = arith.constant dense<0.000000e+00> : vector<8x16xf32>
    %11 = tpu.matmul %9, %10, %cst_9 {dimension_numbers = #tpu.dot_dimension_numbers<[1], [0], [0], [1], [0, 0, 1, 1], [], []>} : vector<8x32xbf16>, vector<32x16xbf16>, vector<8x16xf32> -> vector<8x16xf32>
    %12 = vector.extract_strided_slice %7 {offsets = [0, 0], sizes = [8, 32], strides = [1, 1]} : vector<10x32xbf16> to vector<8x32xbf16>
    %c32 = arith.constant 32 : index
    %c0_10 = arith.constant 0 : index
    %13 = vector.load %arg3[%c32, %c0_10] : memref<192x16xbf16, #tpu.memory_space<vmem>>, vector<32x16xbf16>
    %cst_11 = arith.constant dense<0.000000e+00> : vector<8x16xf32>
    %14 = tpu.matmul %12, %13, %cst_11 {dimension_numbers = #tpu.dot_dimension_numbers<[1], [0], [0], [1], [0, 0, 1, 1], [], []>} : vector<8x32xbf16>, vector<32x16xbf16>, vector<8x16xf32> -> vector<8x16xf32>
    %15 = arith.addf %11, %14 : vector<8x16xf32>
    %16 = arith.addf %8, %15 : vector<8x16xf32>
    %17 = vector.extract_strided_slice %3 {offsets = [1, 0], sizes = [8, 32], strides = [1, 1]} : vector<10x32xbf16> to vector<8x32xbf16>
    %c64 = arith.constant 64 : index
    %c0_12 = arith.constant 0 : index
    %18 = vector.load %arg3[%c64, %c0_12] : memref<192x16xbf16, #tpu.memory_space<vmem>>, vector<32x16xbf16>
    %cst_13 = arith.constant dense<0.000000e+00> : vector<8x16xf32>
    %19 = tpu.matmul %17, %18, %cst_13 {dimension_numbers = #tpu.dot_dimension_numbers<[1], [0], [0], [1], [0, 0, 1, 1], [], []>} : vector<8x32xbf16>, vector<32x16xbf16>, vector<8x16xf32> -> vector<8x16xf32>
    %20 = vector.extract_strided_slice %7 {offsets = [1, 0], sizes = [8, 32], strides = [1, 1]} : vector<10x32xbf16> to vector<8x32xbf16>
    %c96 = arith.constant 96 : index
    %c0_14 = arith.constant 0 : index
    %21 = vector.load %arg3[%c96, %c0_14] : memref<192x16xbf16, #tpu.memory_space<vmem>>, vector<32x16xbf16>
    %cst_15 = arith.constant dense<0.000000e+00> : vector<8x16xf32>
    %22 = tpu.matmul %20, %21, %cst_15 {dimension_numbers = #tpu.dot_dimension_numbers<[1], [0], [0], [1], [0, 0, 1, 1], [], []>} : vector<8x32xbf16>, vector<32x16xbf16>, vector<8x16xf32> -> vector<8x16xf32>
    %23 = arith.addf %19, %22 : vector<8x16xf32>
    %24 = arith.addf %16, %23 : vector<8x16xf32>
    %25 = vector.extract_strided_slice %3 {offsets = [2, 0], sizes = [8, 32], strides = [1, 1]} : vector<10x32xbf16> to vector<8x32xbf16>
    %c128 = arith.constant 128 : index
    %c0_16 = arith.constant 0 : index
    %26 = vector.load %arg3[%c128, %c0_16] : memref<192x16xbf16, #tpu.memory_space<vmem>>, vector<32x16xbf16>
    %cst_17 = arith.constant dense<0.000000e+00> : vector<8x16xf32>
    %27 = tpu.matmul %25, %26, %cst_17 {dimension_numbers = #tpu.dot_dimension_numbers<[1], [0], [0], [1], [0, 0, 1, 1], [], []>} : vector<8x32xbf16>, vector<32x16xbf16>, vector<8x16xf32> -> vector<8x16xf32>
    %28 = vector.extract_strided_slice %7 {offsets = [2, 0], sizes = [8, 32], strides = [1, 1]} : vector<10x32xbf16> to vector<8x32xbf16>
    %c160 = arith.constant 160 : index
    %c0_18 = arith.constant 0 : index
    %29 = vector.load %arg3[%c160, %c0_18] : memref<192x16xbf16, #tpu.memory_space<vmem>>, vector<32x16xbf16>
    %cst_19 = arith.constant dense<0.000000e+00> : vector<8x16xf32>
    %30 = tpu.matmul %28, %29, %cst_19 {dimension_numbers = #tpu.dot_dimension_numbers<[1], [0], [0], [1], [0, 0, 1, 1], [], []>} : vector<8x32xbf16>, vector<32x16xbf16>, vector<8x16xf32> -> vector<8x16xf32>
    %31 = arith.addf %27, %30 : vector<8x16xf32>
    %32 = arith.addf %24, %31 : vector<8x16xf32>
    %c0_20 = arith.constant 0 : index
    %c0_21 = arith.constant 0 : index
    %c0_22 = arith.constant 0 : index
    %33 = vector.load %arg4[%c0_20, %c0_21, %c0_22] : memref<1x1x16xf32, #tpu.memory_space<vmem>>, vector<1x1x16xf32>
    %34 = vector.shape_cast %33 : vector<1x1x16xf32> to vector<1x16xf32>
    %35 = vector.broadcast %34 : vector<1x16xf32> to vector<8x16xf32>
    %36 = arith.addf %32, %35 : vector<8x16xf32>
    %cst_23 = arith.constant 0.000000e+00 : f32
    %37 = vector.broadcast %cst_23 : f32 to vector<8x16xf32>
    %38 = arith.maximumf %36, %37 : vector<8x16xf32>
    %39 = arith.truncf %38 : vector<8x16xf32> to vector<8x16xbf16>
    %c0_24 = arith.constant 0 : index
    %c0_25 = arith.constant 0 : index
    %c0_26 = arith.constant 0 : index
    %40 = vector.load %arg5[%c0_24, %c0_25, %c0_26] : memref<1x8x16xbf16, #tpu.memory_space<vmem>>, vector<1x8x16xbf16>
    %41 = vector.shape_cast %40 : vector<1x8x16xbf16> to vector<8x16xbf16>
    %42 = vector.shape_cast %39 : vector<8x16xbf16> to vector<1x8x16xbf16>
    tpu.vector_store %arg5[%c0_24, %c0_25, %c0_26], %42 {strides = array<i32>} : memref<1x8x16xbf16, #tpu.memory_space<vmem>>, vector<1x8x16xbf16>,
    %cst_27 = arith.constant dense<0.000000e+00> : vector<16xf32>
    %43 = vector.multi_reduction <add>, %38, %cst_27 [0] : vector<8x16xf32> to vector<16xf32>
    %44 = vector.shape_cast %43 : vector<16xf32> to vector<1x16xf32>
    %45 = arith.mulf %38, %38 : vector<8x16xf32>
    %cst_28 = arith.constant dense<0.000000e+00> : vector<16xf32>
    %46 = vector.multi_reduction <add>, %45, %cst_28 [0] : vector<8x16xf32> to vector<16xf32>
    %47 = vector.shape_cast %46 : vector<16xf32> to vector<1x16xf32>
    %48 = tpu.concatenate %44, %47 in 0 : vector<1x16xf32>, vector<1x16xf32> -> vector<2x16xf32>
    %c0_29 = arith.constant 0 : index
    %c0_30 = arith.constant 0 : index
    %c0_31 = arith.constant 0 : index
    %49 = vector.load %arg6[%c0_29, %c0_30, %c0_31] : memref<1x2x16xf32, #tpu.memory_space<vmem>>, vector<1x2x16xf32>
    %50 = vector.shape_cast %49 : vector<1x2x16xf32> to vector<2x16xf32>
    %51 = vector.shape_cast %48 : vector<2x16xf32> to vector<1x2x16xf32>
    tpu.vector_store %arg6[%c0_29, %c0_30, %c0_31], %51 {strides = array<i32>} : memref<1x2x16xf32, #tpu.memory_space<vmem>>, vector<1x2x16xf32>,
    return
  }
  func.func @transform_0(%arg0: i32) -> (i32, i32, i32) {
    %c0_i32 = arith.constant 0 : i32
    %c0_i32_0 = arith.constant 0 : i32
    %c0_i32_1 = arith.constant 0 : i32
    return %arg0, %c0_i32, %c0_i32_0 : i32, i32, i32
  }
  func.func @transform_1(%arg0: i32) -> (i32, i32, i32) {
    %c0_i32 = arith.constant 0 : i32
    %c0_i32_0 = arith.constant 0 : i32
    %c0_i32_1 = arith.constant 0 : i32
    return %arg0, %c0_i32, %c0_i32_0 : i32, i32, i32
  }
  func.func @transform_2(%arg0: i32) -> (i32, i32) {
    %c0_i32 = arith.constant 0 : i32
    %c0_i32_0 = arith.constant 0 : i32
    %c0_i32_1 = arith.constant 0 : i32
    return %c0_i32, %c0_i32_0 : i32, i32
  }
  func.func @transform_3(%arg0: i32) -> (i32, i32, i32) {
    %c0_i32 = arith.constant 0 : i32
    %c0_i32_0 = arith.constant 0 : i32
    %c0_i32_1 = arith.constant 0 : i32
    %c0_i32_2 = arith.constant 0 : i32
    return %c0_i32, %c0_i32_0, %c0_i32_1 : i32, i32, i32
  }
  func.func @transform_4(%arg0: i32) -> (i32, i32, i32) {
    %c0_i32 = arith.constant 0 : i32
    %c0_i32_0 = arith.constant 0 : i32
    %c0_i32_1 = arith.constant 0 : i32
    return %arg0, %c0_i32, %c0_i32_0 : i32, i32, i32
  }
  func.func @transform_5(%arg0: i32) -> (i32, i32, i32) {
    %c0_i32 = arith.constant 0 : i32
    %c0_i32_0 = arith.constant 0 : i32
    %c0_i32_1 = arith.constant 0 : i32
    return %arg0, %c0_i32, %c0_i32_0 : i32, i32, i32
  }
}

module attributes {stable_mosaic.version = 11 : i64} {
  func.func @_tap_conv_kernel(%arg0: i32, %arg1: memref<1x8x16xbf16, #tpu.memory_space<vmem>>, %arg2: memref<48x16xbf16, #tpu.memory_space<vmem>>, %arg3: memref<1x1x16xf32, #tpu.memory_space<vmem>>, %arg4: memref<1x1x16xf32, #tpu.memory_space<vmem>>, %arg5: memref<1x1x16xf32, #tpu.memory_space<vmem>>, %arg6: memref<1x8x16xbf16, #tpu.memory_space<vmem>>, %arg7: memref<1x2x16xf32, #tpu.memory_space<vmem>>) attributes {dimension_semantics = [#tpu.dimension_semantics<parallel>], iteration_bounds = array<i64: 2>, scalar_prefetch = 0 : i64, scratch_operands = 0 : i64, tpu.core_type = #tpu.core_type<tc>, window_params = [{transform_indices = @transform_0, window_bounds = array<i64: 1, 8, 16>}, {pipeline_mode = #tpu.pipeline_mode<synchronous>, transform_indices = @transform_1, window_bounds = array<i64: 48, 16>}, {pipeline_mode = #tpu.pipeline_mode<synchronous>, transform_indices = @transform_2, window_bounds = array<i64: 1, 1, 16>}, {pipeline_mode = #tpu.pipeline_mode<synchronous>, transform_indices = @transform_3, window_bounds = array<i64: 1, 1, 16>}, {transform_indices = @transform_4, window_bounds = array<i64: 1, 1, 16>}, {transform_indices = @transform_5, window_bounds = array<i64: 1, 8, 16>}, {transform_indices = @transform_6, window_bounds = array<i64: 1, 2, 16>}]} {
    %c0 = arith.constant 0 : index
    %c0_0 = arith.constant 0 : index
    %c0_1 = arith.constant 0 : index
    %0 = vector.load %arg1[%c0, %c0_0, %c0_1] : memref<1x8x16xbf16, #tpu.memory_space<vmem>>, vector<1x8x16xbf16>
    %1 = vector.shape_cast %0 : vector<1x8x16xbf16> to vector<8x16xbf16>
    %2 = arith.extf %1 : vector<8x16xbf16> to vector<8x16xf32>
    %c0_2 = arith.constant 0 : index
    %c0_3 = arith.constant 0 : index
    %c0_4 = arith.constant 0 : index
    %3 = vector.load %arg4[%c0_2, %c0_3, %c0_4] : memref<1x1x16xf32, #tpu.memory_space<vmem>>, vector<1x1x16xf32>
    %4 = vector.shape_cast %3 : vector<1x1x16xf32> to vector<1x16xf32>
    %5 = vector.broadcast %4 : vector<1x16xf32> to vector<8x16xf32>
    %6 = arith.mulf %2, %5 : vector<8x16xf32>
    %c0_5 = arith.constant 0 : index
    %c0_6 = arith.constant 0 : index
    %c0_7 = arith.constant 0 : index
    %7 = vector.load %arg5[%c0_5, %c0_6, %c0_7] : memref<1x1x16xf32, #tpu.memory_space<vmem>>, vector<1x1x16xf32>
    %8 = vector.shape_cast %7 : vector<1x1x16xf32> to vector<1x16xf32>
    %9 = vector.broadcast %8 : vector<1x16xf32> to vector<8x16xf32>
    %10 = arith.addf %6, %9 : vector<8x16xf32>
    %11 = arith.truncf %10 : vector<8x16xf32> to vector<8x16xbf16>
    %cst = arith.constant 0.000000e+00 : bf16
    %12 = vector.broadcast %cst : bf16 to vector<1x16xbf16>
    %13 = tpu.concatenate %12, %11, %12 in 0 : vector<1x16xbf16>, vector<8x16xbf16>, vector<1x16xbf16> -> vector<10x16xbf16>
    %cst_8 = arith.constant 0.000000e+00 : f32
    %14 = vector.broadcast %cst_8 : f32 to vector<8x16xf32>
    %15 = vector.extract_strided_slice %13 {offsets = [0, 0], sizes = [8, 16], strides = [1, 1]} : vector<10x16xbf16> to vector<8x16xbf16>
    %c0_9 = arith.constant 0 : index
    %c0_10 = arith.constant 0 : index
    %16 = vector.load %arg2[%c0_9, %c0_10] : memref<48x16xbf16, #tpu.memory_space<vmem>>, vector<16x16xbf16>
    %cst_11 = arith.constant dense<0.000000e+00> : vector<8x16xf32>
    %17 = tpu.matmul %15, %16, %cst_11 {dimension_numbers = #tpu.dot_dimension_numbers<[1], [0], [0], [1], [0, 0, 1, 1], [], []>} : vector<8x16xbf16>, vector<16x16xbf16>, vector<8x16xf32> -> vector<8x16xf32>
    %18 = arith.addf %14, %17 : vector<8x16xf32>
    %19 = vector.extract_strided_slice %13 {offsets = [1, 0], sizes = [8, 16], strides = [1, 1]} : vector<10x16xbf16> to vector<8x16xbf16>
    %c16 = arith.constant 16 : index
    %c0_12 = arith.constant 0 : index
    %20 = vector.load %arg2[%c16, %c0_12] : memref<48x16xbf16, #tpu.memory_space<vmem>>, vector<16x16xbf16>
    %cst_13 = arith.constant dense<0.000000e+00> : vector<8x16xf32>
    %21 = tpu.matmul %19, %20, %cst_13 {dimension_numbers = #tpu.dot_dimension_numbers<[1], [0], [0], [1], [0, 0, 1, 1], [], []>} : vector<8x16xbf16>, vector<16x16xbf16>, vector<8x16xf32> -> vector<8x16xf32>
    %22 = arith.addf %18, %21 : vector<8x16xf32>
    %23 = vector.extract_strided_slice %13 {offsets = [2, 0], sizes = [8, 16], strides = [1, 1]} : vector<10x16xbf16> to vector<8x16xbf16>
    %c32 = arith.constant 32 : index
    %c0_14 = arith.constant 0 : index
    %24 = vector.load %arg2[%c32, %c0_14] : memref<48x16xbf16, #tpu.memory_space<vmem>>, vector<16x16xbf16>
    %cst_15 = arith.constant dense<0.000000e+00> : vector<8x16xf32>
    %25 = tpu.matmul %23, %24, %cst_15 {dimension_numbers = #tpu.dot_dimension_numbers<[1], [0], [0], [1], [0, 0, 1, 1], [], []>} : vector<8x16xbf16>, vector<16x16xbf16>, vector<8x16xf32> -> vector<8x16xf32>
    %26 = arith.addf %22, %25 : vector<8x16xf32>
    %c0_16 = arith.constant 0 : index
    %c0_17 = arith.constant 0 : index
    %c0_18 = arith.constant 0 : index
    %27 = vector.load %arg3[%c0_16, %c0_17, %c0_18] : memref<1x1x16xf32, #tpu.memory_space<vmem>>, vector<1x1x16xf32>
    %28 = vector.shape_cast %27 : vector<1x1x16xf32> to vector<1x16xf32>
    %29 = vector.broadcast %28 : vector<1x16xf32> to vector<8x16xf32>
    %30 = arith.addf %26, %29 : vector<8x16xf32>
    %cst_19 = arith.constant 0.000000e+00 : f32
    %31 = vector.broadcast %cst_19 : f32 to vector<8x16xf32>
    %32 = arith.maximumf %30, %31 : vector<8x16xf32>
    %33 = arith.truncf %32 : vector<8x16xf32> to vector<8x16xbf16>
    %c0_20 = arith.constant 0 : index
    %c0_21 = arith.constant 0 : index
    %c0_22 = arith.constant 0 : index
    %34 = vector.load %arg6[%c0_20, %c0_21, %c0_22] : memref<1x8x16xbf16, #tpu.memory_space<vmem>>, vector<1x8x16xbf16>
    %35 = vector.shape_cast %34 : vector<1x8x16xbf16> to vector<8x16xbf16>
    %36 = vector.shape_cast %33 : vector<8x16xbf16> to vector<1x8x16xbf16>
    tpu.vector_store %arg6[%c0_20, %c0_21, %c0_22], %36 {strides = array<i32>} : memref<1x8x16xbf16, #tpu.memory_space<vmem>>, vector<1x8x16xbf16>,
    %cst_23 = arith.constant dense<0.000000e+00> : vector<16xf32>
    %37 = vector.multi_reduction <add>, %32, %cst_23 [0] : vector<8x16xf32> to vector<16xf32>
    %38 = vector.shape_cast %37 : vector<16xf32> to vector<1x16xf32>
    %39 = arith.mulf %32, %32 : vector<8x16xf32>
    %cst_24 = arith.constant dense<0.000000e+00> : vector<16xf32>
    %40 = vector.multi_reduction <add>, %39, %cst_24 [0] : vector<8x16xf32> to vector<16xf32>
    %41 = vector.shape_cast %40 : vector<16xf32> to vector<1x16xf32>
    %42 = tpu.concatenate %38, %41 in 0 : vector<1x16xf32>, vector<1x16xf32> -> vector<2x16xf32>
    %c0_25 = arith.constant 0 : index
    %c0_26 = arith.constant 0 : index
    %c0_27 = arith.constant 0 : index
    %43 = vector.load %arg7[%c0_25, %c0_26, %c0_27] : memref<1x2x16xf32, #tpu.memory_space<vmem>>, vector<1x2x16xf32>
    %44 = vector.shape_cast %43 : vector<1x2x16xf32> to vector<2x16xf32>
    %45 = vector.shape_cast %42 : vector<2x16xf32> to vector<1x2x16xf32>
    tpu.vector_store %arg7[%c0_25, %c0_26, %c0_27], %45 {strides = array<i32>} : memref<1x2x16xf32, #tpu.memory_space<vmem>>, vector<1x2x16xf32>,
    return
  }
  func.func @transform_0(%arg0: i32) -> (i32, i32, i32) {
    %c0_i32 = arith.constant 0 : i32
    %c0_i32_0 = arith.constant 0 : i32
    %c0_i32_1 = arith.constant 0 : i32
    return %arg0, %c0_i32, %c0_i32_0 : i32, i32, i32
  }
  func.func @transform_1(%arg0: i32) -> (i32, i32) {
    %c0_i32 = arith.constant 0 : i32
    %c0_i32_0 = arith.constant 0 : i32
    %c0_i32_1 = arith.constant 0 : i32
    return %c0_i32, %c0_i32_0 : i32, i32
  }
  func.func @transform_2(%arg0: i32) -> (i32, i32, i32) {
    %c0_i32 = arith.constant 0 : i32
    %c0_i32_0 = arith.constant 0 : i32
    %c0_i32_1 = arith.constant 0 : i32
    %c0_i32_2 = arith.constant 0 : i32
    return %c0_i32, %c0_i32_0, %c0_i32_1 : i32, i32, i32
  }
  func.func @transform_3(%arg0: i32) -> (i32, i32, i32) {
    %c0_i32 = arith.constant 0 : i32
    %c0_i32_0 = arith.constant 0 : i32
    %c0_i32_1 = arith.constant 0 : i32
    %c0_i32_2 = arith.constant 0 : i32
    return %c0_i32, %c0_i32_0, %c0_i32_1 : i32, i32, i32
  }
  func.func @transform_4(%arg0: i32) -> (i32, i32, i32) {
    %c0_i32 = arith.constant 0 : i32
    %c0_i32_0 = arith.constant 0 : i32
    %c0_i32_1 = arith.constant 0 : i32
    return %arg0, %c0_i32, %c0_i32_0 : i32, i32, i32
  }
  func.func @transform_5(%arg0: i32) -> (i32, i32, i32) {
    %c0_i32 = arith.constant 0 : i32
    %c0_i32_0 = arith.constant 0 : i32
    %c0_i32_1 = arith.constant 0 : i32
    return %arg0, %c0_i32, %c0_i32_0 : i32, i32, i32
  }
  func.func @transform_6(%arg0: i32) -> (i32, i32, i32) {
    %c0_i32 = arith.constant 0 : i32
    %c0_i32_0 = arith.constant 0 : i32
    %c0_i32_1 = arith.constant 0 : i32
    return %arg0, %c0_i32, %c0_i32_0 : i32, i32, i32
  }
}

module attributes {stable_mosaic.version = 11 : i64} {
  func.func @_tap_conv_kernel(%arg0: i32, %arg1: memref<1x8x16xbf16, #tpu.memory_space<vmem>>, %arg2: memref<48x32xbf16, #tpu.memory_space<vmem>>, %arg3: memref<1x1x32xf32, #tpu.memory_space<vmem>>, %arg4: memref<1x1x16xf32, #tpu.memory_space<vmem>>, %arg5: memref<1x1x16xf32, #tpu.memory_space<vmem>>, %arg6: memref<1x8x32xbf16, #tpu.memory_space<vmem>>) attributes {dimension_semantics = [#tpu.dimension_semantics<parallel>], iteration_bounds = array<i64: 2>, scalar_prefetch = 0 : i64, scratch_operands = 0 : i64, tpu.core_type = #tpu.core_type<tc>, window_params = [{transform_indices = @transform_0, window_bounds = array<i64: 1, 8, 16>}, {pipeline_mode = #tpu.pipeline_mode<synchronous>, transform_indices = @transform_1, window_bounds = array<i64: 48, 32>}, {pipeline_mode = #tpu.pipeline_mode<synchronous>, transform_indices = @transform_2, window_bounds = array<i64: 1, 1, 32>}, {pipeline_mode = #tpu.pipeline_mode<synchronous>, transform_indices = @transform_3, window_bounds = array<i64: 1, 1, 16>}, {transform_indices = @transform_4, window_bounds = array<i64: 1, 1, 16>}, {transform_indices = @transform_5, window_bounds = array<i64: 1, 8, 32>}]} {
    %c0 = arith.constant 0 : index
    %c0_0 = arith.constant 0 : index
    %c0_1 = arith.constant 0 : index
    %0 = vector.load %arg1[%c0, %c0_0, %c0_1] : memref<1x8x16xbf16, #tpu.memory_space<vmem>>, vector<1x8x16xbf16>
    %1 = vector.shape_cast %0 : vector<1x8x16xbf16> to vector<8x16xbf16>
    %2 = arith.extf %1 : vector<8x16xbf16> to vector<8x16xf32>
    %c0_2 = arith.constant 0 : index
    %c0_3 = arith.constant 0 : index
    %c0_4 = arith.constant 0 : index
    %3 = vector.load %arg4[%c0_2, %c0_3, %c0_4] : memref<1x1x16xf32, #tpu.memory_space<vmem>>, vector<1x1x16xf32>
    %4 = vector.shape_cast %3 : vector<1x1x16xf32> to vector<1x16xf32>
    %5 = vector.broadcast %4 : vector<1x16xf32> to vector<8x16xf32>
    %6 = arith.mulf %2, %5 : vector<8x16xf32>
    %c0_5 = arith.constant 0 : index
    %c0_6 = arith.constant 0 : index
    %c0_7 = arith.constant 0 : index
    %7 = vector.load %arg5[%c0_5, %c0_6, %c0_7] : memref<1x1x16xf32, #tpu.memory_space<vmem>>, vector<1x1x16xf32>
    %8 = vector.shape_cast %7 : vector<1x1x16xf32> to vector<1x16xf32>
    %9 = vector.broadcast %8 : vector<1x16xf32> to vector<8x16xf32>
    %10 = arith.addf %6, %9 : vector<8x16xf32>
    %11 = arith.truncf %10 : vector<8x16xf32> to vector<8x16xbf16>
    %cst = arith.constant 0.000000e+00 : bf16
    %12 = vector.broadcast %cst : bf16 to vector<1x16xbf16>
    %13 = tpu.concatenate %12, %11, %12 in 0 : vector<1x16xbf16>, vector<8x16xbf16>, vector<1x16xbf16> -> vector<10x16xbf16>
    %cst_8 = arith.constant 0.000000e+00 : f32
    %14 = vector.broadcast %cst_8 : f32 to vector<8x32xf32>
    %15 = vector.extract_strided_slice %13 {offsets = [0, 0], sizes = [8, 16], strides = [1, 1]} : vector<10x16xbf16> to vector<8x16xbf16>
    %c0_9 = arith.constant 0 : index
    %c0_10 = arith.constant 0 : index
    %16 = vector.load %arg2[%c0_9, %c0_10] : memref<48x32xbf16, #tpu.memory_space<vmem>>, vector<16x16xbf16>
    %cst_11 = arith.constant dense<0.000000e+00> : vector<8x16xf32>
    %17 = tpu.matmul %15, %16, %cst_11 {dimension_numbers = #tpu.dot_dimension_numbers<[1], [0], [0], [1], [0, 0, 1, 1], [], []>} : vector<8x16xbf16>, vector<16x16xbf16>, vector<8x16xf32> -> vector<8x16xf32>
    %cst_12 = arith.constant 0.000000e+00 : f32
    %18 = vector.broadcast %cst_12 : f32 to vector<8x16xf32>
    %19 = tpu.concatenate %17, %18 in 1 : vector<8x16xf32>, vector<8x16xf32> -> vector<8x32xf32>
    %20 = arith.addf %14, %19 : vector<8x32xf32>
    %21 = vector.extract_strided_slice %13 {offsets = [1, 0], sizes = [8, 16], strides = [1, 1]} : vector<10x16xbf16> to vector<8x16xbf16>
    %c16 = arith.constant 16 : index
    %c0_13 = arith.constant 0 : index
    %22 = vector.load %arg2[%c16, %c0_13] : memref<48x32xbf16, #tpu.memory_space<vmem>>, vector<16x32xbf16>
    %cst_14 = arith.constant dense<0.000000e+00> : vector<8x32xf32>
    %23 = tpu.matmul %21, %22, %cst_14 {dimension_numbers = #tpu.dot_dimension_numbers<[1], [0], [0], [1], [0, 0, 1, 1], [], []>} : vector<8x16xbf16>, vector<16x32xbf16>, vector<8x32xf32> -> vector<8x32xf32>
    %24 = arith.addf %20, %23 : vector<8x32xf32>
    %25 = vector.extract_strided_slice %13 {offsets = [2, 0], sizes = [8, 16], strides = [1, 1]} : vector<10x16xbf16> to vector<8x16xbf16>
    %c32 = arith.constant 32 : index
    %c16_15 = arith.constant 16 : index
    %26 = vector.load %arg2[%c32, %c16_15] : memref<48x32xbf16, #tpu.memory_space<vmem>>, vector<16x16xbf16>
    %cst_16 = arith.constant dense<0.000000e+00> : vector<8x16xf32>
    %27 = tpu.matmul %25, %26, %cst_16 {dimension_numbers = #tpu.dot_dimension_numbers<[1], [0], [0], [1], [0, 0, 1, 1], [], []>} : vector<8x16xbf16>, vector<16x16xbf16>, vector<8x16xf32> -> vector<8x16xf32>
    %cst_17 = arith.constant 0.000000e+00 : f32
    %28 = vector.broadcast %cst_17 : f32 to vector<8x16xf32>
    %29 = tpu.concatenate %28, %27 in 1 : vector<8x16xf32>, vector<8x16xf32> -> vector<8x32xf32>
    %30 = arith.addf %24, %29 : vector<8x32xf32>
    %c0_18 = arith.constant 0 : index
    %c0_19 = arith.constant 0 : index
    %c0_20 = arith.constant 0 : index
    %31 = vector.load %arg3[%c0_18, %c0_19, %c0_20] : memref<1x1x32xf32, #tpu.memory_space<vmem>>, vector<1x1x32xf32>
    %32 = vector.shape_cast %31 : vector<1x1x32xf32> to vector<1x32xf32>
    %33 = vector.broadcast %32 : vector<1x32xf32> to vector<8x32xf32>
    %34 = arith.addf %30, %33 : vector<8x32xf32>
    %35 = arith.truncf %34 : vector<8x32xf32> to vector<8x32xbf16>
    %c0_21 = arith.constant 0 : index
    %c0_22 = arith.constant 0 : index
    %c0_23 = arith.constant 0 : index
    %36 = vector.load %arg6[%c0_21, %c0_22, %c0_23] : memref<1x8x32xbf16, #tpu.memory_space<vmem>>, vector<1x8x32xbf16>
    %37 = vector.shape_cast %36 : vector<1x8x32xbf16> to vector<8x32xbf16>
    %38 = vector.shape_cast %35 : vector<8x32xbf16> to vector<1x8x32xbf16>
    tpu.vector_store %arg6[%c0_21, %c0_22, %c0_23], %38 {strides = array<i32>} : memref<1x8x32xbf16, #tpu.memory_space<vmem>>, vector<1x8x32xbf16>,
    return
  }
  func.func @transform_0(%arg0: i32) -> (i32, i32, i32) {
    %c0_i32 = arith.constant 0 : i32
    %c0_i32_0 = arith.constant 0 : i32
    %c0_i32_1 = arith.constant 0 : i32
    return %arg0, %c0_i32, %c0_i32_0 : i32, i32, i32
  }
  func.func @transform_1(%arg0: i32) -> (i32, i32) {
    %c0_i32 = arith.constant 0 : i32
    %c0_i32_0 = arith.constant 0 : i32
    %c0_i32_1 = arith.constant 0 : i32
    return %c0_i32, %c0_i32_0 : i32, i32
  }
  func.func @transform_2(%arg0: i32) -> (i32, i32, i32) {
    %c0_i32 = arith.constant 0 : i32
    %c0_i32_0 = arith.constant 0 : i32
    %c0_i32_1 = arith.constant 0 : i32
    %c0_i32_2 = arith.constant 0 : i32
    return %c0_i32, %c0_i32_0, %c0_i32_1 : i32, i32, i32
  }
  func.func @transform_3(%arg0: i32) -> (i32, i32, i32) {
    %c0_i32 = arith.constant 0 : i32
    %c0_i32_0 = arith.constant 0 : i32
    %c0_i32_1 = arith.constant 0 : i32
    %c0_i32_2 = arith.constant 0 : i32
    return %c0_i32, %c0_i32_0, %c0_i32_1 : i32, i32, i32
  }
  func.func @transform_4(%arg0: i32) -> (i32, i32, i32) {
    %c0_i32 = arith.constant 0 : i32
    %c0_i32_0 = arith.constant 0 : i32
    %c0_i32_1 = arith.constant 0 : i32
    return %arg0, %c0_i32, %c0_i32_0 : i32, i32, i32
  }
  func.func @transform_5(%arg0: i32) -> (i32, i32, i32) {
    %c0_i32 = arith.constant 0 : i32
    %c0_i32_0 = arith.constant 0 : i32
    %c0_i32_1 = arith.constant 0 : i32
    return %arg0, %c0_i32, %c0_i32_0 : i32, i32, i32
  }
}

module attributes {stable_mosaic.version = 11 : i64} {
  func.func @_tap_conv_kernel(%arg0: i32, %arg1: memref<1x16x16xbf16, #tpu.memory_space<vmem>>, %arg2: memref<16x4xbf16, #tpu.memory_space<vmem>>, %arg3: memref<1x1x4xf32, #tpu.memory_space<vmem>>, %arg4: memref<1x16x4xf32, #tpu.memory_space<vmem>>) attributes {dimension_semantics = [#tpu.dimension_semantics<parallel>], iteration_bounds = array<i64: 2>, scalar_prefetch = 0 : i64, scratch_operands = 0 : i64, tpu.core_type = #tpu.core_type<tc>, window_params = [{transform_indices = @transform_0, window_bounds = array<i64: 1, 16, 16>}, {pipeline_mode = #tpu.pipeline_mode<synchronous>, transform_indices = @transform_1, window_bounds = array<i64: 16, 4>}, {pipeline_mode = #tpu.pipeline_mode<synchronous>, transform_indices = @transform_2, window_bounds = array<i64: 1, 1, 4>}, {transform_indices = @transform_3, window_bounds = array<i64: 1, 16, 4>}]} {
    %c0 = arith.constant 0 : index
    %c0_0 = arith.constant 0 : index
    %c0_1 = arith.constant 0 : index
    %0 = vector.load %arg1[%c0, %c0_0, %c0_1] : memref<1x16x16xbf16, #tpu.memory_space<vmem>>, vector<1x16x16xbf16>
    %1 = vector.shape_cast %0 : vector<1x16x16xbf16> to vector<16x16xbf16>
    %cst = arith.constant 0.000000e+00 : f32
    %2 = vector.broadcast %cst : f32 to vector<16x4xf32>
    %c0_2 = arith.constant 0 : index
    %c0_3 = arith.constant 0 : index
    %3 = vector.load %arg2[%c0_2, %c0_3] : memref<16x4xbf16, #tpu.memory_space<vmem>>, vector<16x4xbf16>
    %cst_4 = arith.constant dense<0.000000e+00> : vector<16x4xf32>
    %4 = tpu.matmul %1, %3, %cst_4 {dimension_numbers = #tpu.dot_dimension_numbers<[1], [0], [0], [1], [0, 0, 1, 1], [], []>} : vector<16x16xbf16>, vector<16x4xbf16>, vector<16x4xf32> -> vector<16x4xf32>
    %5 = arith.addf %2, %4 : vector<16x4xf32>
    %c0_5 = arith.constant 0 : index
    %c0_6 = arith.constant 0 : index
    %c0_7 = arith.constant 0 : index
    %6 = vector.load %arg3[%c0_5, %c0_6, %c0_7] : memref<1x1x4xf32, #tpu.memory_space<vmem>>, vector<1x1x4xf32>
    %7 = vector.shape_cast %6 : vector<1x1x4xf32> to vector<1x4xf32>
    %8 = vector.broadcast %7 : vector<1x4xf32> to vector<16x4xf32>
    %9 = arith.addf %5, %8 : vector<16x4xf32>
    %c0_8 = arith.constant 0 : index
    %c0_9 = arith.constant 0 : index
    %c0_10 = arith.constant 0 : index
    %10 = vector.load %arg4[%c0_8, %c0_9, %c0_10] : memref<1x16x4xf32, #tpu.memory_space<vmem>>, vector<1x16x4xf32>
    %11 = vector.shape_cast %10 : vector<1x16x4xf32> to vector<16x4xf32>
    %12 = vector.shape_cast %9 : vector<16x4xf32> to vector<1x16x4xf32>
    tpu.vector_store %arg4[%c0_8, %c0_9, %c0_10], %12 {strides = array<i32>} : memref<1x16x4xf32, #tpu.memory_space<vmem>>, vector<1x16x4xf32>,
    return
  }
  func.func @transform_0(%arg0: i32) -> (i32, i32, i32) {
    %c0_i32 = arith.constant 0 : i32
    %c0_i32_0 = arith.constant 0 : i32
    %c0_i32_1 = arith.constant 0 : i32
    return %arg0, %c0_i32, %c0_i32_0 : i32, i32, i32
  }
  func.func @transform_1(%arg0: i32) -> (i32, i32) {
    %c0_i32 = arith.constant 0 : i32
    %c0_i32_0 = arith.constant 0 : i32
    %c0_i32_1 = arith.constant 0 : i32
    return %c0_i32, %c0_i32_0 : i32, i32
  }
  func.func @transform_2(%arg0: i32) -> (i32, i32, i32) {
    %c0_i32 = arith.constant 0 : i32
    %c0_i32_0 = arith.constant 0 : i32
    %c0_i32_1 = arith.constant 0 : i32
    %c0_i32_2 = arith.constant 0 : i32
    return %c0_i32, %c0_i32_0, %c0_i32_1 : i32, i32, i32
  }
  func.func @transform_3(%arg0: i32) -> (i32, i32, i32) {
    %c0_i32 = arith.constant 0 : i32
    %c0_i32_0 = arith.constant 0 : i32
    %c0_i32_1 = arith.constant 0 : i32
    return %arg0, %c0_i32, %c0_i32_0 : i32, i32, i32
  }
}

</mosaic_0001>

<bundles_post_ra>
// kernel: tsd_unet_forward.16
= control target key start
LH: loop header
LB: loop body
LE: loop exit
PB: predicated region body
PF: predicated region fallthrough
CT: control target
= control target key end

     0   :  { %v97_v0 = vmov 0.0   ;;  %vm98_vm0 = vmmov 0   ;;  %vm32_vm1 = vcmask 130048   ;;  %vm77_vm2 = vcmask 123904   ;;  %s131_s1 = inlined_call_operand.vmem [shape: bf16[16,16], index: 1, kind: input, shape index: {}]   ;;  %s132_s0 = inlined_call_operand.vmem [shape: f32[1,2,16], index: 0, kind: input, shape index: {}]   ;;  %s133_s2 = inlined_call_operand.vmem [shape: f32[1,1,16], index: 2, kind: input, shape index: {}]   ;;  %s134_s3 = inlined_call_operand.vmem [shape: f32[1,2,16], index: 3, kind: output, shape index: {}]  }
   0x1   :  { %88 = vmatprep.subr.bf16.mxu0 %v97_v0  ;;  %v96_v1 = vld [vmem:[%s131_s1] sm:$0xff]   ;;  %90 = vmatprep.mubr.msk.bf16.mxu0 %vm98_vm0, %v97_v0 }
   0x2   :  { %v15_v2 = vld [vmem:[%s132_s0] sm:$0x3]  ;;  %89 = vmatpush3.bf16.msra.mxu0 %v96_v1 }
   0x3   :  { %v16_v3 = vpack.c.bf16 %v15_v2, %v15_v2  ;;  %v83_v4 = vld [vmem:[%s133_s2] ss:$0 sm:$0xff] }
   0x5   :  { %91 = vmatmul.mubr.msk.bf16.vlgmr.msra.gmra.mrb[0].mxu0 %vm32_vm1, %v16_v3 }
  0xd8   :  { %v70_v5 = vpop.f32.mrb[0].mxu0 }
  0xd9   :  { %v71_v6 = vadd.f32 %v83_v4, %v70_v5  ;;  %v92_v7 = vpop.f32.mrb[1].mxu0 }
  0xda   :  { %v73_v8 = vpop.f32.mrb[2].mxu0 }
  0xdb   :  { %v76_v9 = vmax.f32 %v71_v6, 0.0  ;;  %v93_v10 = vpop.f32.mrb[3].mxu0 }
  0xdd   :  { %78 = vst.msk [vmem:[%s134_s3] sm:$0x3] %vm77_vm2, %v76_v9 }

// kernel: tsd_unet_forward.17
= control target key start
LH: loop header
LB: loop body
LE: loop exit
PB: predicated region body
PF: predicated region fallthrough
CT: control target
= control target key end

     0   :  { %v115_v1 = vmov 0   ;;  %vm41_vm0 = vcmask 130048   ;;  %v21_v5 = vlaneseq  ;;  %v116_v10 = vmov 1983009808   ;;  %s152_s1 = inlined_call_operand.vmem [shape: bf16[16,144], index: 1, kind: input, shape index: {}]   ;;  %s153_s0 = inlined_call_operand.vmem [shape: f32[1,2,16], index: 0, kind: input, shape index: {}]   ;;  %s154_s2 = inlined_call_operand.vmem [shape: f32[1,1,144], index: 2, kind: input, shape index: {}]   ;;  %s155_s3 = inlined_call_operand.vmem [shape: f32[1,2,144], index: 3, kind: output, shape index: {}]  }
   0x1   :  { %v112_v0 = vld [vmem:[%s152_s1 + $0x4] ss:$8 sps:$4 sm:$0xff]   ;;  %77 = vmatprep.mubr.bf16.mxu0 %v115_v1  ;;  %v114_v2 = vld [vmem:[%s152_s1] ss:$8 sps:$4 sm:$0xff]   ;;  %v92_v11 = vunpack.c.l.s4 %v116_v10  ;;  %vm99_vm1 = vcmask 1041408   ;;  %vm100_vm2 = vcmask 125954  }
   0x2   :  { %v15_v3 = vld [vmem:[%s153_s0] sm:$0x3]  ;;  %45 = vmatprep.subr.bf16.mxu0 %v112_v0  ;;  %v22_v6 = vshrl.u32 %v21_v5, 7  ;;  %vm101_vm3 = vmor %vm100_vm2, %vm99_vm1 }
   0x3   :  { %v16_v4 = vpack.c.bf16 %v15_v3, %v15_v3  ;;  %46 = vmatpush1.bf16.msra.mxu0 %v114_v2  ;;  %v19_v8 = vld [vmem:[%s154_s2] sm:$0x3]  ;;  %v93_v15 = vunpack.c.0.s8 %v92_v11 }
   0x4   :  { %v23_v7 = vsub.s32 0, %v22_v6  ;;  %v27_v9 = vsub.s32 1, %v22_v6 }
   0x5   :  { %v96_v23 = vsub.s32 %v93_v15, %v22_v6 }
   0x6   :  { %109 = vmatmul.mubr.msk.bf16.vlgmr.msra.gmra.mrb[0].mxu0 %vm41_vm0, %v16_v4  ;;  %v24_v12 = vrot.slane %v19_v8, %v23_v7  ;;  %v28_v13 = vrot.slane %v19_v8, %v27_v9 }
  0xd9   :  { %v79_v14 = vpop.f32.mrb[0].mxu0 }
  0xda   :  { %v80_v16 = vadd.f32 %v79_v14, %v24_v12  ;;  %v81_v17 = vpop.f32.mrb[1].mxu0 }
  0xdb   :  { %v82_v18 = vadd.f32 %v81_v17, %v28_v13  ;;  %v83_v19 = vpop.f32.mrb[2].mxu0 }
  0xdc   :  { %v86_v20 = vmax.f32 %v80_v16, 0.0  ;;  %v84_v21 = vpop.f32.mrb[3].mxu0 }
  0xdd   :  { %v87_v22 = vmax.f32 %v82_v18, 0.0 }
  0xdf   :  { %v90_v24 = vcombine.low %v86_v20, %v87_v22 }
  0xe1   :  { %v97_v25 = vrot.slane %v90_v24, %v96_v23 }
  0xe3   :  { %102 = vst.msk [vmem:[%s155_s3] sm:$0xf] %vm101_vm3, %v97_v25 }

// kernel: tsd_unet_forward.18
= control target key start
LH: loop header
LB: loop body
LE: loop exit
PB: predicated region body
PF: predicated region fallthrough
CT: control target
= control target key end

     0   :  { %s527_s12 = smov 0   ;;  %s572_s0 = inlined_call_operand.vmem [shape: bf16[2,16,4], index: 0, kind: input, shape index: {}]   ;;  %s573_s1 = inlined_call_operand.vmem [shape: bf16[12,16], index: 1, kind: input, shape index: {}]   ;;  %s574_s2 = inlined_call_operand.vmem [shape: f32[1,1,16], index: 2, kind: input, shape index: {}]   ;;  %s575_s3 = inlined_call_operand.vmem [shape: bf16[2,16,16], index: 3, kind: output, shape index: {}]  }
   0x1 LB: > { %s438_s13 = sadd.s32 4294967295, %s503_s12   ;;  %p442_p0 = scmp.ge.s32.totalorder %s503_s12, 1  ;;  %s503_s12 = sphi %s527_s12, %s13_s12  }
   0x2   : > { %p137_p1 = scmp.lt.s32.totalorder %s503_s12, 3 }
   0x4   : > { %p138_p2 = pnand %p442_p0, %p137_p1 }
   0x5   : > { %v495_v0 = vld [vmem:[%s573_s1] ss:$0 sps:$4 sm:$0xcc] (!%p138_p2)   ;;  %v505_v1 = vmov (!%p138_p2), 0.0   ;;  %vm216_vm0 = vcmask (!%p138_p2), 1041408   ;;  %p161_p3 = scmp.lt.s32.totalorder (!%p138_p2), %s438_s13, 1 }
   0x6   : > { %141 = sbr.rel (%p138_p2) target bundleno = 260 (0x104), region = 32  ;;  %467 = vmatprep.subr.bf16.mxu0 (!%p138_p2), %v505_v1  ;;  %473 = vmatprep.subr.bf16.mxu1 (!%p138_p2), %v505_v1  ;;  %v193_v2 = vld [vmem:[%s573_s1] sm:$0x3] (!%p138_p2)  ;;  %v211_v3 = vrot.slane (!%p138_p2), %v495_v0, 2  ;;  %vm506_vm1 = vmmov (!%p138_p2), 0   ;;  %vm188_vm2 = vcmask (!%p138_p2), 1040384  }
   0x7   : > { %v264_v4 = vsel (!%p138_p2), %vm216_vm0, %v193_v2, 0  ;;  %469 = vmatprep.mubr.msk.bf16.mxu0 (!%p138_p2), %vm506_vm1, %v505_v1  ;;  %475 = vmatprep.mubr.msk.bf16.mxu1 (!%p138_p2), %vm506_vm1, %v505_v1  ;;  %vm189_vm3 = vsmask.f32 (!%p138_p2), 256  ;;  %vm212_vm5 = vcmask (!%p138_p2), 31744   ;;  %v307_v18 = vld [vmem:[%s573_s1 + $0x4] sm:$0x3] (!%p138_p2) }
   0x8   : > { %474 = vmatpush3.bf16.msra.mxu1 (!%p138_p2), %v264_v4  ;;  %v218_v5 = vsel (!%p138_p2), %vm216_vm0, %v211_v3, 0  ;;  %vm190_vm4 = vmand (!%p138_p2), %vm188_vm2, %vm189_vm3  ;;  %vm195_vm6 = vsmask.f32 (!%p138_p2), 7424  ;;  %v318_v20 = vsel (!%p138_p2), %vm216_vm0, %v307_v18, 0  ;;  %vm310_vm7 = vcmask (!%p138_p2), 1046528  }
   0x9   : > { %468 = vmatpush3.bf16.msra.mxu0 (!%p138_p2), %v218_v5  ;;  %v452_v36 = vld [vmem:[%s574_s2] ss:$0 sm:$0xff] (!%p138_p2)  ;;  %vm380_vm8 = vcmask (!%p138_p2), 125952  }
   0xa   : > { %479 = vmatprep.subr.bf16.mxu0 (!%p138_p2), %v505_v1 }
   0xd   : > { %s577_s13 = smov (!%p161_p3, %s438_s13), 1 }
   0xe   : > { %s457_s18 = sshll.u32 %s577_s13, 3 }
   0xf   : > { %s165_s21 = scalar_lea.vmem %s572_s0, %s457_s18  ;;  %s170_s28 = scalar_lea.vmem %s575_s3, %s457_s18 }
  0x10   : > { %v496_v6 = vld [vmem:[%s165_s21] sm:$0xff]  }
  0x11   : > { %v180_v7 = vshrl.u32 %v496_v6, 16  ;;  %v183_v8 = vshll.u32 %v496_v6, 16 }
  0x13   : > { %v182_v9 = vrot.slane %v180_v7, 7 }
  0x15   : > { %v185_v10 = vor.u32 %v183_v8, %v182_v9  ;;  %v192_v11 = vsel %vm190_vm4, %v182_v9, 0 }
  0x16   : > { %v204_v12 = vshll.u32 %v192_v11, 16  ;;  %v312_v23 = vrot.slane %v192_v11, 1 }
  0x17   : > { %v191_v13 = vsel %vm190_vm4, 0, %v185_v10 }
  0x18   : > { %v197_v14 = vshrl.u32 %v191_v13, 16  ;;  %v199_v15 = vshll.u32 %v191_v13, 16  ;;  %476 = vmatmul.mubr.msk.bf16.vlgmr.msra.gmra.mrb[0].mxu1 %vm212_vm5, %v191_v13  ;;  %v206_v17 = vrot.slane %v204_v12, 1  ;;  %v311_v22 = vrot.slane %v191_v13, 1 }
  0x1a   : > { %v201_v16 = vrot.slane %v199_v15, 1  ;;  %v313_v24 = vsel %vm310_vm7, %v311_v22, %v312_v23 }
  0x1c   : > { %v202_v19 = vor.u32 %v201_v16, %v197_v14 }
  0x1e   : > { %v207_v21 = vsel %vm195_vm6, %v202_v19, %v206_v17 }
  0x1f   : > { %470 = vmatmul.mubr.msk.bf16.vlgmr.msra.gmra.mrb[0].mxu0 %vm212_vm5, %v207_v21 }
  0x20   : > { %480 = vmatpush3.bf16.msra.mxu0 %v318_v20  ;;  %481 = vmatprep.mubr.msk.bf16.mxu0 %vm506_vm1, %v505_v1 }
  0x27   : > { %482 = vmatmul.mubr.msk.bf16.vlgmr.msra.gmra.mrb[4].mxu0 %vm212_vm5, %v313_v24 }
  0xeb   : > { %v300_v25 = vpop.f32.mrb[0].mxu1 }
  0xec   : > { %v477_v26 = vpop.f32.mrb[1].mxu1 }
  0xed   : > { %v303_v27 = vpop.f32.mrb[2].mxu1 }
  0xee   : > { %v478_v28 = vpop.f32.mrb[3].mxu1 }
  0xf2   : > { %v254_v29 = vpop.f32.mrb[0].mxu0 }
  0xf3   : > { %v301_v30 = vadd.f32 %v300_v25, %v254_v29  ;;  %v471_v31 = vpop.f32.mrb[1].mxu0 }
  0xf4   : > { %v257_v32 = vpop.f32.mrb[2].mxu0 }
  0xf5   : > { %v304_v33 = vadd.f32 %v303_v27, %v257_v32  ;;  %v472_v34 = vpop.f32.mrb[3].mxu0 }
  0xfa   : > { %v354_v35 = vpop.f32.mrb[4].mxu0 }
  0xfb   : > { %v361_v37 = vadd.f32 %v354_v35, %v301_v30  ;;  %v483_v38 = vpop.f32.mrb[5].mxu0 }
  0xfc   : > { %v357_v39 = vpop.f32.mrb[6].mxu0 }
  0xfd   : > { %v370_v40 = vadd.f32 %v452_v36, %v361_v37  ;;  %v362_v41 = vadd.f32 %v357_v39, %v304_v33  ;;  %v484_v42 = vpop.f32.mrb[7].mxu0 }
  0xff   : > { %v459_v43 = vpack.c.bf16 %v370_v40, %v370_v40  ;;  %v371_v44 = vadd.f32 %v452_v36, %v362_v41 }
 0x101   : > { %381 = vst.msk [vmem:[%s170_s28] sm:$0xf] %vm380_vm8, %v459_v43  ;;  %v460_v45 = vpack.c.bf16 %v371_v44, %v371_v44 }
 0x103   : > { %382 = vst.msk [vmem:[%s170_s28 + $0x4] sm:$0xf] %vm380_vm8, %v460_v45 }
 0x104 PF: > { %s13_s12 = sadd.s32 1, %s503_s12  }
 0x105   : > { %p10_p4 = scmp.ge.s32.totalorder %s13_s12, 4  }
 0x107   :  { %12 = sbr.rel (!%p10_p4) target bundleno = 1 (0x1), region = 62 }

// kernel: tsd_unet_forward.19
= control target key start
LH: loop header
LB: loop body
LE: loop exit
PB: predicated region body
PF: predicated region fallthrough
CT: control target
= control target key end

     0   :  { %s640_s15 = smov 0   ;;  %s688_s0 = inlined_call_operand.vmem [shape: bf16[2,16,16], index: 0, kind: input, shape index: {}]   ;;  %s689_s1 = inlined_call_operand.vmem [shape: bf16[48,32], index: 1, kind: input, shape index: {}]   ;;  %s690_s2 = inlined_call_operand.vmem [shape: f32[1,1,32], index: 2, kind: input, shape index: {}]   ;;  %s691_s3 = inlined_call_operand.vmem [shape: bf16[2,16,32], index: 3, kind: output, shape index: {0}]   ;;  %s692_s4 = inlined_call_operand.vmem [shape: f32[2,2,32], index: 4, kind: output, shape index: {1}]  }
   0x1 LB: > { %s541_s16 = sadd.s32 4294967295, %s611_s15   ;;  %p545_p0 = scmp.ge.s32.totalorder %s611_s15, 1  ;;  %s611_s15 = sphi %s640_s15, %s15_s15  }
   0x2   : > { %p165_p1 = scmp.lt.s32.totalorder %s611_s15, 3 }
   0x4   : > { %p166_p2 = pnand %p545_p0, %p165_p1 }
   0x5   : > { %v601_v0 = vld [vmem:[%s689_s1 + $0x8] sm:$0xff] (!%p166_p2)   ;;  %v613_v1 = vmov (!%p166_p2), 0.0   ;;  %v602_v2 = vld [vmem:[%s689_s1] sm:$0xff] (!%p166_p2)   ;;  %vm614_vm0 = vmmov (!%p166_p2), 0   ;;  %p195_p3 = scmp.lt.s32.totalorder (!%p166_p2), %s541_s16, 1  ;;  %vm226_vm1 = vcmask (!%p166_p2), 1040384  }
   0x6   : > { %169 = sbr.rel (%p166_p2) target bundleno = 278 (0x116), region = 32  ;;  %573 = vmatprep.subr.bf16.mxu0 (!%p166_p2), %v613_v1  ;;  %579 = vmatprep.subr.bf16.mxu1 (!%p166_p2), %v613_v1  ;;  %vm227_vm2 = vsmask.f32 (!%p166_p2), 256  ;;  %vm254_vm4 = vcmask (!%p166_p2), 130048   ;;  %vm235_vm5 = vsmask.f32 (!%p166_p2), 7424 }
   0x7   : > { %574 = vmatpush3.bf16.msra.mxu0 (!%p166_p2), %v601_v0  ;;  %575 = vmatprep.mubr.msk.bf16.mxu0 (!%p166_p2), %vm614_vm0, %v613_v1  ;;  %vm228_vm3 = vmand (!%p166_p2), %vm226_vm1, %vm227_vm2  ;;  %v604_v16 = vld [vmem:[%s689_s1 + $0x10] sm:$0xff] (!%p166_p2)   ;;  %vm352_vm6 = vcmask (!%p166_p2), 1046528   ;;  %v558_v32 = vld [vmem:[%s690_s2] ss:$0 sm:$0xff] (!%p166_p2)  ;;  %vm427_vm7 = vcmask (!%p166_p2), 257024   ;;  %vm430_vm8 = vcmask (!%p166_p2), 261120  }
   0x8   : > { %580 = vmatpush3.bf16.msra.mxu1 (!%p166_p2), %v602_v2  ;;  %581 = vmatprep.mubr.msk.bf16.mxu1 (!%p166_p2), %vm614_vm0, %v613_v1  ;;  %vm453_vm9 = vcmask (!%p166_p2), 254976  }
   0x9   : > { %585 = vmatprep.subr.bf16.mxu0 (!%p166_p2), %v613_v1 }
   0xd   : > { %s694_s16 = smov (!%p195_p3, %s541_s16), 1 }
   0xe   : > { %s563_s21 = sshll.u32 %s694_s16, 3  ;;  %s550_s6 = sshll.u32 %s694_s16, 1 }
   0xf   : > { %s199_s24 = scalar_lea.vmem %s688_s0, %s563_s21  ;;  %s204_s5 = scalar_lea.vmem %s691_s3, %s563_s21 }
  0x10   : > { %v603_v3 = vld [vmem:[%s199_s24] sm:$0xff]   ;;  %s208_s9 = scalar_lea.vmem %s692_s4, %s550_s6 }
  0x11   : > { %v218_v4 = vshrl.u32 %v603_v3, 16  ;;  %v221_v5 = vshll.u32 %v603_v3, 16 }
  0x13   : > { %v220_v6 = vrot.slane %v218_v4, 7 }
  0x15   : > { %v223_v7 = vor.u32 %v221_v5, %v220_v6  ;;  %v230_v8 = vsel %vm228_vm3, %v220_v6, 0 }
  0x16   : > { %v244_v9 = vshll.u32 %v230_v8, 16  ;;  %v354_v19 = vrot.slane %v230_v8, 1 }
  0x17   : > { %v229_v10 = vsel %vm228_vm3, 0, %v223_v7 }
  0x18   : > { %v237_v11 = vshrl.u32 %v229_v10, 16  ;;  %v239_v12 = vshll.u32 %v229_v10, 16  ;;  %582 = vmatmul.mubr.msk.bf16.vlgmr.msra.gmra.mrb[0].mxu1 %vm254_vm4, %v229_v10  ;;  %v246_v14 = vrot.slane %v244_v9, 1  ;;  %v353_v18 = vrot.slane %v229_v10, 1 }
  0x1a   : > { %v241_v13 = vrot.slane %v239_v12, 1  ;;  %v355_v20 = vsel %vm352_vm6, %v353_v18, %v354_v19 }
  0x1c   : > { %v242_v15 = vor.u32 %v241_v13, %v237_v11 }
  0x1e   : > { %v247_v17 = vsel %vm235_vm5, %v242_v15, %v246_v14 }
  0x1f   : > { %576 = vmatmul.mubr.msk.bf16.vlgmr.msra.gmra.mrb[0].mxu0 %vm254_vm4, %v247_v17 }
  0x20   : > { %586 = vmatpush3.bf16.msra.mxu0 %v604_v16  ;;  %587 = vmatprep.mubr.msk.bf16.mxu0 %vm614_vm0, %v613_v1 }
  0x27   : > { %588 = vmatmul.mubr.msk.bf16.vlgmr.msra.gmra.mrb[4].mxu0 %vm254_vm4, %v355_v20 }
  0xeb   : > { %v341_v21 = vpop.f32.mrb[0].mxu1 }
  0xec   : > { %v583_v22 = vpop.f32.mrb[1].mxu1 }
  0xed   : > { %v344_v23 = vpop.f32.mrb[2].mxu1 }
  0xee   : > { %v584_v24 = vpop.f32.mrb[3].mxu1 }
  0xf2   : > { %v292_v25 = vpop.f32.mrb[0].mxu0 }
  0xf3   : > { %v342_v26 = vadd.f32 %v341_v21, %v292_v25  ;;  %v577_v27 = vpop.f32.mrb[1].mxu0 }
  0xf4   : > { %v295_v28 = vpop.f32.mrb[2].mxu0 }
  0xf5   : > { %v345_v29 = vadd.f32 %v344_v23, %v295_v28  ;;  %v578_v30 = vpop.f32.mrb[3].mxu0 }
  0xfa   : > { %v399_v31 = vpop.f32.mrb[4].mxu0 }
  0xfb   : > { %v406_v33 = vadd.f32 %v399_v31, %v342_v26  ;;  %v589_v34 = vpop.f32.mrb[5].mxu0 }
  0xfc   : > { %v402_v35 = vpop.f32.mrb[6].mxu0 }
  0xfd   : > { %v415_v36 = vadd.f32 %v558_v32, %v406_v33  ;;  %v407_v37 = vadd.f32 %v402_v35, %v345_v29  ;;  %v590_v38 = vpop.f32.mrb[7].mxu0 }
  0xff   : > { %v417_v39 = vmax.f32 %v415_v36, 0.0  ;;  %v416_v40 = vadd.f32 %v558_v32, %v407_v37 }
 0x101   : > { %v565_v41 = vpack.c.bf16 %v417_v39, %v417_v39  ;;  %v440_v42 = vmul.f32 %v417_v39, %v417_v39  ;;  %v418_v43 = vmax.f32 %v416_v40, 0.0  ;;  %v431_v44 = vsel %vm430_vm8, %v417_v39, 0.0 }
 0x103   : > { %428 = vst.msk [vmem:[%s204_s5] sm:$0xf] %vm427_vm7, %v565_v41  ;;  %v566_v45 = vpack.c.bf16 %v418_v43, %v418_v43  ;;  %v432_v46 = vsel %vm430_vm8, %v418_v43, 0.0  ;;  %v441_v47 = vmul.f32 %v418_v43, %v418_v43  ;;  %v442_v49 = vsel %vm430_vm8, %v440_v42, 0.0 }
 0x104   : > { %v433_v48 = vadd.f32 %v432_v46, %v431_v44 }
 0x105   : > { %429 = vst.msk [vmem:[%s204_s5 + $0x4] sm:$0xf] %vm427_vm7, %v566_v45  ;;  %v443_v50 = vsel %vm430_vm8, %v441_v47, 0.0 }
 0x106   : > { %v434_v51 = vrot.slane %v433_v48, 4  ;;  %v444_v52 = vadd.f32 %v443_v50, %v442_v49 }
 0x108   : > { %v435_v53 = vadd.f32 %v434_v51, %v433_v48  ;;  %v445_v54 = vrot.slane %v444_v52, 4 }
 0x10a   : > { %v436_v55 = vrot.slane %v435_v53, 2  ;;  %v446_v56 = vadd.f32 %v445_v54, %v444_v52 }
 0x10c   : > { %v437_v57 = vadd.f32 %v436_v55, %v435_v53  ;;  %v447_v58 = vrot.slane %v446_v56, 2 }
 0x10e   : > { %v438_v59 = vrot.slane %v437_v57, 1  ;;  %v448_v60 = vadd.f32 %v447_v58, %v446_v56 }
 0x110   : > { %v449_v61 = vrot.slane %v448_v60, 1  ;;  %v439_v62 = vadd.f32 %v438_v59, %v437_v57 }
 0x112   : > { %v450_v63 = vadd.f32 %v449_v61, %v448_v60 }
 0x114   : > { %v452_v0 = vsel %vm226_vm1, %v439_v62, %v450_v63 }
 0x115   : > { %454 = vst.msk [vmem:[%s208_s9] sm:$0x3] %vm453_vm9, %v452_v0 }
 0x116 PF: > { %s15_s15 = sadd.s32 1, %s611_s15  }
 0x117   : > { %p12_p4 = scmp.ge.s32.totalorder %s15_s15, 4  }
 0x119   :  { %14 = sbr.rel (!%p12_p4) target bundleno = 1 (0x1), region = 74 }

// kernel: tsd_unet_forward.20
= control target key start
LH: loop header
LB: loop body
LE: loop exit
PB: predicated region body
PF: predicated region fallthrough
CT: control target
= control target key end

     0   :  { %s785_s21 = smov 0   ;;  %s853_s0 = inlined_call_operand.vmem [shape: bf16[2,16,32], index: 0, kind: input, shape index: {}]   ;;  %s854_s1 = inlined_call_operand.vmem [shape: bf16[96,32], index: 1, kind: input, shape index: {}]   ;;  %s855_s2 = inlined_call_operand.vmem [shape: f32[1,1,32], index: 2, kind: input, shape index: {}]   ;;  %s856_s3 = inlined_call_operand.vmem [shape: f32[1,1,32], index: 3, kind: input, shape index: {}]   ;;  %s857_s4 = inlined_call_operand.vmem [shape: f32[2,1,32], index: 4, kind: input, shape index: {}]   ;;  %s858_s5 = inlined_call_operand.vmem [shape: bf16[2,16,32], index: 5, kind: output, shape index: {0}]   ;;  %s859_s6 = inlined_call_operand.vmem [shape: f32[2,2,32], index: 6, kind: output, shape index: {1}]  }
   0x1 LB: > { %s657_s22 = sadd.s32 4294967295, %s746_s21   ;;  %p661_p0 = scmp.ge.s32.totalorder %s746_s21, 1  ;;  %s746_s21 = sphi %s785_s21, %s17_s21  }
   0x2   : > { %p223_p1 = scmp.lt.s32.totalorder %s746_s21, 3 }
   0x4   : > { %p224_p2 = pnand %p661_p0, %p223_p1 }
   0x5   : > { %v734_v0 = vld [vmem:[%s854_s1 + $0x10] sm:$0xff] (!%p224_p2)   ;;  %v748_v1 = vmov (!%p224_p2), 0.0   ;;  %v735_v2 = vld [vmem:[%s854_s1] sm:$0xff] (!%p224_p2)   ;;  %v736_v3 = vld [vmem:[%s854_s1 + $0x18] sm:$0xff] (!%p224_p2)   ;;  %vm749_vm0 = vmmov (!%p224_p2), 0   ;;  %p260_p3 = scmp.lt.s32.totalorder (!%p224_p2), %s657_s22, 1 }
   0x6   : > { %227 = sbr.rel (%p224_p2) target bundleno = 286 (0x11e), region = 40  ;;  %700 = vmatprep.subr.bf16.mxu0 (!%p224_p2), %v748_v1  ;;  %708 = vmatprep.subr.bf16.mxu1 (!%p224_p2), %v748_v1  ;;  %v737_v4 = vld [vmem:[%s854_s1 + $0x8] sm:$0xff] (!%p224_p2)   ;;  %v667_v6 = vld [vmem:[%s856_s3] ss:$0 sm:$0xff] (!%p224_p2)  ;;  %vm310_vm1 = vcmask (!%p224_p2), 1040384   ;;  %vm348_vm4 = vcmask (!%p224_p2), 261120  }
   0x7   : > { %701 = vmatpush3.bf16.msra.mxu0 (!%p224_p2), %v734_v0  ;;  %704 = vmatprep.mubr.msk.bf16.mxu0 (!%p224_p2), %vm749_vm0, %v748_v1  ;;  %vm311_vm2 = vsmask.f32 (!%p224_p2), 256  ;;  %vm323_vm5 = vsmask.f32 (!%p224_p2), 7424  ;;  %v738_v27 = vld [vmem:[%s854_s1 + $0x20] sm:$0xff] (!%p224_p2)   ;;  %v739_v29 = vld [vmem:[%s854_s1 + $0x28] sm:$0xff] (!%p224_p2)  }
   0x8   : > { %709 = vmatpush3.bf16.msra.mxu1 (!%p224_p2), %v735_v2  ;;  %702 = vmatprep.subr.bf16.mxu0 (!%p224_p2), %v748_v1  ;;  %vm312_vm3 = vmand (!%p224_p2), %vm310_vm1, %vm311_vm2  ;;  %vm454_vm6 = vcmask (!%p224_p2), 1046528   ;;  %v678_v44 = vld [vmem:[%s855_s2] ss:$0 sm:$0xff] (!%p224_p2)  ;;  %vm535_vm7 = vcmask (!%p224_p2), 257024   ;;  %vm560_vm8 = vcmask (!%p224_p2), 254976  }
   0x9   : > { %710 = vmatprep.subr.bf16.mxu1 (!%p224_p2), %v748_v1  ;;  %712 = vmatprep.mubr.msk.bf16.mxu1 (!%p224_p2), %vm749_vm0, %v748_v1 }
   0xb   : > { %703 = vmatpush3.bf16.msra.mxu0 (!%p224_p2), %v736_v3 }
   0xc   : > { %711 = vmatpush3.bf16.msra.mxu1 (!%p224_p2), %v737_v4  ;;  %716 = vmatprep.subr.bf16.mxu0 (!%p224_p2), %v748_v1 }
   0xd   : > { %s861_s22 = smov (!%p260_p3, %s657_s22), 1 }
   0xe   : > { %s683_s7 = sshll.u32 %s861_s22, 3  ;;  %s267_s13 = scalar_lea.vmem %s857_s4, %s861_s22 }
   0xf   : > { %s264_s10 = scalar_lea.vmem %s853_s0, %s683_s7  ;;  %v668_v9 = vld [vmem:[%s267_s13] ss:$0 sm:$0xff]  ;;  %s272_s26 = scalar_lea.vmem %s858_s5, %s683_s7 }
  0x10   : > { %v688_v5 = vld [vmem:[%s264_s10] sm:$0xff]   ;;  %s666_s27 = sshll.u32 %s861_s22, 1 }
  0x11   : > { %v689_v7 = vunpack.c.l.bf16 %v688_v5  ;;  %v690_v8 = vunpack.c.h.bf16 %v688_v5  ;;  %s276_s30 = scalar_lea.vmem %s859_s6, %s666_s27 }
  0x13   : > { %v289_v10 = vmul.f32 %v689_v7, %v667_v6  ;;  %v290_v11 = vmul.f32 %v690_v8, %v667_v6 }
  0x15   : > { %v298_v12 = vadd.f32 %v668_v9, %v289_v10  ;;  %v299_v13 = vadd.f32 %v668_v9, %v290_v11 }
  0x17   : > { %v300_v14 = vpack.c.bf16 %v299_v13, %v298_v12 }
  0x19   : > { %v302_v15 = vshrl.u32 %v300_v14, 16  ;;  %v305_v16 = vshll.u32 %v300_v14, 16 }
  0x1b   : > { %v304_v17 = vrot.slane %v302_v15, 7 }
  0x1d   : > { %v307_v18 = vor.u32 %v305_v16, %v304_v17  ;;  %v314_v19 = vsel %vm312_vm3, %v304_v17, 0 }
  0x1e   : > { %v332_v20 = vshll.u32 %v314_v19, 16  ;;  %v456_v31 = vrot.slane %v314_v19, 1 }
  0x1f   : > { %v313_v21 = vsel %vm312_vm3, 0, %v307_v18 }
  0x20   : > { %v325_v22 = vshrl.u32 %v313_v21, 16  ;;  %v327_v23 = vshll.u32 %v313_v21, 16  ;;  %713 = vmatmul.mubr.msk.bf16.vlgmr.msra.gmra.mrb[0].mxu1 %vm348_vm4, %v313_v21  ;;  %v334_v25 = vrot.slane %v332_v20, 1  ;;  %v455_v30 = vrot.slane %v313_v21, 1 }
  0x22   : > { %v329_v24 = vrot.slane %v327_v23, 1  ;;  %v457_v32 = vsel %vm454_vm6, %v455_v30, %v456_v31 }
  0x24   : > { %v330_v26 = vor.u32 %v329_v24, %v325_v22 }
  0x26   : > { %v335_v28 = vsel %vm323_vm5, %v330_v26, %v334_v25 }
  0x27   : > { %705 = vmatmul.mubr.msk.bf16.vlgmr.msra.gmra.mrb[0].mxu0 %vm348_vm4, %v335_v28 }
  0x28   : > { %717 = vmatpush3.bf16.msra.mxu0 %v738_v27  ;;  %720 = vmatprep.mubr.msk.bf16.mxu0 %vm749_vm0, %v748_v1 }
  0x29   : > { %718 = vmatprep.subr.bf16.mxu0 %v748_v1 }
  0x2c   : > { %719 = vmatpush3.bf16.msra.mxu0 %v739_v29 }
  0x2f   : > { %721 = vmatmul.mubr.msk.bf16.vlgmr.msra.gmra.mrb[4].mxu0 %vm348_vm4, %v457_v32 }
  0xf3   : > { %v441_v33 = vpop.f32.mrb[0].mxu1 }
  0xf4   : > { %v714_v34 = vpop.f32.mrb[1].mxu1 }
  0xf5   : > { %v444_v35 = vpop.f32.mrb[2].mxu1 }
  0xf6   : > { %v715_v36 = vpop.f32.mrb[3].mxu1 }
  0xfa   : > { %v386_v37 = vpop.f32.mrb[0].mxu0 }
  0xfb   : > { %v442_v38 = vadd.f32 %v441_v33, %v386_v37  ;;  %v706_v39 = vpop.f32.mrb[1].mxu0 }
  0xfc   : > { %v389_v40 = vpop.f32.mrb[2].mxu0 }
  0xfd   : > { %v445_v41 = vadd.f32 %v444_v35, %v389_v40  ;;  %v707_v42 = vpop.f32.mrb[3].mxu0 }
 0x102   : > { %v507_v43 = vpop.f32.mrb[4].mxu0 }
 0x103   : > { %v514_v45 = vadd.f32 %v507_v43, %v442_v38  ;;  %v722_v46 = vpop.f32.mrb[5].mxu0 }
 0x104   : > { %v510_v47 = vpop.f32.mrb[6].mxu0 }
 0x105   : > { %v523_v48 = vadd.f32 %v678_v44, %v514_v45  ;;  %v515_v49 = vadd.f32 %v510_v47, %v445_v41  ;;  %v723_v50 = vpop.f32.mrb[7].mxu0 }
 0x107   : > { %v525_v51 = vmax.f32 %v523_v48, 0.0  ;;  %v524_v52 = vadd.f32 %v678_v44, %v515_v49 }
 0x109   : > { %v685_v53 = vpack.c.bf16 %v525_v51, %v525_v51  ;;  %v547_v54 = vmul.f32 %v525_v51, %v525_v51  ;;  %v526_v55 = vmax.f32 %v524_v52, 0.0  ;;  %v538_v56 = vsel %vm348_vm4, %v525_v51, 0.0 }
 0x10b   : > { %536 = vst.msk [vmem:[%s272_s26] sm:$0xf] %vm535_vm7, %v685_v53  ;;  %v686_v57 = vpack.c.bf16 %v526_v55, %v526_v55  ;;  %v539_v58 = vsel %vm348_vm4, %v526_v55, 0.0  ;;  %v548_v59 = vmul.f32 %v526_v55, %v526_v55  ;;  %v549_v61 = vsel %vm348_vm4, %v547_v54, 0.0 }
 0x10c   : > { %v540_v60 = vadd.f32 %v539_v58, %v538_v56 }
 0x10d   : > { %537 = vst.msk [vmem:[%s272_s26 + $0x4] sm:$0xf] %vm535_vm7, %v686_v57  ;;  %v550_v62 = vsel %vm348_vm4, %v548_v59, 0.0 }
 0x10e   : > { %v541_v63 = vrot.slane %v540_v60, 4  ;;  %v551_v0 = vadd.f32 %v550_v62, %v549_v61 }
 0x110   : > { %v542_v1 = vadd.f32 %v541_v63, %v540_v60  ;;  %v552_v2 = vrot.slane %v551_v0, 4 }
 0x112   : > { %v543_v3 = vrot.slane %v542_v1, 2  ;;  %v553_v4 = vadd.f32 %v552_v2, %v551_v0 }
 0x114   : > { %v544_v5 = vadd.f32 %v543_v3, %v542_v1  ;;  %v554_v6 = vrot.slane %v553_v4, 2 }
 0x116   : > { %v545_v7 = vrot.slane %v544_v5, 1  ;;  %v555_v8 = vadd.f32 %v554_v6, %v553_v4 }
 0x118   : > { %v556_v9 = vrot.slane %v555_v8, 1  ;;  %v546_v10 = vadd.f32 %v545_v7, %v544_v5 }
 0x11a   : > { %v557_v11 = vadd.f32 %v556_v9, %v555_v8 }
 0x11c   : > { %v559_v12 = vsel %vm310_vm1, %v546_v10, %v557_v11 }
 0x11d   : > { %561 = vst.msk [vmem:[%s276_s30] sm:$0x3] %vm560_vm8, %v559_v12 }
 0x11e PF: > { %s17_s21 = sadd.s32 1, %s746_s21  }
 0x11f   : > { %p14_p4 = scmp.ge.s32.totalorder %s17_s21, 4  }
 0x121   :  { %16 = sbr.rel (!%p14_p4) target bundleno = 1 (0x1), region = 85 }

// kernel: tsd_unet_forward.22
= control target key start
LH: loop header
LB: loop body
LE: loop exit
PB: predicated region body
PF: predicated region fallthrough
CT: control target
= control target key end

     0   :  { %s634_s15 = smov 0   ;;  %s691_s0 = inlined_call_operand.vmem [shape: bf16[2,8,32], index: 0, kind: input, shape index: {}]   ;;  %s692_s1 = inlined_call_operand.vmem [shape: bf16[96,64], index: 1, kind: input, shape index: {}]   ;;  %s693_s2 = inlined_call_operand.vmem [shape: f32[1,1,64], index: 2, kind: input, shape index: {}]   ;;  %s694_s3 = inlined_call_operand.vmem [shape: bf16[2,8,64], index: 3, kind: output, shape index: {0}]   ;;  %s695_s4 = inlined_call_operand.vmem [shape: f32[2,2,64], index: 4, kind: output, shape index: {1}]  }
   0x1 LB: > { %s528_s16 = sadd.s32 4294967295, %s605_s15   ;;  %p532_p0 = scmp.ge.s32.totalorder %s605_s15, 1  ;;  %s605_s15 = sphi %s634_s15, %s15_s15  }
   0x2   : > { %p164_p1 = scmp.lt.s32.totalorder %s605_s15, 3 }
   0x4   : > { %p165_p2 = pnand %p532_p0, %p164_p1 }
   0x5   : > { %v592_v0 = vld [vmem:[%s692_s1 + $0x10] sm:$0xff] (!%p165_p2)   ;;  %v607_v1 = vmov (!%p165_p2), 0.0   ;;  %v593_v2 = vld [vmem:[%s692_s1] sm:$0xff] (!%p165_p2)   ;;  %v594_v3 = vld [vmem:[%s692_s1 + $0x18] sm:$0xff] (!%p165_p2)   ;;  %vm608_vm0 = vmmov (!%p165_p2), 0   ;;  %p192_p3 = scmp.lt.s32.totalorder (!%p165_p2), %s528_s16, 1 }
   0x6   : > { %168 = sbr.rel (%p165_p2) target bundleno = 274 (0x112), region = 32  ;;  %558 = vmatprep.subr.bf16.mxu0 (!%p165_p2), %v607_v1  ;;  %566 = vmatprep.subr.bf16.mxu1 (!%p165_p2), %v607_v1  ;;  %v595_v4 = vld [vmem:[%s692_s1 + $0x8] sm:$0xff] (!%p165_p2)   ;;  %vm217_vm1 = vcmask (!%p165_p2), 1040384   ;;  %vm218_vm2 = vsmask.f32 (!%p165_p2), 256  ;;  %vm221_vm3 = vcmask (!%p165_p2), 1044480  }
   0x7   : > { %559 = vmatpush3.bf16.msra.mxu0 (!%p165_p2), %v592_v0  ;;  %562 = vmatprep.mubr.msk.bf16.mxu0 (!%p165_p2), %vm608_vm0, %v607_v1  ;;  %vm222_vm4 = vsmask.f32 (!%p165_p2), 4352  ;;  %vm219_vm5 = vmand (!%p165_p2), %vm217_vm1, %vm218_vm2  ;;  %vm252_vm7 = vcmask (!%p165_p2), 261120   ;;  %v597_v15 = vld [vmem:[%s692_s1 + $0x20] sm:$0xff] (!%p165_p2)   ;;  %v598_v17 = vld [vmem:[%s692_s1 + $0x28] sm:$0xff] (!%p165_p2)   ;;  %vm424_vm8 = vcmask (!%p165_p2), 523264  }
   0x8   : > { %567 = vmatpush3.bf16.msra.mxu1 (!%p165_p2), %v593_v2  ;;  %560 = vmatprep.subr.bf16.mxu0 (!%p165_p2), %v607_v1  ;;  %vm223_vm6 = vmand (!%p165_p2), %vm221_vm3, %vm222_vm4  ;;  %v546_v29 = vld [vmem:[%s693_s2] ss:$0 sm:$0xff] (!%p165_p2)  ;;  %vm422_vm9 = vcmask (!%p165_p2), 519168   ;;  %vm442_vm10 = vcmask (!%p165_p2), 517120  }
   0x9   : > { %568 = vmatprep.subr.bf16.mxu1 (!%p165_p2), %v607_v1  ;;  %570 = vmatprep.mubr.msk.bf16.mxu1 (!%p165_p2), %vm608_vm0, %v607_v1 }
   0xb   : > { %561 = vmatpush3.bf16.msra.mxu0 (!%p165_p2), %v594_v3 }
   0xc   : > { %569 = vmatpush3.bf16.msra.mxu1 (!%p165_p2), %v595_v4  ;;  %574 = vmatprep.subr.bf16.mxu0 (!%p165_p2), %v607_v1 }
   0xd   : > { %s697_s16 = smov (!%p192_p3, %s528_s16), 1 }
   0xe   : > { %s533_s25 = sshll.u32 %s697_s16, 2  ;;  %s535_s12 = sshll.u32 %s697_s16, 1 }
   0xf   : > { %s195_s28 = scalar_lea.vmem %s691_s0, %s533_s25  ;;  %s199_s11 = scalar_lea.vmem %s694_s3, %s533_s25 }
  0x10   : > { %v596_v5 = vld [vmem:[%s195_s28] ss:$0 sps:$4 sm:$0xff]   ;;  %s203_s17 = scalar_lea.vmem %s695_s4, %s535_s12 }
  0x11   : > { %v210_v6 = vshrl.u32 %v596_v5, 16  ;;  %v213_v7 = vshll.u32 %v596_v5, 16 }
  0x13   : > { %v212_v8 = vrot.slane %v210_v6, 7 }
  0x15   : > { %v215_v9 = vor.u32 %v213_v7, %v212_v8 }
  0x17   : > { %v220_v10 = vsel %vm219_vm5, 0, %v215_v9 }
  0x18   : > { %v224_v11 = vsel %vm223_vm6, %v220_v10, 0 }
  0x19   : > { %v234_v12 = vshrl.u32 %v224_v11, 16  ;;  %v236_v13 = vshll.u32 %v224_v11, 16  ;;  %571 = vmatmul.mubr.msk.bf16.vlgmr.msra.gmra.mrb[0].mxu1 %vm252_vm7, %v224_v11  ;;  %v355_v18 = vrot.slane %v224_v11, 1 }
  0x1b   : > { %v238_v14 = vrot.slane %v236_v13, 1 }
  0x1d   : > { %v239_v16 = vor.u32 %v238_v14, %v234_v12 }
  0x1f   : > { %563 = vmatmul.mubr.msk.bf16.vlgmr.msra.gmra.mrb[0].mxu0 %vm252_vm7, %v239_v16 }
  0x20   : > { %575 = vmatpush3.bf16.msra.mxu0 %v597_v15  ;;  %578 = vmatprep.mubr.msk.bf16.mxu0 %vm608_vm0, %v607_v1 }
  0x21   : > { %576 = vmatprep.subr.bf16.mxu0 %v607_v1 }
  0x24   : > { %577 = vmatpush3.bf16.msra.mxu0 %v598_v17 }
  0x27   : > { %579 = vmatmul.mubr.msk.bf16.vlgmr.msra.gmra.mrb[4].mxu0 %vm252_vm7, %v355_v18 }
  0xec   : > { %v344_v19 = vpop.f32.mrb[0].mxu1 }
  0xed   : > { %v572_v20 = vpop.f32.mrb[1].mxu1 }
  0xee   : > { %v347_v21 = vpop.f32.mrb[2].mxu1 }
  0xef   : > { %v573_v22 = vpop.f32.mrb[3].mxu1 }
  0xf2   : > { %v290_v23 = vpop.f32.mrb[0].mxu0 }
  0xf3   : > { %v345_v24 = vadd.f32 %v344_v19, %v290_v23  ;;  %v564_v25 = vpop.f32.mrb[1].mxu0 }
  0xf4   : > { %v293_v26 = vpop.f32.mrb[2].mxu0 }
  0xf5   : > { %v565_v27 = vpop.f32.mrb[3].mxu0 }
  0xfa   : > { %v405_v28 = vpop.f32.mrb[4].mxu0 }
  0xfb   : > { %v411_v30 = vadd.f32 %v405_v28, %v345_v24  ;;  %v580_v31 = vpop.f32.mrb[5].mxu0 }
  0xfc   : > { %v408_v32 = vpop.f32.mrb[6].mxu0 }
  0xfd   : > { %v419_v33 = vadd.f32 %v546_v29, %v411_v30  ;;  %v581_v34 = vpop.f32.mrb[7].mxu0 }
  0xff   : > { %v420_v35 = vmax.f32 %v419_v33, 0.0 }
 0x101   : > { %v421_v36 = vpack.c.bf16 %v420_v35, %v420_v35  ;;  %v425_v37 = vsel %vm424_vm8, %v420_v35, 0.0  ;;  %v432_v38 = vmul.f32 %v420_v35, %v420_v35 }
 0x102   : > { %v426_v39 = vrot.slane %v425_v37, 4 }
 0x103   : > { %423 = vst.msk [vmem:[%s199_s11] sm:$0xf] %vm422_vm9, %v421_v36  ;;  %v433_v40 = vsel %vm424_vm8, %v432_v38, 0.0 }
 0x104   : > { %v427_v41 = vadd.f32 %v426_v39, %v425_v37  ;;  %v434_v42 = vrot.slane %v433_v40, 4 }
 0x106   : > { %v428_v43 = vrot.slane %v427_v41, 2  ;;  %v435_v44 = vadd.f32 %v434_v42, %v433_v40 }
 0x108   : > { %v429_v45 = vadd.f32 %v428_v43, %v427_v41  ;;  %v436_v46 = vrot.slane %v435_v44, 2 }
 0x10a   : > { %v430_v47 = vrot.slane %v429_v45, 1  ;;  %v437_v48 = vadd.f32 %v436_v46, %v435_v44 }
 0x10c   : > { %v438_v49 = vrot.slane %v437_v48, 1  ;;  %v431_v50 = vadd.f32 %v430_v47, %v429_v45 }
 0x10e   : > { %v439_v51 = vadd.f32 %v438_v49, %v437_v48 }
 0x110   : > { %v441_v52 = vsel %vm217_vm1, %v431_v50, %v439_v51 }
 0x111   : > { %443 = vst.msk [vmem:[%s203_s17] sm:$0x3] %vm442_vm10, %v441_v52 }
 0x112 PF: > { %s15_s15 = sadd.s32 1, %s605_s15  }
 0x113   : > { %p12_p4 = scmp.ge.s32.totalorder %s15_s15, 4  }
 0x115   :  { %14 = sbr.rel (!%p12_p4) target bundleno = 1 (0x1), region = 74 }

// kernel: tsd_unet_forward.21
= control target key start
LH: loop header
LB: loop body
LE: loop exit
PB: predicated region body
PF: predicated region fallthrough
CT: control target
= control target key end

     0   :  { %s672_s18 = smov 0   ;;  %s733_s0 = inlined_call_operand.vmem [shape: bf16[2,8,64], index: 0, kind: input, shape index: {}]   ;;  %s734_s1 = inlined_call_operand.vmem [shape: bf16[128,32], index: 1, kind: input, shape index: {}]   ;;  %s735_s2 = inlined_call_operand.vmem [shape: f32[1,1,32], index: 2, kind: input, shape index: {}]   ;;  %s736_s3 = inlined_call_operand.vmem [shape: f32[1,1,64], index: 3, kind: input, shape index: {}]   ;;  %s737_s4 = inlined_call_operand.vmem [shape: f32[2,1,64], index: 4, kind: input, shape index: {}]   ;;  %s738_s5 = inlined_call_operand.vmem [shape: bf16[2,8,32], index: 5, kind: output, shape index: {}]  }
   0x1 LB: > { %s550_s19 = sadd.s32 4294967295, %s637_s18   ;;  %p554_p0 = scmp.ge.s32.totalorder %s637_s18, 1  ;;  %s637_s18 = sphi %s672_s18, %s15_s18  }
   0x2   : > { %p194_p1 = scmp.lt.s32.totalorder %s637_s18, 3 }
   0x4   : > { %p195_p2 = pnand %p554_p0, %p194_p1 }
   0x5   : > { %p223_p3 = scmp.lt.s32.totalorder (!%p195_p2), %s550_s19, 1  ;;  %v623_v0 = vld [vmem:[%s734_s1 + $0x10] sm:$0xff] (!%p195_p2)   ;;  %v639_v1 = vmov (!%p195_p2), 0.0   ;;  %v624_v2 = vld [vmem:[%s734_s1 + $0x18] sm:$0xff] (!%p195_p2)   ;;  %vm640_vm0 = vmmov (!%p195_p2), 0   ;;  %v625_v3 = vld [vmem:[%s734_s1] sm:$0xff] (!%p195_p2)  }
   0x6   : > { %198 = sbr.rel (%p195_p2) target bundleno = 375 (0x177), region = 40  ;;  %584 = vmatprep.subr.bf16.mxu0 (!%p195_p2), %v639_v1  ;;  %596 = vmatprep.subr.bf16.mxu1 (!%p195_p2), %v639_v1  ;;  %v557_v4 = vld [vmem:[%s736_s3] ss:$0 sm:$0xff] (!%p195_p2)  ;;  %v627_v8 = vld [vmem:[%s734_s1 + $0x8] sm:$0xff] (!%p195_p2)   ;;  %vm262_vm1 = vcmask (!%p195_p2), 1040384   ;;  %vm266_vm3 = vcmask (!%p195_p2), 1044480  }
   0x7   : > { %585 = vmatpush3.bf16.msra.mxu0 (!%p195_p2), %v623_v0  ;;  %592 = vmatprep.mubr.msk.bf16.mxu0 (!%p195_p2), %vm640_vm0, %v639_v1  ;;  %v626_v6 = vld [vmem:[%s734_s1 + $0x20] sm:$0xff] (!%p195_p2)   ;;  %v628_v12 = vld [vmem:[%s734_s1 + $0x28] sm:$0xff] (!%p195_p2)   ;;  %vm263_vm2 = vsmask.f32 (!%p195_p2), 256  ;;  %vm267_vm4 = vsmask.f32 (!%p195_p2), 4352 }
   0x8   : > { %586 = vmatprep.subr.bf16.mxu0 (!%p195_p2), %v639_v1  ;;  %600 = vmatprep.mubr.msk.bf16.mxu1 (!%p195_p2), %vm640_vm0, %v639_v1  ;;  %vm264_vm5 = vmand (!%p195_p2), %vm262_vm1, %vm263_vm2  ;;  %s641_s16 = smov (!%p195_p2), 96   ;;  %vm313_vm7 = vcmask (!%p195_p2), 523264   ;;  %vm372_vm8 = vcmask (!%p195_p2), 261120   ;;  %v629_v24 = vld [vmem:[%s734_s1 + $0x30] sm:$0xff] (!%p195_p2)   ;;  %v630_v26 = vld [vmem:[%s734_s1 + $0x38] sm:$0xff] (!%p195_p2)   ;;  %vm486_vm9 = vcmask (!%p195_p2), 257024  }
   0x9   : > { %597 = vmatpush3.bf16.msra.mxu1 (!%p195_p2), %v625_v3  ;;  %vm268_vm6 = vmand (!%p195_p2), %vm266_vm3, %vm267_vm4  ;;  %v570_v38 = vld [vmem:[%s735_s2] ss:$0 sm:$0xff] (!%p195_p2) }
   0xa   : > { %598 = vmatprep.subr.bf16.mxu1 (!%p195_p2), %v639_v1 }
   0xb   : > { %587 = vmatpush3.bf16.msra.mxu0 (!%p195_p2), %v624_v2 }
   0xc   : > { %588 = vmatprep.subr.bf16.mxu0 (!%p195_p2), %v639_v1 }
   0xd   : > { %s740_s19 = smov (!%p223_p3, %s550_s19), 1  ;;  %599 = vmatpush3.bf16.msra.mxu1 %v627_v8 }
   0xe   : > { %s555_s24 = sshll.u32 %s740_s19, 2  ;;  %s229_s7 = scalar_lea.vmem %s737_s4, %s740_s19  ;;  %604 = vmatprep.subr.bf16.mxu1 %v639_v1 }
   0xf   : > { %s226_s29 = scalar_lea.vmem %s733_s0, %s555_s24  ;;  %v558_v9 = vld [vmem:[%s229_s7] ss:$0 sm:$0xff]  ;;  %589 = vmatpush3.bf16.msra.mxu0 %v626_v6  ;;  %s233_s28 = scalar_lea.vmem %s738_s5, %s555_s24 }
  0x10   : > { %v235_v5 = vld [vmem:[%s226_s29] sm:$0xf]  ;;  %590 = vmatprep.subr.bf16.mxu0 %v639_v1 }
  0x11   : > { %v236_v7 = vunpack.c.l.bf16 %v235_v5 }
  0x13   : > { %v244_v10 = vmul.f32 %v557_v4, %v236_v7  ;;  %591 = vmatpush3.bf16.msra.mxu0 %v628_v12 }
  0x15   : > { %v252_v11 = vadd.f32 %v558_v9, %v244_v10 }
  0x17   : > { %v253_v13 = vpack.c.bf16 %v252_v11, %v252_v11 }
  0x19   : > { %v255_v14 = vshrl.u32 %v253_v13, 16  ;;  %v258_v15 = vshll.u32 %v253_v13, 16 }
  0x1b   : > { %v257_v16 = vrot.slane %v255_v14, 7 }
  0x1d   : > { %v260_v17 = vor.u32 %v258_v15, %v257_v16 }
  0x1f   : > { %v265_v18 = vsel %vm264_vm5, 0, %v260_v17 }
  0x20   : > { %v269_v19 = vsel %vm268_vm6, %v265_v18, 0 }
  0x21   : > { %v283_v20 = vshrl.u32 %v269_v19, 16  ;;  %v285_v21 = vshll.u32 %v269_v19, 16  ;;  %358 = vrot.lane.b32.xlu0 %v269_v19, %s641_s16  ;;  %v420_v27 = vrot.slane %v269_v19, 1 }
  0x23   : > { %v287_v22 = vrot.slane %v285_v21, 1 }
  0x25   : > { %v288_v23 = vor.u32 %v287_v22, %v283_v20 }
  0x27   : > { %593 = vmatmul.mubr.msk.bf16.vlgmr.msra.gmra.mrb[0].mxu0 %vm313_vm7, %v288_v23 }
  0x93   : > { %v359_v25 = vpop.permute.xlu0 %358 }
  0x94   : > { %601 = vmatmul.mubr.msk.bf16.vlgmr.msra.gmra.mrb[0].mxu1 %vm372_vm8, %v359_v25 }
  0x95   : > { %605 = vmatpush3.bf16.msra.mxu1 %v629_v24  ;;  %608 = vmatprep.mubr.msk.bf16.mxu1 %vm640_vm0, %v639_v1 }
  0x96   : > { %606 = vmatprep.subr.bf16.mxu1 %v639_v1 }
  0x99   : > { %607 = vmatpush3.bf16.msra.mxu1 %v630_v26 }
  0x9c   : > { %609 = vmatmul.mubr.msk.bf16.vlgmr.msra.gmra.mrb[4].mxu1 %vm372_vm8, %v420_v27 }
  0xfa   : > { %v351_v28 = vpop.f32.mrb[0].mxu0 }
  0xfb   : > { %v594_v29 = vpop.f32.mrb[1].mxu0 }
  0xfc   : > { %v354_v30 = vpop.f32.mrb[2].mxu0 }
  0xfd   : > { %v595_v31 = vpop.f32.mrb[3].mxu0 }
 0x167   : > { %v410_v32 = vpop.f32.mrb[0].mxu1 }
 0x168   : > { %v411_v33 = vadd.f32 %v410_v32, %v351_v28  ;;  %v602_v34 = vpop.f32.mrb[1].mxu1 }
 0x169   : > { %v413_v35 = vpop.f32.mrb[2].mxu1 }
 0x16a   : > { %v603_v36 = vpop.f32.mrb[3].mxu1 }
 0x16f   : > { %v470_v37 = vpop.f32.mrb[4].mxu1 }
 0x170   : > { %v476_v39 = vadd.f32 %v470_v37, %v411_v33  ;;  %v610_v40 = vpop.f32.mrb[5].mxu1 }
 0x171   : > { %v473_v41 = vpop.f32.mrb[6].mxu1 }
 0x172   : > { %v484_v42 = vadd.f32 %v570_v38, %v476_v39  ;;  %v611_v43 = vpop.f32.mrb[7].mxu1 }
 0x174   : > { %v485_v44 = vpack.c.bf16 %v484_v42, %v484_v42 }
 0x176   : > { %487 = vst.msk [vmem:[%s233_s28] sm:$0xf] %vm486_vm9, %v485_v44 }
 0x177 PF: > { %s15_s18 = sadd.s32 1, %s637_s18  }
 0x178   : > { %p12_p4 = scmp.ge.s32.totalorder %s15_s18, 4  }
 0x17a   :  { %14 = sbr.rel (!%p12_p4) target bundleno = 1 (0x1), region = 73 }

// kernel: tsd_unet_forward.23
= control target key start
LH: loop header
LB: loop body
LE: loop exit
PB: predicated region body
PF: predicated region fallthrough
CT: control target
= control target key end

     0   :  { %s813_s21 = smov 0   ;;  %s912_s0 = inlined_call_operand.vmem [shape: bf16[2,8,64], index: 0, kind: input, shape index: {}]   ;;  %s913_s1 = inlined_call_operand.vmem [shape: bf16[192,64], index: 1, kind: input, shape index: {}]   ;;  %s914_s2 = inlined_call_operand.vmem [shape: f32[1,1,64], index: 2, kind: input, shape index: {}]   ;;  %s915_s3 = inlined_call_operand.vmem [shape: f32[1,1,64], index: 3, kind: input, shape index: {}]   ;;  %s916_s4 = inlined_call_operand.vmem [shape: f32[2,1,64], index: 4, kind: input, shape index: {}]   ;;  %s917_s5 = inlined_call_operand.vmem [shape: bf16[2,8,64], index: 5, kind: output, shape index: {0}]   ;;  %s918_s6 = inlined_call_operand.vmem [shape: f32[2,2,64], index: 6, kind: output, shape index: {1}]  }
   0x1 LB: > { %s667_s22 = sadd.s32 4294967295, %s774_s21   ;;  %p671_p0 = scmp.ge.s32.totalorder %s774_s21, 1  ;;  %s774_s21 = sphi %s813_s21, %s17_s21  }
   0x2   : > { %p222_p1 = scmp.lt.s32.totalorder %s774_s21, 3 }
   0x4   : > { %p223_p2 = pnand %p671_p0, %p222_p1 }
   0x5   : > { %v756_v0 = vld [vmem:[%s913_s1 + $0x20] sm:$0xff] (!%p223_p2)   ;;  %v776_v1 = vmov (!%p223_p2), 0.0   ;;  %v758_v3 = vld [vmem:[%s913_s1 + $0x28] sm:$0xff] (!%p223_p2)   ;;  %vm777_vm0 = vmmov (!%p223_p2), 0   ;;  %p257_p3 = scmp.lt.s32.totalorder (!%p223_p2), %s667_s22, 1  ;;  %v760_v5 = vld [vmem:[%s913_s1 + $0x30] sm:$0xff] (!%p223_p2)  }
   0x6   : > { %226 = sbr.rel (%p223_p2) target bundleno = 290 (0x122), region = 40  ;;  %710 = vmatprep.subr.bf16.mxu0 (!%p223_p2), %v776_v1  ;;  %722 = vmatprep.subr.bf16.mxu1 (!%p223_p2), %v776_v1  ;;  %v757_v2 = vld [vmem:[%s913_s1] sm:$0xff] (!%p223_p2)   ;;  %v759_v4 = vld [vmem:[%s913_s1 + $0x8] sm:$0xff] (!%p223_p2)   ;;  %v761_v6 = vld [vmem:[%s913_s1 + $0x10] sm:$0xff] (!%p223_p2)   ;;  %vm300_vm1 = vcmask (!%p223_p2), 1040384   ;;  %vm304_vm3 = vcmask (!%p223_p2), 1044480  }
   0x7   : > { %711 = vmatpush3.bf16.msra.mxu0 (!%p223_p2), %v756_v0  ;;  %718 = vmatprep.mubr.msk.bf16.mxu0 (!%p223_p2), %vm777_vm0, %v776_v1  ;;  %v675_v8 = vld [vmem:[%s915_s3] ss:$0 sm:$0xff] (!%p223_p2)  ;;  %v762_v10 = vld [vmem:[%s913_s1 + $0x38] sm:$0xff] (!%p223_p2)   ;;  %vm301_vm2 = vsmask.f32 (!%p223_p2), 256  ;;  %vm355_vm7 = vcmask (!%p223_p2), 523264  }
   0x8   : > { %723 = vmatpush3.bf16.msra.mxu1 (!%p223_p2), %v757_v2  ;;  %712 = vmatprep.subr.bf16.mxu0 (!%p223_p2), %v776_v1  ;;  %v763_v12 = vld [vmem:[%s913_s1 + $0x18] sm:$0xff] (!%p223_p2)   ;;  %vm305_vm4 = vsmask.f32 (!%p223_p2), 4352  ;;  %vm302_vm5 = vmand (!%p223_p2), %vm300_vm1, %vm301_vm2  ;;  %v764_v25 = vld [vmem:[%s913_s1 + $0x40] sm:$0xff] (!%p223_p2)   ;;  %vm553_vm8 = vcmask (!%p223_p2), 519168   ;;  %vm572_vm9 = vcmask (!%p223_p2), 517120  }
   0x9   : > { %724 = vmatprep.subr.bf16.mxu1 (!%p223_p2), %v776_v1  ;;  %730 = vmatprep.mubr.msk.bf16.mxu1 (!%p223_p2), %vm777_vm0, %v776_v1  ;;  %vm306_vm6 = vmand (!%p223_p2), %vm304_vm3, %vm305_vm4  ;;  %v765_v27 = vld [vmem:[%s913_s1 + $0x48] sm:$0xff] (!%p223_p2)   ;;  %v766_v28 = vld [vmem:[%s913_s1 + $0x50] sm:$0xff] (!%p223_p2)  }
   0xa   : > { %v767_v29 = vld [vmem:[%s913_s1 + $0x58] sm:$0xff] (!%p223_p2)   ;;  %v692_v41 = vld [vmem:[%s914_s2] ss:$0 sm:$0xff] (!%p223_p2) }
   0xb   : > { %713 = vmatpush3.bf16.msra.mxu0 (!%p223_p2), %v758_v3 }
   0xc   : > { %725 = vmatpush3.bf16.msra.mxu1 (!%p223_p2), %v759_v4  ;;  %714 = vmatprep.subr.bf16.mxu0 (!%p223_p2), %v776_v1 }
   0xd   : > { %s920_s22 = smov (!%p257_p3, %s667_s22), 1  ;;  %726 = vmatprep.subr.bf16.mxu1 %v776_v1 }
   0xe   : > { %s672_s9 = sshll.u32 %s920_s22, 2  ;;  %s263_s17 = scalar_lea.vmem %s916_s4, %s920_s22 }
   0xf   : > { %s260_s14 = scalar_lea.vmem %s912_s0, %s672_s9  ;;  %715 = vmatpush3.bf16.msra.mxu0 %v760_v5  ;;  %v676_v11 = vld [vmem:[%s263_s17] ss:$0 sm:$0xff]  ;;  %s267_s15 = scalar_lea.vmem %s917_s5, %s672_s9 }
  0x10   : > { %v273_v7 = vld [vmem:[%s260_s14] sm:$0xf]  ;;  %727 = vmatpush3.bf16.msra.mxu1 %v761_v6  ;;  %716 = vmatprep.subr.bf16.mxu0 %v776_v1  ;;  %s674_s16 = sshll.u32 %s920_s22, 1 }
  0x11   : > { %v274_v9 = vunpack.c.l.bf16 %v273_v7  ;;  %728 = vmatprep.subr.bf16.mxu1 %v776_v1  ;;  %s271_s18 = scalar_lea.vmem %s918_s6, %s674_s16 }
  0x13   : > { %v282_v13 = vmul.f32 %v675_v8, %v274_v9  ;;  %717 = vmatpush3.bf16.msra.mxu0 %v762_v10 }
  0x14   : > { %729 = vmatpush3.bf16.msra.mxu1 %v763_v12  ;;  %734 = vmatprep.subr.bf16.mxu0 %v776_v1 }
  0x15   : > { %v290_v14 = vadd.f32 %v676_v11, %v282_v13 }
  0x17   : > { %v291_v15 = vpack.c.bf16 %v290_v14, %v290_v14 }
  0x19   : > { %v293_v16 = vshrl.u32 %v291_v15, 16  ;;  %v296_v17 = vshll.u32 %v291_v15, 16 }
  0x1b   : > { %v295_v18 = vrot.slane %v293_v16, 7 }
  0x1d   : > { %v298_v19 = vor.u32 %v296_v17, %v295_v18 }
  0x1f   : > { %v303_v20 = vsel %vm302_vm5, 0, %v298_v19 }
  0x20   : > { %v307_v21 = vsel %vm306_vm6, %v303_v20, 0 }
  0x21   : > { %v325_v22 = vshrl.u32 %v307_v21, 16  ;;  %v327_v23 = vshll.u32 %v307_v21, 16  ;;  %731 = vmatmul.mubr.msk.bf16.vlgmr.msra.gmra.mrb[0].mxu1 %vm355_vm7, %v307_v21  ;;  %v474_v30 = vrot.slane %v307_v21, 1 }
  0x23   : > { %v329_v24 = vrot.slane %v327_v23, 1 }
  0x25   : > { %v330_v26 = vor.u32 %v329_v24, %v325_v22 }
  0x27   : > { %719 = vmatmul.mubr.msk.bf16.vlgmr.msra.gmra.mrb[0].mxu0 %vm355_vm7, %v330_v26 }
  0x28   : > { %735 = vmatpush3.bf16.msra.mxu0 %v764_v25  ;;  %742 = vmatprep.mubr.msk.bf16.mxu0 %vm777_vm0, %v776_v1 }
  0x29   : > { %736 = vmatprep.subr.bf16.mxu0 %v776_v1 }
  0x2c   : > { %737 = vmatpush3.bf16.msra.mxu0 %v765_v27 }
  0x2d   : > { %738 = vmatprep.subr.bf16.mxu0 %v776_v1 }
  0x30   : > { %739 = vmatpush3.bf16.msra.mxu0 %v766_v28 }
  0x31   : > { %740 = vmatprep.subr.bf16.mxu0 %v776_v1 }
  0x34   : > { %741 = vmatpush3.bf16.msra.mxu0 %v767_v29 }
  0x37   : > { %743 = vmatmul.mubr.msk.bf16.vlgmr.msra.gmra.mrb[4].mxu0 %vm355_vm7, %v474_v30 }
  0xf4   : > { %v459_v31 = vpop.f32.mrb[0].mxu1 }
  0xf5   : > { %v732_v32 = vpop.f32.mrb[1].mxu1 }
  0xf6   : > { %v462_v33 = vpop.f32.mrb[2].mxu1 }
  0xf7   : > { %v733_v34 = vpop.f32.mrb[3].mxu1 }
  0xfa   : > { %v393_v35 = vpop.f32.mrb[0].mxu0 }
  0xfb   : > { %v460_v36 = vadd.f32 %v459_v31, %v393_v35  ;;  %v720_v37 = vpop.f32.mrb[1].mxu0 }
  0xfc   : > { %v396_v38 = vpop.f32.mrb[2].mxu0 }
  0xfd   : > { %v721_v39 = vpop.f32.mrb[3].mxu0 }
 0x10a   : > { %v536_v40 = vpop.f32.mrb[4].mxu0 }
 0x10b   : > { %v542_v42 = vadd.f32 %v536_v40, %v460_v36  ;;  %v744_v43 = vpop.f32.mrb[5].mxu0 }
 0x10c   : > { %v539_v44 = vpop.f32.mrb[6].mxu0 }
 0x10d   : > { %v550_v45 = vadd.f32 %v692_v41, %v542_v42  ;;  %v745_v46 = vpop.f32.mrb[7].mxu0 }
 0x10f   : > { %v551_v47 = vmax.f32 %v550_v45, 0.0 }
 0x111   : > { %v552_v48 = vpack.c.bf16 %v551_v47, %v551_v47  ;;  %v555_v49 = vsel %vm355_vm7, %v551_v47, 0.0  ;;  %v562_v50 = vmul.f32 %v551_v47, %v551_v47 }
 0x112   : > { %v556_v51 = vrot.slane %v555_v49, 4 }
 0x113   : > { %554 = vst.msk [vmem:[%s267_s15] sm:$0xf] %vm553_vm8, %v552_v48  ;;  %v563_v52 = vsel %vm355_vm7, %v562_v50, 0.0 }
 0x114   : > { %v557_v53 = vadd.f32 %v556_v51, %v555_v49  ;;  %v564_v54 = vrot.slane %v563_v52, 4 }
 0x116   : > { %v558_v55 = vrot.slane %v557_v53, 2  ;;  %v565_v56 = vadd.f32 %v564_v54, %v563_v52 }
 0x118   : > { %v559_v57 = vadd.f32 %v558_v55, %v557_v53  ;;  %v566_v58 = vrot.slane %v565_v56, 2 }
 0x11a   : > { %v560_v59 = vrot.slane %v559_v57, 1  ;;  %v567_v60 = vadd.f32 %v566_v58, %v565_v56 }
 0x11c   : > { %v568_v61 = vrot.slane %v567_v60, 1  ;;  %v561_v62 = vadd.f32 %v560_v59, %v559_v57 }
 0x11e   : > { %v569_v63 = vadd.f32 %v568_v61, %v567_v60 }
 0x120   : > { %v571_v0 = vsel %vm300_vm1, %v561_v62, %v569_v63 }
 0x121   : > { %573 = vst.msk [vmem:[%s271_s18] sm:$0x3] %vm572_vm9, %v571_v0 }
 0x122 PF: > { %s17_s21 = sadd.s32 1, %s774_s21  }
 0x123   : > { %p14_p4 = scmp.ge.s32.totalorder %s17_s21, 4  }
 0x125   :  { %16 = sbr.rel (!%p14_p4) target bundleno = 1 (0x1), region = 85 }

// kernel: tsd_unet_forward.24
= control target key start
LH: loop header
LB: loop body
LE: loop exit
PB: predicated region body
PF: predicated region fallthrough
CT: control target
= control target key end

     0   :  { %s772_s18 = smov 0   ;;  %s879_s0 = inlined_call_operand.vmem [shape: bf16[2,4,128], index: 0, kind: input, shape index: {}]   ;;  %s880_s1 = inlined_call_operand.vmem [shape: bf16[256,64], index: 1, kind: input, shape index: {}]   ;;  %s881_s2 = inlined_call_operand.vmem [shape: f32[1,1,64], index: 2, kind: input, shape index: {}]   ;;  %s882_s3 = inlined_call_operand.vmem [shape: f32[1,1,128], index: 3, kind: input, shape index: {}]   ;;  %s883_s4 = inlined_call_operand.vmem [shape: f32[2,1,128], index: 4, kind: input, shape index: {}]   ;;  %s884_s5 = inlined_call_operand.vmem [shape: bf16[2,4,64], index: 5, kind: output, shape index: {}]  }
   0x1 LB: > { %s611_s19 = sadd.s32 4294967295, %s737_s18   ;;  %p615_p0 = scmp.ge.s32.totalorder %s737_s18, 1  ;;  %s737_s18 = sphi %s772_s18, %s15_s18  }
   0x2   : > { %p194_p1 = scmp.lt.s32.totalorder %s737_s18, 3 }
   0x4   : > { %p195_p2 = pnand %p615_p0, %p194_p1 }
   0x5   : > { %p223_p3 = scmp.lt.s32.totalorder (!%p195_p2), %s611_s19, 1  ;;  %v715_v0 = vld [vmem:[%s880_s1 + $0x20] sm:$0xff] (!%p195_p2)   ;;  %v739_v1 = vmov (!%p195_p2), 0.0   ;;  %v716_v2 = vld [vmem:[%s880_s1 + $0x28] sm:$0xff] (!%p195_p2)   ;;  %vm740_vm0 = vmmov (!%p195_p2), 0   ;;  %v717_v5 = vld [vmem:[%s880_s1 + $0x30] sm:$0xff] (!%p195_p2)  }
   0x6   : > { %198 = sbr.rel (%p195_p2) target bundleno = 383 (0x17f), region = 40  ;;  %660 = vmatprep.subr.bf16.mxu0 (!%p195_p2), %v739_v1  ;;  %680 = vmatprep.subr.bf16.mxu1 (!%p195_p2), %v739_v1  ;;  %v618_v3 = vld [vmem:[%s882_s3] ss:$0 sm:$0xff] (!%p195_p2)  ;;  %v721_v10 = vld [vmem:[%s880_s1 + $0x8] sm:$0xff] (!%p195_p2)   ;;  %v718_v12 = vld [vmem:[%s880_s1 + $0x38] sm:$0xff] (!%p195_p2)   ;;  %vm262_vm2 = vcmask (!%p195_p2), 1040384  }
   0x7   : > { %661 = vmatpush3.bf16.msra.mxu0 (!%p195_p2), %v715_v0  ;;  %676 = vmatprep.mubr.msk.bf16.mxu0 (!%p195_p2), %vm740_vm0, %v739_v1  ;;  %v719_v7 = vld [vmem:[%s880_s1] sm:$0xff] (!%p195_p2)   ;;  %vm263_vm1 = vsmask.f32 (!%p195_p2), 256  ;;  %v723_v14 = vld [vmem:[%s880_s1 + $0x10] sm:$0xff] (!%p195_p2)   ;;  %vm267_vm3 = vsmask.f32 (!%p195_p2), 2304 }
   0x8   : > { %662 = vmatprep.subr.bf16.mxu0 (!%p195_p2), %v739_v1  ;;  %688 = vmatprep.mubr.msk.bf16.mxu1 (!%p195_p2), %vm740_vm0, %v739_v1  ;;  %vm266_vm4 = vcmask (!%p195_p2), 1042432   ;;  %v720_v17 = vld [vmem:[%s880_s1 + $0x40] sm:$0xff] (!%p195_p2)   ;;  %v725_v19 = vld [vmem:[%s880_s1 + $0x18] sm:$0xff] (!%p195_p2)   ;;  %vm264_vm5 = vmand (!%p195_p2), %vm262_vm2, %vm263_vm1  ;;  %vm417_vm7 = vcmask (!%p195_p2), 523264   ;;  %vm547_vm8 = vcmask (!%p195_p2), 517120  }
   0x9   : > { %681 = vmatpush3.bf16.msra.mxu1 (!%p195_p2), %v719_v7  ;;  %vm268_vm6 = vmand (!%p195_p2), %vm266_vm4, %vm267_vm3  ;;  %v722_v21 = vld [vmem:[%s880_s1 + $0x48] sm:$0xff] (!%p195_p2)   ;;  %v724_v24 = vld [vmem:[%s880_s1 + $0x50] sm:$0xff] (!%p195_p2)  }
   0xa   : > { %682 = vmatprep.subr.bf16.mxu1 (!%p195_p2), %v739_v1  ;;  %v726_v28 = vld [vmem:[%s880_s1 + $0x58] sm:$0xff] (!%p195_p2)   ;;  %v727_v30 = vld [vmem:[%s880_s1 + $0x60] sm:$0xff] (!%p195_p2)   ;;  %v728_v32 = vld [vmem:[%s880_s1 + $0x68] sm:$0xff] (!%p195_p2)  }
   0xb   : > { %663 = vmatpush3.bf16.msra.mxu0 (!%p195_p2), %v716_v2  ;;  %v729_v33 = vld [vmem:[%s880_s1 + $0x70] sm:$0xff] (!%p195_p2)   ;;  %v730_v34 = vld [vmem:[%s880_s1 + $0x78] sm:$0xff] (!%p195_p2)   ;;  %v638_v46 = vld [vmem:[%s881_s2] ss:$0 sm:$0xff] (!%p195_p2) }
   0xc   : > { %664 = vmatprep.subr.bf16.mxu0 (!%p195_p2), %v739_v1 }
   0xd   : > { %s886_s19 = smov (!%p223_p3, %s611_s19), 1  ;;  %683 = vmatpush3.bf16.msra.mxu1 %v721_v10 }
   0xe   : > { %s616_s24 = sshll.u32 %s886_s19, 1  ;;  %s229_s30 = scalar_lea.vmem %s883_s4, %s886_s19  ;;  %684 = vmatprep.subr.bf16.mxu1 %v739_v1 }
   0xf   : > { %s226_s27 = scalar_lea.vmem %s879_s0, %s616_s24  ;;  %v619_v8 = vld [vmem:[%s229_s30] ss:$0 sm:$0xff]  ;;  %665 = vmatpush3.bf16.msra.mxu0 %v717_v5  ;;  %s233_s21 = scalar_lea.vmem %s884_s5, %s616_s24 }
  0x10   : > { %v235_v4 = vld [vmem:[%s226_s27] sm:$0x3]  ;;  %666 = vmatprep.subr.bf16.mxu0 %v739_v1  ;;  %s741_s27 = smov 64  }
  0x11   : > { %v236_v6 = vunpack.c.l.bf16 %v235_v4  ;;  %685 = vmatpush3.bf16.msra.mxu1 %v723_v14 }
  0x12   : > { %686 = vmatprep.subr.bf16.mxu1 %v739_v1 }
  0x13   : > { %v244_v9 = vmul.f32 %v618_v3, %v236_v6  ;;  %667 = vmatpush3.bf16.msra.mxu0 %v718_v12 }
  0x14   : > { %668 = vmatprep.subr.bf16.mxu0 %v739_v1 }
  0x15   : > { %v252_v11 = vadd.f32 %v619_v8, %v244_v9  ;;  %687 = vmatpush3.bf16.msra.mxu1 %v725_v19 }
  0x16   : > { %692 = vmatprep.subr.bf16.mxu1 %v739_v1 }
  0x17   : > { %v253_v13 = vpack.c.bf16 %v252_v11, %v252_v11  ;;  %669 = vmatpush3.bf16.msra.mxu0 %v720_v17 }
  0x18   : > { %670 = vmatprep.subr.bf16.mxu0 %v739_v1 }
  0x19   : > { %v255_v15 = vshrl.u32 %v253_v13, 16  ;;  %v258_v16 = vshll.u32 %v253_v13, 16 }
  0x1b   : > { %v257_v18 = vrot.slane %v255_v15, 7  ;;  %671 = vmatpush3.bf16.msra.mxu0 %v722_v21 }
  0x1c   : > { %672 = vmatprep.subr.bf16.mxu0 %v739_v1 }
  0x1d   : > { %v260_v20 = vor.u32 %v258_v16, %v257_v18 }
  0x1f   : > { %v265_v22 = vsel %vm264_vm5, 0, %v260_v20  ;;  %673 = vmatpush3.bf16.msra.mxu0 %v724_v24 }
  0x20   : > { %v269_v23 = vsel %vm268_vm6, %v265_v22, 0  ;;  %674 = vmatprep.subr.bf16.mxu0 %v739_v1 }
  0x21   : > { %391 = vrot.lane.b32.xlu0 %v269_v23, %s741_s27  ;;  %v297_v25 = vshll.u32 %v269_v23, 16  ;;  %v295_v26 = vshrl.u32 %v269_v23, 16  ;;  %v469_v35 = vrot.slane %v269_v23, 1 }
  0x23   : > { %v299_v27 = vrot.slane %v297_v25, 1  ;;  %675 = vmatpush3.bf16.msra.mxu0 %v726_v28 }
  0x25   : > { %v300_v29 = vor.u32 %v299_v27, %v295_v26 }
  0x27   : > { %677 = vmatmul.mubr.bf16.vlgmr.msra.gmra.mrb[0].mxu0 %v300_v29 }
  0x93   : > { %v392_v31 = vpop.permute.xlu0 %391 }
  0x94   : > { %689 = vmatmul.mubr.msk.bf16.vlgmr.msra.gmra.mrb[0].mxu1 %vm417_vm7, %v392_v31 }
  0x95   : > { %693 = vmatpush3.bf16.msra.mxu1 %v727_v30  ;;  %700 = vmatprep.mubr.msk.bf16.mxu1 %vm740_vm0, %v739_v1 }
  0x96   : > { %694 = vmatprep.subr.bf16.mxu1 %v739_v1 }
  0x99   : > { %695 = vmatpush3.bf16.msra.mxu1 %v728_v32 }
  0x9a   : > { %696 = vmatprep.subr.bf16.mxu1 %v739_v1 }
  0x9d   : > { %697 = vmatpush3.bf16.msra.mxu1 %v729_v33 }
  0x9e   : > { %698 = vmatprep.subr.bf16.mxu1 %v739_v1 }
  0xa1   : > { %699 = vmatpush3.bf16.msra.mxu1 %v730_v34 }
  0xa4   : > { %701 = vmatmul.mubr.msk.bf16.vlgmr.msra.gmra.mrb[4].mxu1 %vm417_vm7, %v469_v35 }
  0xfa   : > { %v384_v36 = vpop.f32.mrb[0].mxu0 }
  0xfb   : > { %v678_v37 = vpop.f32.mrb[1].mxu0 }
  0xfc   : > { %v387_v38 = vpop.f32.mrb[2].mxu0 }
  0xfd   : > { %v679_v39 = vpop.f32.mrb[3].mxu0 }
 0x167   : > { %v455_v40 = vpop.f32.mrb[0].mxu1 }
 0x168   : > { %v456_v41 = vadd.f32 %v455_v40, %v384_v36  ;;  %v690_v42 = vpop.f32.mrb[1].mxu1 }
 0x169   : > { %v458_v43 = vpop.f32.mrb[2].mxu1 }
 0x16a   : > { %v691_v44 = vpop.f32.mrb[3].mxu1 }
 0x177   : > { %v531_v45 = vpop.f32.mrb[4].mxu1 }
 0x178   : > { %v537_v47 = vadd.f32 %v531_v45, %v456_v41  ;;  %v702_v48 = vpop.f32.mrb[5].mxu1 }
 0x179   : > { %v534_v49 = vpop.f32.mrb[6].mxu1 }
 0x17a   : > { %v545_v50 = vadd.f32 %v638_v46, %v537_v47  ;;  %v703_v51 = vpop.f32.mrb[7].mxu1 }
 0x17c   : > { %v546_v52 = vpack.c.bf16 %v545_v50, %v545_v50 }
 0x17e   : > { %548 = vst.msk [vmem:[%s233_s21] sm:$0x3] %vm547_vm8, %v546_v52 }
 0x17f PF: > { %s15_s18 = sadd.s32 1, %s737_s18  }
 0x180   : > { %p12_p4 = scmp.ge.s32.totalorder %s15_s18, 4  }
 0x182   :  { %14 = sbr.rel (!%p12_p4) target bundleno = 1 (0x1), region = 73 }

// kernel: tsd_unet_forward.25
= control target key start
LH: loop header
LB: loop body
LE: loop exit
PB: predicated region body
PF: predicated region fallthrough
CT: control target
= control target key end

     0   :  { %s1110_s18 = smov 0   ;;  %s1282_s0 = inlined_call_operand.vmem [shape: bf16[2,4,64], index: 0, kind: input, shape index: {}, may-alias: {0,1}]   ;;  %s1283_s1 = inlined_call_operand.vmem [shape: bf16[2,4,64], index: 1, kind: input, shape index: {}, may-alias: {0,1}]   ;;  %s1284_s2 = inlined_call_operand.vmem [shape: bf16[384,32], index: 2, kind: input, shape index: {}]   ;;  %s1285_s3 = inlined_call_operand.vmem [shape: f32[1,1,32], index: 3, kind: input, shape index: {}]   ;;  %s1286_s4 = inlined_call_operand.vmem [shape: bf16[2,4,32], index: 4, kind: output, shape index: {0}]   ;;  %s1287_s5 = inlined_call_operand.vmem [shape: f32[2,2,32], index: 5, kind: output, shape index: {1}]  }
   0x1 LB: > { %s890_s19 = sadd.s32 4294967295, %s1076_s18   ;;  %p894_p0 = scmp.ge.s32.totalorder %s1076_s18, 1  ;;  %s1076_s18 = sphi %s1110_s18, %s16_s18  }
   0x2   : > { %p198_p1 = scmp.lt.s32.totalorder %s1076_s18, 3 }
   0x4   : > { %p199_p2 = pnand %p894_p0, %p198_p1 }
   0x5   : > { %v1046_v0 = vld [vmem:[%s1284_s2 + $0x20] sm:$0xff] (!%p199_p2)   ;;  %v1078_v1 = vmov (!%p199_p2), 0.0   ;;  %v1048_v3 = vld [vmem:[%s1284_s2 + $0x28] sm:$0xff] (!%p199_p2)   ;;  %vm1079_vm0 = vmmov (!%p199_p2), 0   ;;  %p232_p3 = scmp.lt.s32.totalorder (!%p199_p2), %s890_s19, 1  ;;  %vm266_vm1 = vcmask (!%p199_p2), 1040384  }
   0x6   : > { %202 = sbr.rel (%p199_p2) target bundleno = 295 (0x127), region = 36  ;;  %964 = vmatprep.subr.bf16.mxu0 (!%p199_p2), %v1078_v1  ;;  %976 = vmatprep.subr.bf16.mxu1 (!%p199_p2), %v1078_v1  ;;  %v1047_v2 = vld [vmem:[%s1284_s2] sm:$0xff] (!%p199_p2)   ;;  %v1049_v4 = vld [vmem:[%s1284_s2 + $0x8] sm:$0xff] (!%p199_p2)   ;;  %v1050_v5 = vld [vmem:[%s1284_s2 + $0x30] sm:$0xff] (!%p199_p2)   ;;  %vm270_vm2 = vcmask (!%p199_p2), 1042432   ;;  %vm333_vm7 = vcmask (!%p199_p2), 523264  }
   0x7   : > { %965 = vmatpush3.bf16.msra.mxu0 (!%p199_p2), %v1046_v0  ;;  %972 = vmatprep.mubr.msk.bf16.mxu0 (!%p199_p2), %vm1079_vm0, %v1078_v1  ;;  %v1051_v6 = vld [vmem:[%s1284_s2 + $0x10] sm:$0xff] (!%p199_p2)   ;;  %v1052_v7 = vld [vmem:[%s1284_s2 + $0x38] sm:$0xff] (!%p199_p2)   ;;  %vm267_vm3 = vsmask.f32 (!%p199_p2), 256  ;;  %vm271_vm4 = vsmask.f32 (!%p199_p2), 2304 }
   0x8   : > { %977 = vmatpush3.bf16.msra.mxu1 (!%p199_p2), %v1047_v2  ;;  %966 = vmatprep.subr.bf16.mxu0 (!%p199_p2), %v1078_v1  ;;  %v1053_v12 = vld [vmem:[%s1284_s2 + $0x18] sm:$0xff] (!%p199_p2)   ;;  %vm1165_vm5 = vmand (!%p199_p2), %vm266_vm1, %vm267_vm3  ;;  %v1054_v20 = vld [vmem:[%s1284_s2 + $0x60] sm:$0xff] (!%p199_p2)   ;;  %vm775_vm8 = vcmask (!%p199_p2), 257024   ;;  %vm773_vm9 = vcmask (!%p199_p2), 254976  }
   0x9   : > { %978 = vmatprep.subr.bf16.mxu1 (!%p199_p2), %v1078_v1  ;;  %984 = vmatprep.mubr.msk.bf16.mxu1 (!%p199_p2), %vm1079_vm0, %v1078_v1  ;;  %vm272_vm6 = vmand (!%p199_p2), %vm270_vm2, %vm271_vm4  ;;  %v1055_v22 = vld [vmem:[%s1284_s2 + $0x40] sm:$0xff] (!%p199_p2)   ;;  %v1056_v26 = vld [vmem:[%s1284_s2 + $0x68] sm:$0xff] (!%p199_p2)  }
   0xa   : > { %v1057_v27 = vld [vmem:[%s1284_s2 + $0x48] sm:$0xff] (!%p199_p2)   ;;  %v1058_v30 = vld [vmem:[%s1284_s2 + $0x70] sm:$0xff] (!%p199_p2)   ;;  %v1060_v36 = vld [vmem:[%s1284_s2 + $0x78] sm:$0xff] (!%p199_p2)  }
   0xb   : > { %967 = vmatpush3.bf16.msra.mxu0 (!%p199_p2), %v1048_v3  ;;  %v1059_v31 = vld [vmem:[%s1284_s2 + $0x50] sm:$0xff] (!%p199_p2)   ;;  %v1061_v37 = vld [vmem:[%s1284_s2 + $0x58] sm:$0xff] (!%p199_p2)   ;;  %v1062_v40 = vld [vmem:[%s1284_s2 + $0xa0] sm:$0xff] (!%p199_p2)  }
   0xc   : > { %979 = vmatpush3.bf16.msra.mxu1 (!%p199_p2), %v1049_v4  ;;  %968 = vmatprep.subr.bf16.mxu0 (!%p199_p2), %v1078_v1  ;;  %v1063_v41 = vld [vmem:[%s1284_s2 + $0x80] sm:$0xff] (!%p199_p2)   ;;  %v1064_v42 = vld [vmem:[%s1284_s2 + $0xa8] sm:$0xff] (!%p199_p2)   ;;  %v1066_v44 = vld [vmem:[%s1284_s2 + $0xb0] sm:$0xff] (!%p199_p2)  }
   0xd   : > { %s1291_s19 = smov (!%p232_p3, %s890_s19), 1  ;;  %980 = vmatprep.subr.bf16.mxu1 %v1078_v1  ;;  %v1065_v43 = vld [vmem:[%s1284_s2 + $0x88] sm:$0xff]   ;;  %v1067_v45 = vld [vmem:[%s1284_s2 + $0x90] sm:$0xff]   ;;  %v1068_v46 = vld [vmem:[%s1284_s2 + $0xb8] sm:$0xff]  }
   0xe   : > { %s1141_s30 = sshll.u32 %s1291_s19, 1  ;;  %v1069_v47 = vld [vmem:[%s1284_s2 + $0x98] sm:$0xff]  }
   0xf   : > { %s239_s10 = scalar_lea.vmem %s1283_s1, %s1141_s30  ;;  %s235_s15 = scalar_lea.vmem %s1282_s0, %s1141_s30  ;;  %969 = vmatpush3.bf16.msra.mxu0 %v1050_v5 }
  0x10   : > { %v900_v8 = vld.sshfl [vmem:[%s239_s10] sm:$0x3 pattern:$0x76325410]  ;;  %981 = vmatpush3.bf16.msra.mxu1 %v1051_v6  ;;  %970 = vmatprep.subr.bf16.mxu0 %v1078_v1  ;;  %s243_s8 = scalar_lea.vmem %s1286_s4, %s1141_s30  ;;  %s247_s11 = scalar_lea.vmem %s1287_s5, %s1141_s30 }
  0x11   : > { %v284_v9 = vshrl.u32 %v900_v8, 16  ;;  %v287_v10 = vshll.u32 %v900_v8, 16  ;;  %v899_v11 = vld.sshfl [vmem:[%s235_s15] sm:$0x3 pattern:$0x76325410]  ;;  %982 = vmatprep.subr.bf16.mxu1 %v1078_v1 }
  0x12   : > { %v259_v13 = vshrl.u32 %v899_v11, 16  ;;  %v262_v14 = vshll.u32 %v899_v11, 16  ;;  %v931_v11 = vld [vmem:[%s1285_s3] ss:$0 sm:$0xff] }
  0x13   : > { %v286_v16 = vrot.slane %v284_v9, 7  ;;  %971 = vmatpush3.bf16.msra.mxu0 %v1052_v7 }
  0x14   : > { %v261_v17 = vrot.slane %v259_v13, 7  ;;  %983 = vmatpush3.bf16.msra.mxu1 %v1053_v12  ;;  %988 = vmatprep.subr.bf16.mxu0 %v1078_v1 }
  0x15   : > { %v289_v18 = vor.u32 %v287_v10, %v286_v16  ;;  %1000 = vmatprep.subr.bf16.mxu1 %v1078_v1 }
  0x16   : > { %v264_v19 = vor.u32 %v262_v14, %v261_v17 }
  0x17   : > { %v291_v21 = vsel %vm1165_vm5, 0, %v289_v18 }
  0x18   : > { %v1181_v23 = vsel %vm272_vm6, %v291_v21, 0  ;;  %v269_v24 = vsel %vm1165_vm5, 0, %v264_v19 }
  0x19   : > { %973 = vmatmul.mubr.msk.bf16.vlgmr.msra.gmra.mrb[0].mxu0 %vm333_vm7, %v1181_v23  ;;  %v1187_v25 = vsel %vm272_vm6, %v269_v24, 0  ;;  %v463_v28 = vshll.u32 %v1181_v23, 16  ;;  %v461_v32 = vshrl.u32 %v1181_v23, 16  ;;  %v625_v48 = vrot.slane %v1181_v23, 1 }
  0x1a   : > { %985 = vmatmul.mubr.msk.bf16.vlgmr.msra.gmra.mrb[0].mxu1 %vm333_vm7, %v1187_v25  ;;  %989 = vmatpush3.bf16.msra.mxu0 %v1054_v20  ;;  %v536_v29 = vshll.u32 %v1187_v25, 16  ;;  %v534_v34 = vshrl.u32 %v1187_v25, 16  ;;  %v694_v49 = vrot.slane %v1187_v25, 1 }
  0x1b   : > { %1001 = vmatpush3.bf16.msra.mxu1 %v1055_v22  ;;  %990 = vmatprep.subr.bf16.mxu0 %v1078_v1  ;;  %v465_v33 = vrot.slane %v463_v28, 1 }
  0x1c   : > { %1002 = vmatprep.subr.bf16.mxu1 %v1078_v1  ;;  %996 = vmatprep.mubr.msk.bf16.mxu0 %vm1079_vm0, %v1078_v1  ;;  %v538_v35 = vrot.slane %v536_v29, 1 }
  0x1d   : > { %1008 = vmatprep.mubr.msk.bf16.mxu1 %vm1079_vm0, %v1078_v1  ;;  %v466_v38 = vor.u32 %v465_v33, %v461_v32 }
  0x1e   : > { %991 = vmatpush3.bf16.msra.mxu0 %v1056_v26  ;;  %v539_v39 = vor.u32 %v538_v35, %v534_v34 }
  0x1f   : > { %1003 = vmatpush3.bf16.msra.mxu1 %v1057_v27  ;;  %992 = vmatprep.subr.bf16.mxu0 %v1078_v1 }
  0x20   : > { %1004 = vmatprep.subr.bf16.mxu1 %v1078_v1 }
  0x22   : > { %993 = vmatpush3.bf16.msra.mxu0 %v1058_v30 }
  0x23   : > { %1005 = vmatpush3.bf16.msra.mxu1 %v1059_v31  ;;  %994 = vmatprep.subr.bf16.mxu0 %v1078_v1 }
  0x24   : > { %1006 = vmatprep.subr.bf16.mxu1 %v1078_v1 }
  0x26   : > { %995 = vmatpush3.bf16.msra.mxu0 %v1060_v36 }
  0x27   : > { %1007 = vmatpush3.bf16.msra.mxu1 %v1061_v37  ;;  %1012 = vmatprep.subr.bf16.mxu0 %v1078_v1 }
  0x28   : > { %1024 = vmatprep.subr.bf16.mxu1 %v1078_v1 }
  0x29   : > { %997 = vmatmul.mubr.msk.bf16.vlgmr.msra.gmra.mrb[4].mxu0 %vm333_vm7, %v466_v38 }
  0x2a   : > { %1009 = vmatmul.mubr.msk.bf16.vlgmr.msra.gmra.mrb[4].mxu1 %vm333_vm7, %v539_v39  ;;  %1013 = vmatpush3.bf16.msra.mxu0 %v1062_v40 }
  0x2b   : > { %1025 = vmatpush3.bf16.msra.mxu1 %v1063_v41  ;;  %1014 = vmatprep.subr.bf16.mxu0 %v1078_v1 }
  0x2c   : > { %1026 = vmatprep.subr.bf16.mxu1 %v1078_v1  ;;  %1020 = vmatprep.mubr.msk.bf16.mxu0 %vm1079_vm0, %v1078_v1 }
  0x2d   : > { %1032 = vmatprep.mubr.msk.bf16.mxu1 %vm1079_vm0, %v1078_v1 }
  0x2e   : > { %1015 = vmatpush3.bf16.msra.mxu0 %v1064_v42 }
  0x2f   : > { %1027 = vmatpush3.bf16.msra.mxu1 %v1065_v43  ;;  %1016 = vmatprep.subr.bf16.mxu0 %v1078_v1 }
  0x30   : > { %1028 = vmatprep.subr.bf16.mxu1 %v1078_v1 }
  0x32   : > { %1017 = vmatpush3.bf16.msra.mxu0 %v1066_v44 }
  0x33   : > { %1029 = vmatpush3.bf16.msra.mxu1 %v1067_v45  ;;  %1018 = vmatprep.subr.bf16.mxu0 %v1078_v1 }
  0x34   : > { %1030 = vmatprep.subr.bf16.mxu1 %v1078_v1 }
  0x36   : > { %1019 = vmatpush3.bf16.msra.mxu0 %v1068_v46 }
  0x37   : > { %1031 = vmatpush3.bf16.msra.mxu1 %v1069_v47 }
  0x39   : > { %1021 = vmatmul.mubr.msk.bf16.vlgmr.msra.gmra.mrb[8].mxu0 %vm333_vm7, %v625_v48 }
  0x3a   : > { %1033 = vmatmul.mubr.msk.bf16.vlgmr.msra.gmra.mrb[8].mxu1 %vm333_vm7, %v694_v49 }
  0xec   : > { %v371_v50 = vpop.f32.mrb[0].mxu0 }
  0xed   : > { %v438_v51 = vpop.f32.mrb[0].mxu1  ;;  %v974_v52 = vpop.f32.mrb[1].mxu0 }
  0xee   : > { %v439_v53 = vadd.f32 %v438_v51, %v371_v50  ;;  %v986_v54 = vpop.f32.mrb[1].mxu1  ;;  %v374_v55 = vpop.f32.mrb[2].mxu0 }
  0xef   : > { %v441_v56 = vpop.f32.mrb[2].mxu1  ;;  %v975_v57 = vpop.f32.mrb[3].mxu0 }
  0xf0   : > { %v987_v58 = vpop.f32.mrb[3].mxu1 }
  0xfc   : > { %v528_v59 = vpop.f32.mrb[4].mxu0 }
  0xfd   : > { %v601_v60 = vpop.f32.mrb[4].mxu1  ;;  %v998_v61 = vpop.f32.mrb[5].mxu0 }
  0xfe   : > { %v602_v62 = vadd.f32 %v601_v60, %v528_v59  ;;  %v1010_v63 = vpop.f32.mrb[5].mxu1  ;;  %v531_v0 = vpop.f32.mrb[6].mxu0 }
  0xff   : > { %v604_v1 = vpop.f32.mrb[6].mxu1  ;;  %v999_v2 = vpop.f32.mrb[7].mxu0 }
 0x100   : > { %v607_v3 = vadd.f32 %v602_v62, %v439_v53  ;;  %v1011_v4 = vpop.f32.mrb[7].mxu1 }
 0x10c   : > { %v687_v5 = vpop.f32.mrb[8].mxu0 }
 0x10d   : > { %v756_v6 = vpop.f32.mrb[8].mxu1  ;;  %v1022_v7 = vpop.f32.mrb[9].mxu0 }
 0x10e   : > { %v757_v8 = vadd.f32 %v756_v6, %v687_v5  ;;  %v1034_v9 = vpop.f32.mrb[9].mxu1  ;;  %v690_v10 = vpop.f32.mrb[10].mxu0 }
 0x10f   : > { %v759_v12 = vpop.f32.mrb[10].mxu1  ;;  %v1023_v13 = vpop.f32.mrb[11].mxu0 }
 0x110   : > { %v762_v14 = vadd.f32 %v757_v8, %v607_v3  ;;  %v1035_v15 = vpop.f32.mrb[11].mxu1 }
 0x112   : > { %v770_v16 = vadd.f32 %v931_v11, %v762_v14 }
 0x114   : > { %v771_v17 = vmax.f32 %v770_v16, 0.0 }
 0x116   : > { %v772_v18 = vpack.c.bf16 %v771_v17, %v771_v17  ;;  %v776_v19 = vsel %vm775_vm8, %v771_v17, 0.0  ;;  %v783_v20 = vmul.f32 %v771_v17, %v771_v17 }
 0x117   : > { %v777_v21 = vrot.slane %v776_v19, 4 }
 0x118   : > { %774 = vst.msk [vmem:[%s243_s8] sm:$0x3] %vm773_vm9, %v772_v18  ;;  %v784_v22 = vsel %vm775_vm8, %v783_v20, 0.0 }
 0x119   : > { %v778_v23 = vadd.f32 %v777_v21, %v776_v19  ;;  %v785_v24 = vrot.slane %v784_v22, 4 }
 0x11b   : > { %v779_v25 = vrot.slane %v778_v23, 2  ;;  %v786_v26 = vadd.f32 %v785_v24, %v784_v22 }
 0x11d   : > { %v780_v27 = vadd.f32 %v779_v25, %v778_v23  ;;  %v787_v28 = vrot.slane %v786_v26, 2 }
 0x11f   : > { %v781_v29 = vrot.slane %v780_v27, 1  ;;  %v788_v30 = vadd.f32 %v787_v28, %v786_v26 }
 0x121   : > { %v789_v31 = vrot.slane %v788_v30, 1  ;;  %v782_v32 = vadd.f32 %v781_v29, %v780_v27 }
 0x123   : > { %v790_v33 = vadd.f32 %v789_v31, %v788_v30 }
 0x125   : > { %v792_v34 = vsel %vm266_vm1, %v782_v32, %v790_v33 }
 0x126   : > { %793 = vst.msk [vmem:[%s247_s11] sm:$0x3] %vm773_vm9, %v792_v34 }
 0x127 PF: > { %s16_s18 = sadd.s32 1, %s1076_s18  }
 0x128   : > { %p13_p4 = scmp.ge.s32.totalorder %s16_s18, 4  }
 0x12a   :  { %15 = sbr.rel (!%p13_p4) target bundleno = 1 (0x1), region = 81 }

// kernel: tsd_unet_forward.26
= control target key start
LH: loop header
LB: loop body
LE: loop exit
PB: predicated region body
PF: predicated region fallthrough
CT: control target
= control target key end

     0   :  { %s735_s21 = smov 0   ;;  %s797_s0 = inlined_call_operand.vmem [shape: bf16[2,4,32], index: 0, kind: input, shape index: {}]   ;;  %s798_s1 = inlined_call_operand.vmem [shape: bf16[96,32], index: 1, kind: input, shape index: {}]   ;;  %s799_s2 = inlined_call_operand.vmem [shape: f32[1,1,32], index: 2, kind: input, shape index: {}]   ;;  %s800_s3 = inlined_call_operand.vmem [shape: f32[1,1,32], index: 3, kind: input, shape index: {}]   ;;  %s801_s4 = inlined_call_operand.vmem [shape: f32[2,1,32], index: 4, kind: input, shape index: {}]   ;;  %s802_s5 = inlined_call_operand.vmem [shape: bf16[2,4,32], index: 5, kind: output, shape index: {0}]   ;;  %s803_s6 = inlined_call_operand.vmem [shape: f32[2,2,32], index: 6, kind: output, shape index: {1}]  }
   0x1 LB: > { %s619_s22 = sadd.s32 4294967295, %s696_s21   ;;  %p623_p0 = scmp.ge.s32.totalorder %s696_s21, 1  ;;  %s696_s21 = sphi %s735_s21, %s17_s21  }
   0x2   : > { %p222_p1 = scmp.lt.s32.totalorder %s696_s21, 3 }
   0x4   : > { %p223_p2 = pnand %p623_p0, %p222_p1 }
   0x5   : > { %v684_v0 = vld [vmem:[%s798_s1 + $0x10] sm:$0xff] (!%p223_p2)   ;;  %v698_v1 = vmov (!%p223_p2), 0.0   ;;  %v685_v2 = vld [vmem:[%s798_s1] sm:$0xff] (!%p223_p2)   ;;  %v686_v3 = vld [vmem:[%s798_s1 + $0x18] sm:$0xff] (!%p223_p2)   ;;  %vm699_vm0 = vmmov (!%p223_p2), 0   ;;  %p257_p3 = scmp.lt.s32.totalorder (!%p223_p2), %s619_s22, 1 }
   0x6   : > { %226 = sbr.rel (%p223_p2) target bundleno = 282 (0x11a), region = 40  ;;  %650 = vmatprep.subr.bf16.mxu0 (!%p223_p2), %v698_v1  ;;  %658 = vmatprep.subr.bf16.mxu1 (!%p223_p2), %v698_v1  ;;  %v687_v4 = vld [vmem:[%s798_s1 + $0x8] sm:$0xff] (!%p223_p2)   ;;  %v627_v6 = vld [vmem:[%s800_s3] ss:$0 sm:$0xff] (!%p223_p2)  ;;  %vm300_vm1 = vcmask (!%p223_p2), 1040384   ;;  %vm304_vm3 = vcmask (!%p223_p2), 1042432  }
   0x7   : > { %651 = vmatpush3.bf16.msra.mxu0 (!%p223_p2), %v684_v0  ;;  %654 = vmatprep.mubr.msk.bf16.mxu0 (!%p223_p2), %vm699_vm0, %v698_v1  ;;  %vm301_vm2 = vsmask.f32 (!%p223_p2), 256  ;;  %vm305_vm4 = vsmask.f32 (!%p223_p2), 2304  ;;  %vm335_vm7 = vcmask (!%p223_p2), 261120   ;;  %v688_v21 = vld [vmem:[%s798_s1 + $0x20] sm:$0xff] (!%p223_p2)  }
   0x8   : > { %659 = vmatpush3.bf16.msra.mxu1 (!%p223_p2), %v685_v2  ;;  %652 = vmatprep.subr.bf16.mxu0 (!%p223_p2), %v698_v1  ;;  %vm302_vm5 = vmand (!%p223_p2), %vm300_vm1, %vm301_vm2  ;;  %v689_v23 = vld [vmem:[%s798_s1 + $0x28] sm:$0xff] (!%p223_p2)   ;;  %v638_v35 = vld [vmem:[%s799_s2] ss:$0 sm:$0xff] (!%p223_p2)  ;;  %vm507_vm8 = vcmask (!%p223_p2), 257024   ;;  %vm505_vm9 = vcmask (!%p223_p2), 254976  }
   0x9   : > { %660 = vmatprep.subr.bf16.mxu1 (!%p223_p2), %v698_v1  ;;  %662 = vmatprep.mubr.msk.bf16.mxu1 (!%p223_p2), %vm699_vm0, %v698_v1  ;;  %vm306_vm6 = vmand (!%p223_p2), %vm304_vm3, %vm305_vm4 }
   0xb   : > { %653 = vmatpush3.bf16.msra.mxu0 (!%p223_p2), %v686_v3 }
   0xc   : > { %661 = vmatpush3.bf16.msra.mxu1 (!%p223_p2), %v687_v4  ;;  %666 = vmatprep.subr.bf16.mxu0 (!%p223_p2), %v698_v1 }
   0xd   : > { %s805_s22 = smov (!%p257_p3, %s619_s22), 1 }
   0xe   : > { %s757_s7 = sshll.u32 %s805_s22, 1  ;;  %s263_s13 = scalar_lea.vmem %s801_s4, %s805_s22 }
   0xf   : > { %s260_s10 = scalar_lea.vmem %s797_s0, %s757_s7  ;;  %v628_v8 = vld [vmem:[%s263_s13] ss:$0 sm:$0xff]  ;;  %s267_s25 = scalar_lea.vmem %s802_s5, %s757_s7 }
  0x10   : > { %v273_v5 = vld [vmem:[%s260_s10] sm:$0x3]  ;;  %s271_s28 = scalar_lea.vmem %s803_s6, %s757_s7 }
  0x11   : > { %v274_v7 = vunpack.c.l.bf16 %v273_v5 }
  0x13   : > { %v282_v9 = vmul.f32 %v627_v6, %v274_v7 }
  0x15   : > { %v290_v10 = vadd.f32 %v628_v8, %v282_v9 }
  0x17   : > { %v291_v11 = vpack.c.bf16 %v290_v10, %v290_v10 }
  0x19   : > { %v293_v12 = vshrl.u32 %v291_v11, 16  ;;  %v296_v13 = vshll.u32 %v291_v11, 16 }
  0x1b   : > { %v295_v14 = vrot.slane %v293_v12, 7 }
  0x1d   : > { %v298_v15 = vor.u32 %v296_v13, %v295_v14 }
  0x1f   : > { %v303_v16 = vsel %vm302_vm5, 0, %v298_v15 }
  0x20   : > { %v307_v17 = vsel %vm306_vm6, %v303_v16, 0 }
  0x21   : > { %v317_v18 = vshrl.u32 %v307_v17, 16  ;;  %v319_v19 = vshll.u32 %v307_v17, 16  ;;  %663 = vmatmul.mubr.msk.bf16.vlgmr.msra.gmra.mrb[0].mxu1 %vm335_vm7, %v307_v17  ;;  %v438_v24 = vrot.slane %v307_v17, 1 }
  0x23   : > { %v321_v20 = vrot.slane %v319_v19, 1 }
  0x25   : > { %v322_v22 = vor.u32 %v321_v20, %v317_v18 }
  0x27   : > { %655 = vmatmul.mubr.msk.bf16.vlgmr.msra.gmra.mrb[0].mxu0 %vm335_vm7, %v322_v22 }
  0x28   : > { %667 = vmatpush3.bf16.msra.mxu0 %v688_v21  ;;  %670 = vmatprep.mubr.msk.bf16.mxu0 %vm699_vm0, %v698_v1 }
  0x29   : > { %668 = vmatprep.subr.bf16.mxu0 %v698_v1 }
  0x2c   : > { %669 = vmatpush3.bf16.msra.mxu0 %v689_v23 }
  0x2f   : > { %671 = vmatmul.mubr.msk.bf16.vlgmr.msra.gmra.mrb[4].mxu0 %vm335_vm7, %v438_v24 }
  0xf4   : > { %v427_v25 = vpop.f32.mrb[0].mxu1 }
  0xf5   : > { %v664_v26 = vpop.f32.mrb[1].mxu1 }
  0xf6   : > { %v430_v27 = vpop.f32.mrb[2].mxu1 }
  0xf7   : > { %v665_v28 = vpop.f32.mrb[3].mxu1 }
  0xfa   : > { %v373_v29 = vpop.f32.mrb[0].mxu0 }
  0xfb   : > { %v428_v30 = vadd.f32 %v427_v25, %v373_v29  ;;  %v656_v31 = vpop.f32.mrb[1].mxu0 }
  0xfc   : > { %v376_v32 = vpop.f32.mrb[2].mxu0 }
  0xfd   : > { %v657_v33 = vpop.f32.mrb[3].mxu0 }
 0x102   : > { %v488_v34 = vpop.f32.mrb[4].mxu0 }
 0x103   : > { %v494_v36 = vadd.f32 %v488_v34, %v428_v30  ;;  %v672_v37 = vpop.f32.mrb[5].mxu0 }
 0x104   : > { %v491_v38 = vpop.f32.mrb[6].mxu0 }
 0x105   : > { %v502_v39 = vadd.f32 %v638_v35, %v494_v36  ;;  %v673_v40 = vpop.f32.mrb[7].mxu0 }
 0x107   : > { %v503_v41 = vmax.f32 %v502_v39, 0.0 }
 0x109   : > { %v504_v42 = vpack.c.bf16 %v503_v41, %v503_v41  ;;  %v508_v43 = vsel %vm507_vm8, %v503_v41, 0.0  ;;  %v515_v44 = vmul.f32 %v503_v41, %v503_v41 }
 0x10a   : > { %v509_v45 = vrot.slane %v508_v43, 4 }
 0x10b   : > { %506 = vst.msk [vmem:[%s267_s25] sm:$0x3] %vm505_vm9, %v504_v42  ;;  %v516_v46 = vsel %vm507_vm8, %v515_v44, 0.0 }
 0x10c   : > { %v510_v47 = vadd.f32 %v509_v45, %v508_v43  ;;  %v517_v48 = vrot.slane %v516_v46, 4 }
 0x10e   : > { %v511_v49 = vrot.slane %v510_v47, 2  ;;  %v518_v50 = vadd.f32 %v517_v48, %v516_v46 }
 0x110   : > { %v512_v51 = vadd.f32 %v511_v49, %v510_v47  ;;  %v519_v52 = vrot.slane %v518_v50, 2 }
 0x112   : > { %v513_v53 = vrot.slane %v512_v51, 1  ;;  %v520_v54 = vadd.f32 %v519_v52, %v518_v50 }
 0x114   : > { %v521_v55 = vrot.slane %v520_v54, 1  ;;  %v514_v56 = vadd.f32 %v513_v53, %v512_v51 }
 0x116   : > { %v522_v57 = vadd.f32 %v521_v55, %v520_v54 }
 0x118   : > { %v524_v58 = vsel %vm300_vm1, %v514_v56, %v522_v57 }
 0x119   : > { %525 = vst.msk [vmem:[%s271_s28] sm:$0x3] %vm505_vm9, %v524_v58 }
 0x11a PF: > { %s17_s21 = sadd.s32 1, %s696_s21  }
 0x11b   : > { %p14_p4 = scmp.ge.s32.totalorder %s17_s21, 4  }
 0x11d   :  { %16 = sbr.rel (!%p14_p4) target bundleno = 1 (0x1), region = 85 }

// kernel: tsd_unet_forward.27
= control target key start
LH: loop header
LB: loop body
LE: loop exit
PB: predicated region body
PF: predicated region fallthrough
CT: control target
= control target key end

     0   :  { %s656_s18 = smov 0   ;;  %s716_s0 = inlined_call_operand.vmem [shape: bf16[2,4,32], index: 0, kind: input, shape index: {}]   ;;  %s717_s1 = inlined_call_operand.vmem [shape: bf16[96,64], index: 1, kind: input, shape index: {}]   ;;  %s718_s2 = inlined_call_operand.vmem [shape: f32[1,1,64], index: 2, kind: input, shape index: {}]   ;;  %s719_s3 = inlined_call_operand.vmem [shape: f32[1,1,32], index: 3, kind: input, shape index: {}]   ;;  %s720_s4 = inlined_call_operand.vmem [shape: f32[2,1,32], index: 4, kind: input, shape index: {}]   ;;  %s721_s5 = inlined_call_operand.vmem [shape: bf16[2,4,64], index: 5, kind: output, shape index: {}]  }
   0x1 LB: > { %s542_s19 = sadd.s32 4294967295, %s620_s18   ;;  %p546_p0 = scmp.ge.s32.totalorder %s620_s18, 1  ;;  %s620_s18 = sphi %s656_s18, %s15_s18  }
   0x2   : > { %p194_p1 = scmp.lt.s32.totalorder %s620_s18, 3 }
   0x4   : > { %p195_p2 = pnand %p546_p0, %p194_p1 }
   0x5   : > { %v608_v0 = vld [vmem:[%s717_s1 + $0x20] sm:$0xff] (!%p195_p2)   ;;  %v609_v1 = vld [vmem:[%s717_s1 + $0x28] sm:$0xff] (!%p195_p2)   ;;  %s622_s24 = smov (!%p195_p2), 96   ;;  %v623_v2 = vmov (!%p195_p2), 0.0   ;;  %vm624_vm0 = vmmov (!%p195_p2), 0   ;;  %p223_p3 = scmp.lt.s32.totalorder (!%p195_p2), %s542_s19, 1 }
   0x6   : > { %198 = sbr.rel (%p195_p2) target bundleno = 463 (0x1cf), region = 40  ;;  %414 = vrot.lane.b32.xlu0 (!%p195_p2), %v608_v0, %s622_s24  ;;  %572 = vmatprep.subr.bf16.mxu0 (!%p195_p2), %v623_v2  ;;  %v610_v3 = vld [vmem:[%s717_s1] sm:$0xff] (!%p195_p2)   ;;  %v611_v4 = vld [vmem:[%s717_s1 + $0x8] sm:$0xff] (!%p195_p2)   ;;  %v612_v5 = vld [vmem:[%s717_s1 + $0x10] sm:$0xff] (!%p195_p2)   ;;  %vm262_vm1 = vcmask (!%p195_p2), 1040384   ;;  %vm266_vm3 = vcmask (!%p195_p2), 1042432  }
   0x7   : > { %580 = vmatprep.subr.bf16.mxu1 (!%p195_p2), %v623_v2  ;;  %576 = vmatprep.mubr.msk.bf16.mxu0 (!%p195_p2), %vm624_vm0, %v623_v2  ;;  %v613_v6 = vld [vmem:[%s717_s1 + $0x18] sm:$0xff] (!%p195_p2)   ;;  %v549_v8 = vld [vmem:[%s719_s3] ss:$0 sm:$0xff] (!%p195_p2)  ;;  %vm263_vm2 = vsmask.f32 (!%p195_p2), 256  ;;  %vm286_vm7 = vcmask (!%p195_p2), 261120  }
   0x8   : > { %573 = vmatpush3.bf16.msra.mxu0 (!%p195_p2), %v610_v3  ;;  %584 = vmatprep.mubr.msk.bf16.mxu1 (!%p195_p2), %vm624_vm0, %v623_v2  ;;  %vm267_vm4 = vsmask.f32 (!%p195_p2), 2304  ;;  %vm264_vm5 = vmand (!%p195_p2), %vm262_vm1, %vm263_vm2  ;;  %s625_s17 = smov (!%p195_p2), 32   ;;  %v560_v42 = vld [vmem:[%s718_s2] ss:$0 sm:$0xff] (!%p195_p2)  ;;  %vm478_vm8 = vcmask (!%p195_p2), 517120  }
   0x9   : > { %574 = vmatprep.subr.bf16.mxu0 (!%p195_p2), %v623_v2  ;;  %581 = vmatpush3.bf16.msra.mxu1 (!%p195_p2), %v612_v5  ;;  %vm268_vm6 = vmand (!%p195_p2), %vm266_vm3, %vm267_vm4 }
   0xa   : > { %416 = vrot.lane.b32.xlu0 (!%p195_p2), %v609_v1, %s622_s24  ;;  %582 = vmatprep.subr.bf16.mxu1 (!%p195_p2), %v623_v2 }
   0xc   : > { %575 = vmatpush3.bf16.msra.mxu0 (!%p195_p2), %v611_v4 }
   0xd   : > { %s723_s19 = smov (!%p223_p3, %s542_s19), 1  ;;  %588 = vmatprep.subr.bf16.mxu0 %v623_v2  ;;  %583 = vmatpush3.bf16.msra.mxu1 %v613_v6 }
   0xe   : > { %s547_s8 = sshll.u32 %s723_s19, 1  ;;  %s229_s14 = scalar_lea.vmem %s720_s4, %s723_s19 }
   0xf   : > { %s226_s11 = scalar_lea.vmem %s716_s0, %s547_s8  ;;  %v550_v10 = vld [vmem:[%s229_s14] ss:$0 sm:$0xff]  ;;  %s233_s24 = scalar_lea.vmem %s721_s5, %s547_s8 }
  0x10   : > { %v235_v7 = vld [vmem:[%s226_s11] sm:$0x3] }
  0x11   : > { %v236_v9 = vunpack.c.l.bf16 %v235_v7 }
  0x13   : > { %v244_v11 = vmul.f32 %v549_v8, %v236_v9 }
  0x15   : > { %v252_v12 = vadd.f32 %v550_v10, %v244_v11 }
  0x17   : > { %v253_v13 = vpack.c.bf16 %v252_v12, %v252_v12 }
  0x19   : > { %v255_v14 = vshrl.u32 %v253_v13, 16  ;;  %v258_v15 = vshll.u32 %v253_v13, 16 }
  0x1b   : > { %v257_v16 = vrot.slane %v255_v14, 7 }
  0x1d   : > { %v260_v17 = vor.u32 %v258_v15, %v257_v16 }
  0x1f   : > { %v265_v18 = vsel %vm264_vm5, 0, %v260_v17 }
  0x20   : > { %v269_v19 = vsel %vm268_vm6, %v265_v18, 0 }
  0x21   : > { %577 = vmatmul.mubr.msk.bf16.vlgmr.msra.gmra.mrb[0].mxu0 %vm286_vm7, %v269_v19  ;;  %v336_v20 = vshrl.u32 %v269_v19, 16  ;;  %v338_v21 = vshll.u32 %v269_v19, 16  ;;  %v403_v25 = vrot.slane %v269_v19, 1 }
  0x22   : > { %592 = vmatprep.mubr.msk.bf16.mxu0 %vm624_vm0, %v623_v2 }
  0x23   : > { %v340_v22 = vrot.slane %v338_v21, 1 }
  0x25   : > { %v341_v23 = vor.u32 %v340_v22, %v336_v20 }
  0x27   : > { %585 = vmatmul.mubr.msk.bf16.vlgmr.msra.gmra.mrb[0].mxu1 %vm286_vm7, %v341_v23 }
  0x78   : > { %v415_v24 = vpop.permute.xlu0 %414 }
  0x79   : > { %589 = vmatpush3.bf16.msra.mxu0 %v415_v24 }
  0x7a   : > { %590 = vmatprep.subr.bf16.mxu0 %v623_v2 }
  0x7c   : > { %v417_v26 = vpop.permute.xlu0 %416 }
  0x7d   : > { %591 = vmatpush3.bf16.msra.mxu0 %v417_v26 }
  0x80   : > { %593 = vmatmul.mubr.msk.bf16.vlgmr.msra.gmra.mrb[4].mxu0 %vm286_vm7, %v403_v25 }
  0xf4   : > { %v324_v27 = vpop.f32.mrb[0].mxu0 }
  0xf5   : > { %v578_v28 = vpop.f32.mrb[1].mxu0  ;;  %v330_v31 = vsel %vm286_vm7, %v324_v27, 0.0 }
  0xf6   : > { %v327_v29 = vpop.f32.mrb[2].mxu0 }
  0xf7   : > { %v579_v30 = vpop.f32.mrb[3].mxu0 }
  0xfa   : > { %v391_v32 = vpop.f32.mrb[0].mxu1 }
  0xfb   : > { %v397_v33 = vadd.f32 %v391_v32, %v330_v31  ;;  %v586_v34 = vpop.f32.mrb[1].mxu1 }
  0xfc   : > { %v394_v35 = vpop.f32.mrb[2].mxu1 }
  0xfd   : > { %v587_v36 = vpop.f32.mrb[3].mxu1 }
 0x153   : > { %v457_v37 = vpop.f32.mrb[4].mxu0 }
 0x154   : > { %464 = vrot.lane.b32.xlu1 %v457_v37, %s625_s17  ;;  %v594_v38 = vpop.f32.mrb[5].mxu0 }
 0x155   : > { %v460_v39 = vpop.f32.mrb[6].mxu0 }
 0x156   : > { %v595_v40 = vpop.f32.mrb[7].mxu0 }
 0x1c6   : > { %v465_v41 = vpop.permute.xlu1 %464 }
 0x1c7   : > { %v467_v43 = vsel %vm286_vm7, 0.0, %v465_v41 }
 0x1c8   : > { %v468_v44 = vadd.f32 %v467_v43, %v397_v33 }
 0x1ca   : > { %v476_v45 = vadd.f32 %v560_v42, %v468_v44 }
 0x1cc   : > { %v477_v46 = vpack.c.bf16 %v476_v45, %v476_v45 }
 0x1ce   : > { %479 = vst.msk [vmem:[%s233_s24] sm:$0x3] %vm478_vm8, %v477_v46 }
 0x1cf PF: > { %s15_s18 = sadd.s32 1, %s620_s18  }
 0x1d0   : > { %p12_p4 = scmp.ge.s32.totalorder %s15_s18, 4  }
 0x1d2   :  { %14 = sbr.rel (!%p12_p4) target bundleno = 1 (0x1), region = 73 }

// kernel: tsd_unet_forward.28
= control target key start
LH: loop header
LB: loop body
LE: loop exit
PB: predicated region body
PF: predicated region fallthrough
CT: control target
= control target key end

     0   :  { %s947_s18 = smov 0   ;;  %s1059_s0 = inlined_call_operand.vmem [shape: bf16[2,8,32], index: 0, kind: input, shape index: {}]   ;;  %s1060_s1 = inlined_call_operand.vmem [shape: bf16[2,8,32], index: 1, kind: input, shape index: {}]   ;;  %s1061_s2 = inlined_call_operand.vmem [shape: bf16[192,16], index: 2, kind: input, shape index: {}]   ;;  %s1062_s3 = inlined_call_operand.vmem [shape: f32[1,1,16], index: 3, kind: input, shape index: {}]   ;;  %s1063_s4 = inlined_call_operand.vmem [shape: bf16[2,8,16], index: 4, kind: output, shape index: {0}]   ;;  %s1064_s5 = inlined_call_operand.vmem [shape: f32[2,2,16], index: 5, kind: output, shape index: {1}]  }
   0x1 LB: > { %s785_s19 = sadd.s32 4294967295, %s913_s18   ;;  %p789_p0 = scmp.ge.s32.totalorder %s913_s18, 1  ;;  %s913_s18 = sphi %s947_s18, %s16_s18  }
   0x2   : > { %p198_p1 = scmp.lt.s32.totalorder %s913_s18, 3 }
   0x4   : > { %p199_p2 = pnand %p789_p0, %p198_p1 }
   0x5   : > { %v893_v0 = vld [vmem:[%s1061_s2 + $0x10] sm:$0xff] (!%p199_p2)   ;;  %v915_v1 = vmov (!%p199_p2), 0.0   ;;  %v894_v2 = vld [vmem:[%s1061_s2] sm:$0xff] (!%p199_p2)   ;;  %v895_v3 = vld [vmem:[%s1061_s2 + $0x18] sm:$0xff] (!%p199_p2)   ;;  %vm916_vm0 = vmmov (!%p199_p2), 0   ;;  %p232_p3 = scmp.lt.s32.totalorder (!%p199_p2), %s785_s19, 1 }
   0x6   : > { %202 = sbr.rel (%p199_p2) target bundleno = 279 (0x117), region = 36  ;;  %835 = vmatprep.subr.bf16.mxu0 (!%p199_p2), %v915_v1  ;;  %843 = vmatprep.subr.bf16.mxu1 (!%p199_p2), %v915_v1  ;;  %v896_v4 = vld [vmem:[%s1061_s2 + $0x8] sm:$0xff] (!%p199_p2)   ;;  %vm262_vm1 = vsmask.f32 (!%p199_p2), 256  ;;  %vm261_vm2 = vcmask (!%p199_p2), 1040384   ;;  %vm265_vm3 = vcmask (!%p199_p2), 1044480  }
   0x7   : > { %836 = vmatpush3.bf16.msra.mxu0 (!%p199_p2), %v893_v0  ;;  %839 = vmatprep.mubr.msk.bf16.mxu0 (!%p199_p2), %vm916_vm0, %v915_v1  ;;  %vm266_vm4 = vsmask.f32 (!%p199_p2), 4352  ;;  %vm992_vm5 = vmand (!%p199_p2), %vm261_vm2, %vm262_vm1  ;;  %vm303_vm7 = vcmask (!%p199_p2), 261120   ;;  %v899_v16 = vld [vmem:[%s1061_s2 + $0x30] sm:$0xff] (!%p199_p2)   ;;  %v900_v18 = vld [vmem:[%s1061_s2 + $0x20] sm:$0xff] (!%p199_p2)   ;;  %vm669_vm8 = vcmask (!%p199_p2), 130048  }
   0x8   : > { %844 = vmatpush3.bf16.msra.mxu1 (!%p199_p2), %v894_v2  ;;  %837 = vmatprep.subr.bf16.mxu0 (!%p199_p2), %v915_v1  ;;  %vm267_vm6 = vmand (!%p199_p2), %vm265_vm3, %vm266_vm4  ;;  %v901_v26 = vld [vmem:[%s1061_s2 + $0x38] sm:$0xff] (!%p199_p2)   ;;  %v902_v28 = vld [vmem:[%s1061_s2 + $0x28] sm:$0xff] (!%p199_p2)   ;;  %vm667_vm9 = vcmask (!%p199_p2), 125952   ;;  %vm687_vm10 = vcmask (!%p199_p2), 123904  }
   0x9   : > { %845 = vmatprep.subr.bf16.mxu1 (!%p199_p2), %v915_v1  ;;  %847 = vmatprep.mubr.msk.bf16.mxu1 (!%p199_p2), %vm916_vm0, %v915_v1  ;;  %v903_v32 = vld [vmem:[%s1061_s2 + $0x50] sm:$0xff] (!%p199_p2)   ;;  %v904_v33 = vld [vmem:[%s1061_s2 + $0x40] sm:$0xff] (!%p199_p2)   ;;  %v905_v34 = vld [vmem:[%s1061_s2 + $0x58] sm:$0xff] (!%p199_p2)  }
   0xa   : > { %v906_v35 = vld [vmem:[%s1061_s2 + $0x48] sm:$0xff] (!%p199_p2)   ;;  %v814_v63 = vld [vmem:[%s1062_s3] ss:$0 sm:$0xff] (!%p199_p2) }
   0xb   : > { %838 = vmatpush3.bf16.msra.mxu0 (!%p199_p2), %v895_v3 }
   0xc   : > { %846 = vmatpush3.bf16.msra.mxu1 (!%p199_p2), %v896_v4  ;;  %851 = vmatprep.subr.bf16.mxu0 (!%p199_p2), %v915_v1 }
   0xd   : > { %s1068_s19 = smov (!%p232_p3, %s785_s19), 1  ;;  %859 = vmatprep.subr.bf16.mxu1 %v915_v1 }
   0xe   : > { %s978_s28 = sshll.u32 %s1068_s19, 2 }
   0xf   : > { %s239_s6 = scalar_lea.vmem %s1060_s1, %s978_s28  ;;  %s235_s9 = scalar_lea.vmem %s1059_s0, %s978_s28 }
  0x10   : > { %v897_v5 = vld [vmem:[%s239_s6] ss:$0 sps:$4 sm:$0xff]   ;;  %s243_s8 = scalar_lea.vmem %s1063_s4, %s978_s28 }
  0x11   : > { %v898_v6 = vld [vmem:[%s235_s9] ss:$0 sps:$4 sm:$0xff]   ;;  %v274_v7 = vshrl.u32 %v897_v5, 16  ;;  %v277_v8 = vshll.u32 %v897_v5, 16  ;;  %s793_s9 = sshll.u32 %s1068_s19, 1 }
  0x12   : > { %v254_v9 = vshrl.u32 %v898_v6, 16  ;;  %v257_v10 = vshll.u32 %v898_v6, 16  ;;  %s247_s11 = scalar_lea.vmem %s1064_s5, %s793_s9 }
  0x13   : > { %v276_v12 = vrot.slane %v274_v7, 7 }
  0x14   : > { %v256_v13 = vrot.slane %v254_v9, 7 }
  0x15   : > { %v279_v14 = vor.u32 %v277_v8, %v276_v12 }
  0x16   : > { %v259_v15 = vor.u32 %v257_v10, %v256_v13 }
  0x17   : > { %v281_v17 = vsel %vm992_vm5, 0, %v279_v14 }
  0x18   : > { %v282_v19 = vsel %vm267_vm6, %v281_v17, 0  ;;  %v264_v20 = vsel %vm992_vm5, 0, %v259_v15 }
  0x19   : > { %840 = vmatmul.mubr.msk.bf16.vlgmr.msra.gmra.mrb[0].mxu0 %vm303_vm7, %v282_v19  ;;  %v411_v21 = vshrl.u32 %v282_v19, 16  ;;  %v413_v22 = vshll.u32 %v282_v19, 16  ;;  %v268_v23 = vsel %vm267_vm6, %v264_v20, 0  ;;  %v543_v36 = vrot.slane %v282_v19, 1 }
  0x1a   : > { %848 = vmatmul.mubr.msk.bf16.vlgmr.msra.gmra.mrb[0].mxu1 %vm303_vm7, %v268_v23  ;;  %v472_v24 = vshrl.u32 %v268_v23, 16  ;;  %v474_v25 = vshll.u32 %v268_v23, 16  ;;  %852 = vmatpush3.bf16.msra.mxu0 %v899_v16  ;;  %v600_v37 = vrot.slane %v268_v23, 1 }
  0x1b   : > { %v415_v27 = vrot.slane %v413_v22, 1  ;;  %860 = vmatpush3.bf16.msra.mxu1 %v900_v18  ;;  %853 = vmatprep.subr.bf16.mxu0 %v915_v1 }
  0x1c   : > { %v476_v29 = vrot.slane %v474_v25, 1  ;;  %861 = vmatprep.subr.bf16.mxu1 %v915_v1  ;;  %855 = vmatprep.mubr.msk.bf16.mxu0 %vm916_vm0, %v915_v1 }
  0x1d   : > { %v416_v30 = vor.u32 %v415_v27, %v411_v21  ;;  %863 = vmatprep.mubr.msk.bf16.mxu1 %vm916_vm0, %v915_v1 }
  0x1e   : > { %v477_v31 = vor.u32 %v476_v29, %v472_v24  ;;  %854 = vmatpush3.bf16.msra.mxu0 %v901_v26 }
  0x1f   : > { %862 = vmatpush3.bf16.msra.mxu1 %v902_v28  ;;  %867 = vmatprep.subr.bf16.mxu0 %v915_v1 }
  0x20   : > { %875 = vmatprep.subr.bf16.mxu1 %v915_v1 }
  0x21   : > { %856 = vmatmul.mubr.msk.bf16.vlgmr.msra.gmra.mrb[4].mxu0 %vm303_vm7, %v416_v30 }
  0x22   : > { %864 = vmatmul.mubr.msk.bf16.vlgmr.msra.gmra.mrb[4].mxu1 %vm303_vm7, %v477_v31  ;;  %868 = vmatpush3.bf16.msra.mxu0 %v903_v32 }
  0x23   : > { %876 = vmatpush3.bf16.msra.mxu1 %v904_v33  ;;  %869 = vmatprep.subr.bf16.mxu0 %v915_v1 }
  0x24   : > { %877 = vmatprep.subr.bf16.mxu1 %v915_v1  ;;  %871 = vmatprep.mubr.msk.bf16.mxu0 %vm916_vm0, %v915_v1 }
  0x25   : > { %879 = vmatprep.mubr.msk.bf16.mxu1 %vm916_vm0, %v915_v1 }
  0x26   : > { %870 = vmatpush3.bf16.msra.mxu0 %v905_v34 }
  0x27   : > { %878 = vmatpush3.bf16.msra.mxu1 %v906_v35 }
  0x29   : > { %872 = vmatmul.mubr.msk.bf16.vlgmr.msra.gmra.mrb[8].mxu0 %vm303_vm7, %v543_v36 }
  0x2a   : > { %880 = vmatmul.mubr.msk.bf16.vlgmr.msra.gmra.mrb[8].mxu1 %vm303_vm7, %v600_v37 }
  0xec   : > { %v341_v38 = vpop.f32.mrb[0].mxu0 }
  0xed   : > { %v396_v39 = vpop.f32.mrb[0].mxu1  ;;  %v841_v40 = vpop.f32.mrb[1].mxu0 }
  0xee   : > { %v397_v41 = vadd.f32 %v396_v39, %v341_v38  ;;  %v849_v42 = vpop.f32.mrb[1].mxu1  ;;  %v344_v43 = vpop.f32.mrb[2].mxu0 }
  0xef   : > { %v399_v44 = vpop.f32.mrb[2].mxu1  ;;  %v842_v45 = vpop.f32.mrb[3].mxu0 }
  0xf0   : > { %v850_v46 = vpop.f32.mrb[3].mxu1 }
  0xf4   : > { %v466_v47 = vpop.f32.mrb[4].mxu0 }
  0xf5   : > { %v527_v48 = vpop.f32.mrb[4].mxu1  ;;  %v857_v49 = vpop.f32.mrb[5].mxu0 }
  0xf6   : > { %v528_v50 = vadd.f32 %v527_v48, %v466_v47  ;;  %v865_v51 = vpop.f32.mrb[5].mxu1  ;;  %v469_v52 = vpop.f32.mrb[6].mxu0 }
  0xf7   : > { %v530_v53 = vpop.f32.mrb[6].mxu1  ;;  %v858_v54 = vpop.f32.mrb[7].mxu0 }
  0xf8   : > { %v533_v55 = vadd.f32 %v528_v50, %v397_v41  ;;  %v866_v56 = vpop.f32.mrb[7].mxu1 }
  0xfc   : > { %v593_v57 = vpop.f32.mrb[8].mxu0 }
  0xfd   : > { %v650_v58 = vpop.f32.mrb[8].mxu1  ;;  %v873_v59 = vpop.f32.mrb[9].mxu0 }
  0xfe   : > { %v651_v60 = vadd.f32 %v650_v58, %v593_v57  ;;  %v881_v61 = vpop.f32.mrb[9].mxu1  ;;  %v596_v62 = vpop.f32.mrb[10].mxu0 }
  0xff   : > { %v653_v0 = vpop.f32.mrb[10].mxu1  ;;  %v874_v1 = vpop.f32.mrb[11].mxu0 }
 0x100   : > { %v656_v2 = vadd.f32 %v651_v60, %v533_v55  ;;  %v882_v3 = vpop.f32.mrb[11].mxu1 }
 0x102   : > { %v664_v4 = vadd.f32 %v814_v63, %v656_v2 }
 0x104   : > { %v665_v5 = vmax.f32 %v664_v4, 0.0 }
 0x106   : > { %v666_v6 = vpack.c.bf16 %v665_v5, %v665_v5  ;;  %v670_v7 = vsel %vm669_vm8, %v665_v5, 0.0  ;;  %v677_v8 = vmul.f32 %v665_v5, %v665_v5 }
 0x107   : > { %v671_v9 = vrot.slane %v670_v7, 4 }
 0x108   : > { %668 = vst.msk [vmem:[%s243_s8] sm:$0xf] %vm667_vm9, %v666_v6  ;;  %v678_v10 = vsel %vm669_vm8, %v677_v8, 0.0 }
 0x109   : > { %v672_v11 = vadd.f32 %v671_v9, %v670_v7  ;;  %v679_v12 = vrot.slane %v678_v10, 4 }
 0x10b   : > { %v673_v13 = vrot.slane %v672_v11, 2  ;;  %v680_v14 = vadd.f32 %v679_v12, %v678_v10 }
 0x10d   : > { %v674_v15 = vadd.f32 %v673_v13, %v672_v11  ;;  %v681_v16 = vrot.slane %v680_v14, 2 }
 0x10f   : > { %v675_v17 = vrot.slane %v674_v15, 1  ;;  %v682_v18 = vadd.f32 %v681_v16, %v680_v14 }
 0x111   : > { %v683_v19 = vrot.slane %v682_v18, 1  ;;  %v676_v20 = vadd.f32 %v675_v17, %v674_v15 }
 0x113   : > { %v684_v21 = vadd.f32 %v683_v19, %v682_v18 }
 0x115   : > { %v686_v22 = vsel %vm261_vm2, %v676_v20, %v684_v21 }
 0x116   : > { %688 = vst.msk [vmem:[%s247_s11] sm:$0x3] %vm687_vm10, %v686_v22 }
 0x117 PF: > { %s16_s18 = sadd.s32 1, %s913_s18  }
 0x118   : > { %p13_p4 = scmp.ge.s32.totalorder %s16_s18, 4  }
 0x11a   :  { %15 = sbr.rel (!%p13_p4) target bundleno = 1 (0x1), region = 81 }

// kernel: tsd_unet_forward.29
= control target key start
LH: loop header
LB: loop body
LE: loop exit
PB: predicated region body
PF: predicated region fallthrough
CT: control target
= control target key end

     0   :  { %s696_s21 = smov 0   ;;  %s753_s0 = inlined_call_operand.vmem [shape: bf16[2,8,16], index: 0, kind: input, shape index: {}]   ;;  %s754_s1 = inlined_call_operand.vmem [shape: bf16[48,16], index: 1, kind: input, shape index: {}]   ;;  %s755_s2 = inlined_call_operand.vmem [shape: f32[1,1,16], index: 2, kind: input, shape index: {}]   ;;  %s756_s3 = inlined_call_operand.vmem [shape: f32[1,1,16], index: 3, kind: input, shape index: {}]   ;;  %s757_s4 = inlined_call_operand.vmem [shape: f32[2,1,16], index: 4, kind: input, shape index: {}]   ;;  %s758_s5 = inlined_call_operand.vmem [shape: bf16[2,8,16], index: 5, kind: output, shape index: {0}]   ;;  %s759_s6 = inlined_call_operand.vmem [shape: f32[2,2,16], index: 6, kind: output, shape index: {1}]  }
   0x1 LB: > { %s595_s22 = sadd.s32 4294967295, %s657_s21   ;;  %p599_p0 = scmp.ge.s32.totalorder %s657_s21, 1  ;;  %s657_s21 = sphi %s696_s21, %s17_s21  }
   0x2   : > { %p222_p1 = scmp.lt.s32.totalorder %s657_s21, 3 }
   0x4   : > { %p223_p2 = pnand %p599_p0, %p222_p1 }
   0x5   : > { %v648_v0 = vld [vmem:[%s754_s1 + $0x8] sm:$0xff] (!%p223_p2)   ;;  %v659_v1 = vmov (!%p223_p2), 0.0   ;;  %v649_v2 = vld [vmem:[%s754_s1] sm:$0xff] (!%p223_p2)   ;;  %vm660_vm0 = vmmov (!%p223_p2), 0   ;;  %p257_p3 = scmp.lt.s32.totalorder (!%p223_p2), %s595_s22, 1  ;;  %vm300_vm1 = vcmask (!%p223_p2), 1040384  }
   0x6   : > { %226 = sbr.rel (%p223_p2) target bundleno = 282 (0x11a), region = 40  ;;  %620 = vmatprep.subr.bf16.mxu0 (!%p223_p2), %v659_v1  ;;  %626 = vmatprep.subr.bf16.mxu1 (!%p223_p2), %v659_v1  ;;  %v603_v4 = vld [vmem:[%s756_s3] ss:$0 sm:$0xff] (!%p223_p2)  ;;  %vm301_vm2 = vsmask.f32 (!%p223_p2), 256  ;;  %vm304_vm3 = vcmask (!%p223_p2), 1044480  }
   0x7   : > { %621 = vmatpush3.bf16.msra.mxu0 (!%p223_p2), %v648_v0  ;;  %622 = vmatprep.mubr.msk.bf16.mxu0 (!%p223_p2), %vm660_vm0, %v659_v1  ;;  %vm305_vm4 = vsmask.f32 (!%p223_p2), 4352  ;;  %vm302_vm5 = vmand (!%p223_p2), %vm300_vm1, %vm301_vm2  ;;  %vm325_vm7 = vcmask (!%p223_p2), 130048   ;;  %v650_v19 = vld [vmem:[%s754_s1 + $0x10] sm:$0xff] (!%p223_p2)   ;;  %v611_v32 = vld [vmem:[%s755_s2] ss:$0 sm:$0xff] (!%p223_p2) }
   0x8   : > { %627 = vmatpush3.bf16.msra.mxu1 (!%p223_p2), %v649_v2  ;;  %628 = vmatprep.mubr.msk.bf16.mxu1 (!%p223_p2), %vm660_vm0, %v659_v1  ;;  %vm306_vm6 = vmand (!%p223_p2), %vm304_vm3, %vm305_vm4  ;;  %vm481_vm8 = vcmask (!%p223_p2), 125952   ;;  %vm500_vm9 = vcmask (!%p223_p2), 123904  }
   0x9   : > { %632 = vmatprep.subr.bf16.mxu0 (!%p223_p2), %v659_v1 }
   0xd   : > { %s761_s22 = smov (!%p257_p3, %s595_s22), 1 }
   0xe   : > { %s600_s27 = sshll.u32 %s761_s22, 2  ;;  %s263_s9 = scalar_lea.vmem %s757_s4, %s761_s22 }
   0xf   : > { %s260_s30 = scalar_lea.vmem %s753_s0, %s600_s27  ;;  %v604_v6 = vld [vmem:[%s263_s9] ss:$0 sm:$0xff]  ;;  %s267_s18 = scalar_lea.vmem %s758_s5, %s600_s27 }
  0x10   : > { %v273_v3 = vld [vmem:[%s260_s30] sm:$0xf]  ;;  %s602_s19 = sshll.u32 %s761_s22, 1 }
  0x11   : > { %v274_v5 = vunpack.c.l.bf16 %v273_v3  ;;  %s271_s24 = scalar_lea.vmem %s759_s6, %s602_s19 }
  0x13   : > { %v282_v7 = vmul.f32 %v603_v4, %v274_v5 }
  0x15   : > { %v290_v8 = vadd.f32 %v604_v6, %v282_v7 }
  0x17   : > { %v291_v9 = vpack.c.bf16 %v290_v8, %v290_v8 }
  0x19   : > { %v293_v10 = vshrl.u32 %v291_v9, 16  ;;  %v296_v11 = vshll.u32 %v291_v9, 16 }
  0x1b   : > { %v295_v12 = vrot.slane %v293_v10, 7 }
  0x1d   : > { %v298_v13 = vor.u32 %v296_v11, %v295_v12 }
  0x1f   : > { %v303_v14 = vsel %vm302_vm5, 0, %v298_v13 }
  0x20   : > { %v307_v15 = vsel %vm306_vm6, %v303_v14, 0 }
  0x21   : > { %v313_v16 = vshrl.u32 %v307_v15, 16  ;;  %v315_v17 = vshll.u32 %v307_v15, 16  ;;  %629 = vmatmul.mubr.msk.bf16.vlgmr.msra.gmra.mrb[0].mxu1 %vm325_vm7, %v307_v15  ;;  %v420_v21 = vrot.slane %v307_v15, 1 }
  0x23   : > { %v317_v18 = vrot.slane %v315_v17, 1 }
  0x25   : > { %v318_v20 = vor.u32 %v317_v18, %v313_v16 }
  0x27   : > { %623 = vmatmul.mubr.msk.bf16.vlgmr.msra.gmra.mrb[0].mxu0 %vm325_vm7, %v318_v20 }
  0x28   : > { %633 = vmatpush3.bf16.msra.mxu0 %v650_v19  ;;  %634 = vmatprep.mubr.msk.bf16.mxu0 %vm660_vm0, %v659_v1 }
  0x2f   : > { %635 = vmatmul.mubr.msk.bf16.vlgmr.msra.gmra.mrb[4].mxu0 %vm325_vm7, %v420_v21 }
  0xf4   : > { %v411_v22 = vpop.f32.mrb[0].mxu1 }
  0xf5   : > { %v630_v23 = vpop.f32.mrb[1].mxu1 }
  0xf6   : > { %v414_v24 = vpop.f32.mrb[2].mxu1 }
  0xf7   : > { %v631_v25 = vpop.f32.mrb[3].mxu1 }
  0xfa   : > { %v363_v26 = vpop.f32.mrb[0].mxu0 }
  0xfb   : > { %v412_v27 = vadd.f32 %v411_v22, %v363_v26  ;;  %v624_v28 = vpop.f32.mrb[1].mxu0 }
  0xfc   : > { %v366_v29 = vpop.f32.mrb[2].mxu0 }
  0xfd   : > { %v625_v30 = vpop.f32.mrb[3].mxu0 }
 0x102   : > { %v464_v31 = vpop.f32.mrb[4].mxu0 }
 0x103   : > { %v470_v33 = vadd.f32 %v464_v31, %v412_v27  ;;  %v636_v34 = vpop.f32.mrb[5].mxu0 }
 0x104   : > { %v467_v35 = vpop.f32.mrb[6].mxu0 }
 0x105   : > { %v478_v36 = vadd.f32 %v611_v32, %v470_v33  ;;  %v637_v37 = vpop.f32.mrb[7].mxu0 }
 0x107   : > { %v479_v38 = vmax.f32 %v478_v36, 0.0 }
 0x109   : > { %v480_v39 = vpack.c.bf16 %v479_v38, %v479_v38  ;;  %v483_v40 = vsel %vm325_vm7, %v479_v38, 0.0  ;;  %v490_v41 = vmul.f32 %v479_v38, %v479_v38 }
 0x10a   : > { %v484_v42 = vrot.slane %v483_v40, 4 }
 0x10b   : > { %482 = vst.msk [vmem:[%s267_s18] sm:$0xf] %vm481_vm8, %v480_v39  ;;  %v491_v43 = vsel %vm325_vm7, %v490_v41, 0.0 }
 0x10c   : > { %v485_v44 = vadd.f32 %v484_v42, %v483_v40  ;;  %v492_v45 = vrot.slane %v491_v43, 4 }
 0x10e   : > { %v486_v46 = vrot.slane %v485_v44, 2  ;;  %v493_v47 = vadd.f32 %v492_v45, %v491_v43 }
 0x110   : > { %v487_v48 = vadd.f32 %v486_v46, %v485_v44  ;;  %v494_v49 = vrot.slane %v493_v47, 2 }
 0x112   : > { %v488_v50 = vrot.slane %v487_v48, 1  ;;  %v495_v51 = vadd.f32 %v494_v49, %v493_v47 }
 0x114   : > { %v496_v52 = vrot.slane %v495_v51, 1  ;;  %v489_v53 = vadd.f32 %v488_v50, %v487_v48 }
 0x116   : > { %v497_v54 = vadd.f32 %v496_v52, %v495_v51 }
 0x118   : > { %v499_v55 = vsel %vm300_vm1, %v489_v53, %v497_v54 }
 0x119   : > { %501 = vst.msk [vmem:[%s271_s24] sm:$0x3] %vm500_vm9, %v499_v55 }
 0x11a PF: > { %s17_s21 = sadd.s32 1, %s657_s21  }
 0x11b   : > { %p14_p4 = scmp.ge.s32.totalorder %s17_s21, 4  }
 0x11d   :  { %16 = sbr.rel (!%p14_p4) target bundleno = 1 (0x1), region = 85 }

// kernel: tsd_unet_forward.31
= control target key start
LH: loop header
LB: loop body
LE: loop exit
PB: predicated region body
PF: predicated region fallthrough
CT: control target
= control target key end

     0   :  { %s364_s12 = smov 0   ;;  %s387_s0 = inlined_call_operand.vmem [shape: bf16[2,16,16], index: 0, kind: input, shape index: {}]   ;;  %s388_s1 = inlined_call_operand.vmem [shape: bf16[16,4], index: 1, kind: input, shape index: {}]   ;;  %s389_s2 = inlined_call_operand.vmem [shape: f32[1,1,4], index: 2, kind: input, shape index: {}]   ;;  %s390_s3 = inlined_call_operand.vmem [shape: f32[2,16,4], index: 3, kind: output, shape index: {}]  }
   0x1 LB: > { %s297_s13 = sadd.s32 4294967295, %s340_s12   ;;  %p301_p0 = scmp.ge.s32.totalorder %s340_s12, 1  ;;  %s340_s12 = sphi %s364_s12, %s13_s12  }
   0x2   : > { %p137_p1 = scmp.lt.s32.totalorder %s340_s12, 3 }
   0x4   : > { %p138_p2 = pnand %p301_p0, %p137_p1 }
   0x5   : > { %v332_v0 = vld [vmem:[%s388_s1] sm:$0xff] (!%p138_p2)   ;;  %v342_v1 = vmov (!%p138_p2), 0.0   ;;  %p161_p3 = scmp.lt.s32.totalorder (!%p138_p2), %s297_s13, 1  ;;  %vm343_vm0 = vmmov (!%p138_p2), 0   ;;  %vm194_vm1 = vcmask (!%p138_p2), 130048   ;;  %vm239_vm2 = vcmask (!%p138_p2), 31744  }
   0x6   : > { %141 = sbr.rel (%p138_p2) target bundleno = 234 (0xea), region = 32  ;;  %316 = vmatprep.subr.bf16.mxu0 (!%p138_p2), %v342_v1  ;;  %318 = vmatprep.mubr.msk.bf16.mxu0 (!%p138_p2), %vm343_vm0, %v342_v1  ;;  %v306_v3 = vld [vmem:[%s389_s2] ss:$0 sm:$0xff] (!%p138_p2) }
   0x7   : > { %317 = vmatpush3.bf16.msra.mxu0 (!%p138_p2), %v332_v0 }
   0xd   : > { %s392_s13 = smov (!%p161_p3, %s297_s13), 1 }
   0xe   : > { %s312_s16 = sshll.u32 %s392_s13, 3  ;;  %s313_s20 = sshll.u32 %s392_s13, 4 }
   0xf   : > { %s165_s19 = scalar_lea.vmem %s387_s0, %s312_s16  ;;  %s170_s25 = scalar_lea.vmem %s390_s3, %s313_s20 }
  0x10   : > { %v333_v2 = vld [vmem:[%s165_s19] sm:$0xff]  }
  0x11   : > { %319 = vmatmul.mubr.msk.bf16.vlgmr.msra.gmra.mrb[0].mxu0 %vm194_vm1, %v333_v2 }
  0xe4   : > { %v232_v4 = vpop.f32.mrb[0].mxu0 }
  0xe5   : > { %v233_v5 = vadd.f32 %v306_v3, %v232_v4  ;;  %v320_v6 = vpop.f32.mrb[1].mxu0 }
  0xe6   : > { %v235_v7 = vpop.f32.mrb[2].mxu0 }
  0xe7   : > { %240 = vst.msk [vmem:[%s170_s25] sm:$0xff] %vm239_vm2, %v233_v5  ;;  %v236_v8 = vadd.f32 %v306_v3, %v235_v7  ;;  %v321_v9 = vpop.f32.mrb[3].mxu0 }
  0xe9   : > { %241 = vst.msk [vmem:[%s170_s25 + $0x8] sm:$0xff] %vm239_vm2, %v236_v8 }
  0xea PF: > { %s13_s12 = sadd.s32 1, %s340_s12  }
  0xeb   : > { %p10_p4 = scmp.ge.s32.totalorder %s13_s12, 4  }
  0xed   :  { %12 = sbr.rel (!%p10_p4) target bundleno = 1 (0x1), region = 62 }

// kernel: tsd_unet_forward.30
= control target key start
LH: loop header
LB: loop body
LE: loop exit
PB: predicated region body
PF: predicated region fallthrough
CT: control target
= control target key end

     0   :  { %s615_s18 = smov 0   ;;  %s666_s0 = inlined_call_operand.vmem [shape: bf16[2,8,16], index: 0, kind: input, shape index: {}]   ;;  %s667_s1 = inlined_call_operand.vmem [shape: bf16[48,32], index: 1, kind: input, shape index: {}]   ;;  %s668_s2 = inlined_call_operand.vmem [shape: f32[1,1,32], index: 2, kind: input, shape index: {}]   ;;  %s669_s3 = inlined_call_operand.vmem [shape: f32[1,1,16], index: 3, kind: input, shape index: {}]   ;;  %s670_s4 = inlined_call_operand.vmem [shape: f32[2,1,16], index: 4, kind: input, shape index: {}]   ;;  %s671_s5 = inlined_call_operand.vmem [shape: bf16[2,8,32], index: 5, kind: output, shape index: {}]  }
   0x1 LB: > { %s516_s19 = sadd.s32 4294967295, %s579_s18   ;;  %p520_p0 = scmp.ge.s32.totalorder %s579_s18, 1  ;;  %s579_s18 = sphi %s615_s18, %s15_s18  }
   0x2   : > { %p194_p1 = scmp.lt.s32.totalorder %s579_s18, 3 }
   0x4   : > { %p195_p2 = pnand %p520_p0, %p194_p1 }
   0x5   : > { %v570_v0 = vld [vmem:[%s667_s1 + $0x10] sm:$0xff] (!%p195_p2)   ;;  %v571_v1 = vld [vmem:[%s667_s1] sm:$0xff] (!%p195_p2)   ;;  %s581_s24 = smov (!%p195_p2), 112   ;;  %v582_v2 = vmov (!%p195_p2), 0.0   ;;  %p223_p3 = scmp.lt.s32.totalorder (!%p195_p2), %s516_s19, 1  ;;  %vm583_vm0 = vmmov (!%p195_p2), 0  }
   0x6   : > { %198 = sbr.rel (%p195_p2) target bundleno = 459 (0x1cb), region = 40  ;;  %391 = vrot.lane.b32.xlu0 (!%p195_p2), %v570_v0, %s581_s24  ;;  %540 = vmatprep.subr.bf16.mxu0 (!%p195_p2), %v582_v2  ;;  %v572_v3 = vld [vmem:[%s667_s1 + $0x8] sm:$0xff] (!%p195_p2)   ;;  %v523_v5 = vld [vmem:[%s669_s3] ss:$0 sm:$0xff] (!%p195_p2)  ;;  %vm262_vm1 = vcmask (!%p195_p2), 1040384   ;;  %vm266_vm3 = vcmask (!%p195_p2), 1044480  }
   0x7   : > { %541 = vmatpush3.bf16.msra.mxu0 (!%p195_p2), %v571_v1  ;;  %542 = vmatprep.mubr.msk.bf16.mxu0 (!%p195_p2), %vm583_vm0, %v582_v2  ;;  %vm263_vm2 = vsmask.f32 (!%p195_p2), 256  ;;  %vm267_vm4 = vsmask.f32 (!%p195_p2), 4352  ;;  %vm278_vm7 = vcmask (!%p195_p2), 130048   ;;  %s584_s11 = smov (!%p195_p2), 16  }
   0x8   : > { %546 = vmatprep.subr.bf16.mxu1 (!%p195_p2), %v582_v2  ;;  %552 = vmatprep.subr.bf16.mxu0 (!%p195_p2), %v582_v2  ;;  %vm264_vm5 = vmand (!%p195_p2), %vm262_vm1, %vm263_vm2  ;;  %v531_v38 = vld [vmem:[%s668_s2] ss:$0 sm:$0xff] (!%p195_p2)  ;;  %vm452_vm8 = vcmask (!%p195_p2), 257024  }
   0x9   : > { %547 = vmatpush3.bf16.msra.mxu1 (!%p195_p2), %v572_v3  ;;  %548 = vmatprep.mubr.msk.bf16.mxu1 (!%p195_p2), %vm583_vm0, %v582_v2  ;;  %vm268_vm6 = vmand (!%p195_p2), %vm266_vm3, %vm267_vm4 }
   0xd   : > { %s673_s19 = smov (!%p223_p3, %s516_s19), 1 }
   0xe   : > { %s521_s27 = sshll.u32 %s673_s19, 2  ;;  %s229_s8 = scalar_lea.vmem %s670_s4, %s673_s19 }
   0xf   : > { %s226_s30 = scalar_lea.vmem %s666_s0, %s521_s27  ;;  %v524_v7 = vld [vmem:[%s229_s8] ss:$0 sm:$0xff]  ;;  %s233_s16 = scalar_lea.vmem %s671_s5, %s521_s27 }
  0x10   : > { %v235_v4 = vld [vmem:[%s226_s30] sm:$0xf] }
  0x11   : > { %v236_v6 = vunpack.c.l.bf16 %v235_v4 }
  0x13   : > { %v244_v8 = vmul.f32 %v523_v5, %v236_v6 }
  0x15   : > { %v252_v9 = vadd.f32 %v524_v7, %v244_v8 }
  0x17   : > { %v253_v10 = vpack.c.bf16 %v252_v9, %v252_v9 }
  0x19   : > { %v255_v11 = vshrl.u32 %v253_v10, 16  ;;  %v258_v12 = vshll.u32 %v253_v10, 16 }
  0x1b   : > { %v257_v13 = vrot.slane %v255_v11, 7 }
  0x1d   : > { %v260_v14 = vor.u32 %v258_v12, %v257_v13 }
  0x1f   : > { %v265_v15 = vsel %vm264_vm5, 0, %v260_v14 }
  0x20   : > { %v269_v16 = vsel %vm268_vm6, %v265_v15, 0 }
  0x21   : > { %543 = vmatmul.mubr.msk.bf16.vlgmr.msra.gmra.mrb[0].mxu0 %vm278_vm7, %v269_v16  ;;  %v326_v17 = vshrl.u32 %v269_v16, 16  ;;  %v328_v18 = vshll.u32 %v269_v16, 16  ;;  %v385_v21 = vrot.slane %v269_v16, 1 }
  0x22   : > { %554 = vmatprep.mubr.msk.bf16.mxu0 %vm583_vm0, %v582_v2 }
  0x23   : > { %v330_v19 = vrot.slane %v328_v18, 1 }
  0x25   : > { %v331_v20 = vor.u32 %v330_v19, %v326_v17 }
  0x27   : > { %549 = vmatmul.mubr.msk.bf16.vlgmr.msra.gmra.mrb[0].mxu1 %vm278_vm7, %v331_v20 }
  0x78   : > { %v392_v22 = vpop.permute.xlu0 %391 }
  0x79   : > { %553 = vmatpush3.bf16.msra.mxu0 %v392_v22 }
  0x7c   : > { %555 = vmatmul.mubr.msk.bf16.vlgmr.msra.gmra.mrb[4].mxu0 %vm278_vm7, %v385_v21 }
  0xf4   : > { %v316_v23 = vpop.f32.mrb[0].mxu0 }
  0xf5   : > { %v544_v24 = vpop.f32.mrb[1].mxu0  ;;  %v322_v27 = vsel %vm278_vm7, %v316_v23, 0.0 }
  0xf6   : > { %v319_v25 = vpop.f32.mrb[2].mxu0 }
  0xf7   : > { %v545_v26 = vpop.f32.mrb[3].mxu0 }
  0xfa   : > { %v375_v28 = vpop.f32.mrb[0].mxu1 }
  0xfb   : > { %v381_v29 = vadd.f32 %v375_v28, %v322_v27  ;;  %v550_v30 = vpop.f32.mrb[1].mxu1 }
  0xfc   : > { %v378_v31 = vpop.f32.mrb[2].mxu1 }
  0xfd   : > { %v551_v32 = vpop.f32.mrb[3].mxu1 }
 0x14f   : > { %v431_v33 = vpop.f32.mrb[4].mxu0 }
 0x150   : > { %438 = vrot.lane.b32.xlu0 %v431_v33, %s584_s11  ;;  %v556_v34 = vpop.f32.mrb[5].mxu0 }
 0x151   : > { %v434_v35 = vpop.f32.mrb[6].mxu0 }
 0x152   : > { %v557_v36 = vpop.f32.mrb[7].mxu0 }
 0x1c2   : > { %v439_v37 = vpop.permute.xlu0 %438 }
 0x1c3   : > { %v441_v39 = vsel %vm278_vm7, 0.0, %v439_v37 }
 0x1c4   : > { %v442_v40 = vadd.f32 %v441_v39, %v381_v29 }
 0x1c6   : > { %v450_v41 = vadd.f32 %v531_v38, %v442_v40 }
 0x1c8   : > { %v451_v42 = vpack.c.bf16 %v450_v41, %v450_v41 }
 0x1ca   : > { %453 = vst.msk [vmem:[%s233_s16] sm:$0xf] %vm452_vm8, %v451_v42 }
 0x1cb PF: > { %s15_s18 = sadd.s32 1, %s579_s18  }
 0x1cc   : > { %p12_p4 = scmp.ge.s32.totalorder %s15_s18, 4  }
 0x1ce   :  { %14 = sbr.rel (!%p12_p4) target bundleno = 1 (0x1), region = 73 }

</bundles_post_ra>
